<compile_context>
chip_gen: v7x
topology: tpu7x:2x2x1
jax: 0.10.0
libtpu: 0.0.40
codegen_flags: <defaults>
</compile_context>

<pallas_src>
import functools
import math

import jax
import jax.numpy as jnp
from jax.experimental import pallas as pl
from jax.experimental.pallas import tpu as pltpu

EPS = 1e-5  # PyTorch LayerNorm default eps


def _layernorm(x, g, b):
    mu = jnp.mean(x, axis=-1, keepdims=True)
    xc = x - mu
    var = jnp.mean(xc * xc, axis=-1, keepdims=True)
    return xc * jax.lax.rsqrt(var + EPS) * g + b


def _gelu_exact(x):
    # PyTorch activation='gelu' in TransformerEncoderLayer uses exact (erf) GELU.
    return 0.5 * x * (1.0 + jax.lax.erf(x * (1.0 / math.sqrt(2.0))))


def encoder_layer_kernel(x_ref,
                         wqkv_ref, bqkv_ref, wo_ref, bo_ref,
                         g1_ref, b1_ref,
                         w1_ref, bf1_ref, w2_ref, bf2_ref,
                         g2_ref, b2_ref,
                         *rest, num_heads, apply_final_norm):
    if apply_final_norm:
        gf_ref, bf_ref, o_ref, attn_scratch = rest
    else:
        o_ref, attn_scratch = rest

    BB, S, D = x_ref.shape                      # block: (batch_tile, seq, dim)
    R = BB * S
    H = num_heads
    dh = D // H

    x = x_ref[...].reshape(R, D)                # dense f32 (rows, D) slab
    x_bf = x.astype(jnp.bfloat16)

    # ---- multi-head self attention --------------------------------------
    # Fused QKV projection: single (R,D) x (D,3D) bf16 matmul (K=D lane-dense).
    # 1/sqrt(dh) is pre-folded into the Q columns of wqkv/bqkv on the host.
    qkv = jnp.dot(x_bf, wqkv_ref[...],
                  preferred_element_type=jnp.float32) + bqkv_ref[...]

    # Per-head attention; head outputs are lane-concatenated into a bf16 scratch
    # so the output projection is a single full-width (R,D) x (D,D) matmul.
    for h in range(H):                          # static loop; stores bound live ranges
        qh = qkv[:, h * dh:(h + 1) * dh].reshape(BB, S, dh).astype(jnp.bfloat16)
        kh = qkv[:, D + h * dh:D + (h + 1) * dh].reshape(BB, S, dh).astype(jnp.bfloat16)
        vh = qkv[:, 2 * D + h * dh:2 * D + (h + 1) * dh].reshape(BB, S, dh).astype(jnp.bfloat16)
        s = jnp.einsum('bqd,bkd->bqk', qh, kh,
                       preferred_element_type=jnp.float32)
        s = s - jnp.max(s, axis=-1, keepdims=True)          # softmax in f32
        p = jnp.exp(s)
        p = p * pl.reciprocal(jnp.sum(p, axis=-1, keepdims=True), approx=True)
        oh = jnp.einsum('bqk,bkd->bqd', p.astype(jnp.bfloat16), vh,
                        preferred_element_type=jnp.float32)
        attn_scratch[:, h * dh:(h + 1) * dh] = oh.reshape(R, dh).astype(jnp.bfloat16)

    # Fused output projection.
    attn = jnp.dot(attn_scratch[...], wo_ref[...],
                   preferred_element_type=jnp.float32) + bo_ref[...]

    # TODO(synk): attention masks / key_padding_mask are not modeled (the reference
    # module never passes a mask); dropout = identity (eval mode).
    x = _layernorm(x + attn, g1_ref[...], b1_ref[...])

    # ---- feed-forward (exact-erf GELU MLP), tiled over Dff -----------------
    Dff = w1_ref.shape[1]
    ff_chunk = Dff if Dff <= 1024 else (1024 if Dff % 1024 == 0 else Dff)
    x_ffn_bf = x.astype(jnp.bfloat16)
    h2 = jnp.zeros((R, D), jnp.float32)
    for c0 in range(0, Dff, ff_chunk):          # single chunk at small Dff
        h1c = jnp.dot(x_ffn_bf, w1_ref[:, c0:c0 + ff_chunk],
                      preferred_element_type=jnp.float32) + bf1_ref[:, c0:c0 + ff_chunk]
        h1c = _gelu_exact(h1c)
        h2 = h2 + jnp.dot(h1c.astype(jnp.bfloat16), w2_ref[c0:c0 + ff_chunk, :],
                          preferred_element_type=jnp.float32)
    h2 = h2 + bf2_ref[...]

    x = _layernorm(x + h2, g2_ref[...], b2_ref[...])

    if apply_final_norm:                        # fused final LayerNorm (last layer)
        x = _layernorm(x, gf_ref[...], bf_ref[...])

    o_ref[...] = x.reshape(BB, S, D)


def _const_spec(arr, single_buffer):
    # Untiled constant operand: full array, same block every grid step.
    nd = arr.ndim
    if single_buffer:
        # Index map never changes -> single-buffer to avoid duplicating weights in VMEM.
        return pl.BlockSpec(arr.shape, lambda i, _nd=nd: (0,) * _nd,
                            pipeline_mode=pl.Buffered(1))
    return pl.BlockSpec(arr.shape, lambda i, _nd=nd: (0,) * _nd)


def _vmem_limit_bytes():
    # Generation-aware VMEM budget: ~75% of physical capacity
    # (~96 MiB on 128 MiB v5e/v6e parts, ~48 MiB on 64 MiB v7x).
    try:
        cap = pltpu.get_tpu_info().vmem_capacity_bytes
    except Exception:
        cap = 128 * 1024 * 1024
    return int(cap) * 3 // 4


def run_encoder_layer(x, p, num_heads, *, final_norm=None, batch_block=None):
    B, S, D = x.shape
    if batch_block is None:
        # Guarantee >= 2 parallel grid steps when possible (v7x has 2 TensorCores).
        bb = B // 2 if (B >= 2 and B % 2 == 0) else B
    else:
        bb = batch_block
    assert B % bb == 0, "batch_block must divide batch"
    assert D % num_heads == 0, "embedding_dim must be divisible by num_heads"

    apply_final = final_norm is not None
    weights = [p["wqkv"], p["bqkv"], p["wo"], p["bo"],
               p["g1"], p["b1"],
               p["w1"], p["bf1"], p["w2"], p["bf2"],
               p["g2"], p["b2"]]
    if apply_final:
        weights += [final_norm[0], final_norm[1]]

    def _call(single_buffer):
        in_specs = [pl.BlockSpec((bb, S, D), lambda i: (i, 0, 0))]
        in_specs += [_const_spec(w, single_buffer) for w in weights]
        return pl.pallas_call(
            functools.partial(encoder_layer_kernel, num_heads=num_heads,
                              apply_final_norm=apply_final),
            out_shape=jax.ShapeDtypeStruct((B, S, D), jnp.float32),
            grid=(B // bb,),
            in_specs=in_specs,
            out_specs=pl.BlockSpec((bb, S, D), lambda i: (i, 0, 0)),
            scratch_shapes=[pltpu.VMEM((bb * S, D), jnp.bfloat16)],
            compiler_params=pltpu.CompilerParams(
                dimension_semantics=("parallel",),
                vmem_limit_bytes=_vmem_limit_bytes()),
        )(x, *weights)

    try:
        return _call(True)
    except Exception:
        # TODO(synk): drop fallback once pl.Buffered(1) is guaranteed on all jax versions.
        return _call(False)


def init_torch_layout_params(key, D, num_layers, mlp_ratio):
    """Random parameters in the same layout PyTorch's TransformerEncoderLayer uses."""
    Dff = mlp_ratio * D
    layers = []
    for _ in range(num_layers):
        key, k1, k2, k3, k4, k5, k6 = jax.random.split(key, 7)
        layers.append(dict(
            in_proj_w=0.02 * jax.random.normal(k1, (3 * D, D), jnp.float32),
            in_proj_b=0.02 * jax.random.normal(k2, (3 * D,), jnp.float32),
            out_proj_w=0.02 * jax.random.normal(k3, (D, D), jnp.float32),
            out_proj_b=jnp.zeros((D,), jnp.float32),
            ln1_g=jnp.ones((D,), jnp.float32), ln1_b=jnp.zeros((D,), jnp.float32),
            lin1_w=0.02 * jax.random.normal(k4, (Dff, D), jnp.float32),
            lin1_b=0.02 * jax.random.normal(k5, (Dff,), jnp.float32),
            lin2_w=0.02 * jax.random.normal(k6, (D, Dff), jnp.float32),
            lin2_b=jnp.zeros((D,), jnp.float32),
            ln2_g=jnp.ones((D,), jnp.float32), ln2_b=jnp.zeros((D,), jnp.float32),
        ))
    final = dict(g=jnp.ones((D,), jnp.float32), b=jnp.zeros((D,), jnp.float32))
    return layers, final


def convert_layer_params(tp, num_heads):
    """Host-side layout conversion (free): pre-transpose the weights (no in-kernel
    transposes), fuse QKV, fold the 1/sqrt(dh) scale into the Q projection, and
    cast matmul weights to bf16."""
    D = tp["out_proj_w"].shape[0]
    dh = D // num_heads
    scale = 1.0 / math.sqrt(dh)

    wqkv = tp["in_proj_w"].T                      # (D_in, 3*D_out): qkv = x @ W^T
    bqkv = tp["in_proj_b"]                        # (3*D,)
    wqkv = wqkv.at[:, :D].multiply(scale)         # fold attention scale into Q
    bqkv = bqkv.at[:D].multiply(scale)

    return dict(
        wqkv=wqkv.astype(jnp.bfloat16),           # (D, 3D)
        bqkv=bqkv.reshape(1, 3 * D).astype(jnp.float32),
        wo=tp["out_proj_w"].T.astype(jnp.bfloat16),   # (D, D)
        bo=tp["out_proj_b"].reshape(1, D),
        g1=tp["ln1_g"].reshape(1, D), b1=tp["ln1_b"].reshape(1, D),
        w1=tp["lin1_w"].T.astype(jnp.bfloat16),   # (D, Dff)
        bf1=tp["lin1_b"].reshape(1, -1),
        w2=tp["lin2_w"].T.astype(jnp.bfloat16),   # (Dff, D)
        bf2=tp["lin2_b"].reshape(1, D),
        g2=tp["ln2_g"].reshape(1, D), b2=tp["ln2_b"].reshape(1, D),
    )


def transformer_encoder(x, layer_params, final_params, num_heads, batch_block=None):
    n = len(layer_params)
    gf = final_params["g"].reshape(1, -1)
    bf = final_params["b"].reshape(1, -1)
    for li, p in enumerate(layer_params):
        fin = (gf, bf) if li == n - 1 else None   # fuse final LN into last layer
        x = run_encoder_layer(x, p, num_heads, final_norm=fin,
                              batch_block=batch_block)
    return x


if __name__ == "__main__":
    # Small config consistent with the module's __init__.
    embedding_dim = 32
    config = dict(num_heads=4, num_layers=2, mlp_ratio=4, dropout=0.0)

    B, S, D = 2, 8, embedding_dim
    key = jax.random.PRNGKey(0)
    k_x, k_p = jax.random.split(key)
    x = jax.random.normal(k_x, (B, S, D), jnp.float32)

    torch_layers, final_params = init_torch_layout_params(
        k_p, D, config["num_layers"], config["mlp_ratio"])
    layer_params = [convert_layer_params(tp, config["num_heads"])
                    for tp in torch_layers]

    out = transformer_encoder(x, layer_params, final_params, config["num_heads"])
    out = jax.block_until_ready(out)
    assert out.shape == (B, S, D)
    assert bool(jnp.all(jnp.isfinite(out)))
    print("KERNEL_OK")
</pallas_src>

<mosaic_0001>
module attributes {stable_mosaic.version = 11 : i64} {
  func.func @encoder_layer_kernel(%arg0: i32, %arg1: memref<1x8x32xf32, #tpu.memory_space<vmem>>, %arg2: memref<32x96xbf16, #tpu.memory_space<vmem>>, %arg3: memref<1x96xf32, #tpu.memory_space<vmem>>, %arg4: memref<32x32xbf16, #tpu.memory_space<vmem>>, %arg5: memref<1x32xf32, #tpu.memory_space<vmem>>, %arg6: memref<1x32xf32, #tpu.memory_space<vmem>>, %arg7: memref<1x32xf32, #tpu.memory_space<vmem>>, %arg8: memref<32x128xbf16, #tpu.memory_space<vmem>>, %arg9: memref<1x128xf32, #tpu.memory_space<vmem>>, %arg10: memref<128x32xbf16, #tpu.memory_space<vmem>>, %arg11: memref<1x32xf32, #tpu.memory_space<vmem>>, %arg12: memref<1x32xf32, #tpu.memory_space<vmem>>, %arg13: memref<1x32xf32, #tpu.memory_space<vmem>>, %arg14: memref<1x8x32xf32, #tpu.memory_space<vmem>>, %arg15: memref<8x32xbf16, #tpu.memory_space<vmem>>) attributes {dimension_semantics = [#tpu.dimension_semantics<parallel>], iteration_bounds = array<i64: 2>, scalar_prefetch = 0 : i64, scratch_operands = 1 : i64, tpu.core_type = #tpu.core_type<tc>, window_params = [{transform_indices = @transform_0, window_bounds = array<i64: 1, 8, 32>}, {pipeline_mode = #tpu.pipeline_mode<synchronous>, transform_indices = @transform_1, window_bounds = array<i64: 32, 96>}, {pipeline_mode = #tpu.pipeline_mode<synchronous>, transform_indices = @transform_2, window_bounds = array<i64: 1, 96>}, {pipeline_mode = #tpu.pipeline_mode<synchronous>, transform_indices = @transform_3, window_bounds = array<i64: 32, 32>}, {pipeline_mode = #tpu.pipeline_mode<synchronous>, transform_indices = @transform_4, window_bounds = array<i64: 1, 32>}, {pipeline_mode = #tpu.pipeline_mode<synchronous>, transform_indices = @transform_5, window_bounds = array<i64: 1, 32>}, {pipeline_mode = #tpu.pipeline_mode<synchronous>, transform_indices = @transform_6, window_bounds = array<i64: 1, 32>}, {pipeline_mode = #tpu.pipeline_mode<synchronous>, transform_indices = @transform_7, window_bounds = array<i64: 32, 128>}, {pipeline_mode = #tpu.pipeline_mode<synchronous>, transform_indices = @transform_8, window_bounds = array<i64: 1, 128>}, {pipeline_mode = #tpu.pipeline_mode<synchronous>, transform_indices = @transform_9, window_bounds = array<i64: 128, 32>}, {pipeline_mode = #tpu.pipeline_mode<synchronous>, transform_indices = @transform_10, window_bounds = array<i64: 1, 32>}, {pipeline_mode = #tpu.pipeline_mode<synchronous>, transform_indices = @transform_11, window_bounds = array<i64: 1, 32>}, {pipeline_mode = #tpu.pipeline_mode<synchronous>, transform_indices = @transform_12, window_bounds = array<i64: 1, 32>}, {transform_indices = @transform_13, window_bounds = array<i64: 1, 8, 32>}]} {
    %c0 = arith.constant 0 : index
    %c0_0 = arith.constant 0 : index
    %c0_1 = arith.constant 0 : index
    %0 = vector.load %arg1[%c0, %c0_0, %c0_1] : memref<1x8x32xf32, #tpu.memory_space<vmem>>, vector<1x8x32xf32>
    %1 = vector.shape_cast %0 : vector<1x8x32xf32> to vector<8x32xf32>
    %2 = arith.truncf %1 : vector<8x32xf32> to vector<8x32xbf16>
    %c0_2 = arith.constant 0 : index
    %c0_3 = arith.constant 0 : index
    %3 = vector.load %arg2[%c0_2, %c0_3] : memref<32x96xbf16, #tpu.memory_space<vmem>>, vector<32x96xbf16>
    %cst = arith.constant dense<0.000000e+00> : vector<8x96xf32>
    %4 = tpu.matmul %2, %3, %cst {dimension_numbers = #tpu.dot_dimension_numbers<[1], [0], [0], [1], [0, 0, 1, 1], [], []>} : vector<8x32xbf16>, vector<32x96xbf16>, vector<8x96xf32> -> vector<8x96xf32>
    %c0_4 = arith.constant 0 : index
    %c0_5 = arith.constant 0 : index
    %5 = vector.load %arg3[%c0_4, %c0_5] : memref<1x96xf32, #tpu.memory_space<vmem>>, vector<1x96xf32>
    %6 = vector.broadcast %5 : vector<1x96xf32> to vector<8x96xf32>
    %7 = arith.addf %4, %6 : vector<8x96xf32>
    %8 = vector.extract_strided_slice %7 {offsets = [0, 0], sizes = [8, 8], strides = [1, 1]} : vector<8x96xf32> to vector<8x8xf32>
    %9 = vector.shape_cast %8 : vector<8x8xf32> to vector<1x8x8xf32>
    %10 = arith.truncf %9 : vector<1x8x8xf32> to vector<1x8x8xbf16>
    %11 = vector.extract_strided_slice %7 {offsets = [0, 32], sizes = [8, 8], strides = [1, 1]} : vector<8x96xf32> to vector<8x8xf32>
    %12 = vector.shape_cast %11 : vector<8x8xf32> to vector<1x8x8xf32>
    %13 = arith.truncf %12 : vector<1x8x8xf32> to vector<1x8x8xbf16>
    %14 = vector.extract_strided_slice %7 {offsets = [0, 64], sizes = [8, 8], strides = [1, 1]} : vector<8x96xf32> to vector<8x8xf32>
    %15 = vector.shape_cast %14 : vector<8x8xf32> to vector<1x8x8xf32>
    %16 = arith.truncf %15 : vector<1x8x8xf32> to vector<1x8x8xbf16>
    "tpu.trace_start"() <{level = 10 : i32, message = "bqd,bkd->bqk"}> : () -> ()
    %cst_6 = arith.constant dense<0.000000e+00> : vector<1x8x8xf32>
    %17 = tpu.matmul %10, %13, %cst_6 {dimension_numbers = #tpu.dot_dimension_numbers<[2], [2], [1], [1], [0, 0, 0, 1, 1, 1], [0], [0]>} : vector<1x8x8xbf16>, vector<1x8x8xbf16>, vector<1x8x8xf32> -> vector<1x8x8xf32>
    "tpu.trace_stop"() : () -> ()
    %cst_7 = arith.constant dense<0xFF800000> : vector<1x8xf32>
    %18 = vector.multi_reduction <maximumf>, %17, %cst_7 [2] : vector<1x8x8xf32> to vector<1x8xf32>
    %19 = vector.shape_cast %18 : vector<1x8xf32> to vector<1x8x1xf32>
    %20 = vector.broadcast %19 : vector<1x8x1xf32> to vector<1x8x8xf32>
    %21 = arith.subf %17, %20 : vector<1x8x8xf32>
    %22 = math.exp %21 : vector<1x8x8xf32>
    %cst_8 = arith.constant dense<0.000000e+00> : vector<1x8xf32>
    %23 = vector.multi_reduction <add>, %22, %cst_8 [2] : vector<1x8x8xf32> to vector<1x8xf32>
    %24 = vector.shape_cast %23 : vector<1x8xf32> to vector<1x8x1xf32>
    %25 = tpu.reciprocal %24 {approx = true} : vector<1x8x1xf32> -> vector<1x8x1xf32>
    %26 = vector.broadcast %25 : vector<1x8x1xf32> to vector<1x8x8xf32>
    %27 = arith.mulf %22, %26 : vector<1x8x8xf32>
    %28 = arith.truncf %27 : vector<1x8x8xf32> to vector<1x8x8xbf16>
    "tpu.trace_start"() <{level = 10 : i32, message = "bqk,bkd->bqd"}> : () -> ()
    %cst_9 = arith.constant dense<0.000000e+00> : vector<1x8x8xf32>
    %29 = tpu.matmul %28, %16, %cst_9 {dimension_numbers = #tpu.dot_dimension_numbers<[2], [1], [1], [2], [0, 0, 0, 1, 1, 2], [0], [0]>} : vector<1x8x8xbf16>, vector<1x8x8xbf16>, vector<1x8x8xf32> -> vector<1x8x8xf32>
    "tpu.trace_stop"() : () -> ()
    %30 = vector.shape_cast %29 : vector<1x8x8xf32> to vector<8x8xf32>
    %31 = arith.truncf %30 : vector<8x8xf32> to vector<8x8xbf16>
    %c0_10 = arith.constant 0 : index
    %c0_11 = arith.constant 0 : index
    %32 = vector.load %arg15[%c0_10, %c0_11] : memref<8x32xbf16, #tpu.memory_space<vmem>>, vector<8x8xbf16>
    tpu.vector_store %arg15[%c0_10, %c0_11], %31 {strides = array<i32>} : memref<8x32xbf16, #tpu.memory_space<vmem>>, vector<8x8xbf16>,
    %33 = vector.extract_strided_slice %7 {offsets = [0, 8], sizes = [8, 8], strides = [1, 1]} : vector<8x96xf32> to vector<8x8xf32>
    %34 = vector.shape_cast %33 : vector<8x8xf32> to vector<1x8x8xf32>
    %35 = arith.truncf %34 : vector<1x8x8xf32> to vector<1x8x8xbf16>
    %36 = vector.extract_strided_slice %7 {offsets = [0, 40], sizes = [8, 8], strides = [1, 1]} : vector<8x96xf32> to vector<8x8xf32>
    %37 = vector.shape_cast %36 : vector<8x8xf32> to vector<1x8x8xf32>
    %38 = arith.truncf %37 : vector<1x8x8xf32> to vector<1x8x8xbf16>
    %39 = vector.extract_strided_slice %7 {offsets = [0, 72], sizes = [8, 8], strides = [1, 1]} : vector<8x96xf32> to vector<8x8xf32>
    %40 = vector.shape_cast %39 : vector<8x8xf32> to vector<1x8x8xf32>
    %41 = arith.truncf %40 : vector<1x8x8xf32> to vector<1x8x8xbf16>
    "tpu.trace_start"() <{level = 10 : i32, message = "bqd,bkd->bqk"}> : () -> ()
    %cst_12 = arith.constant dense<0.000000e+00> : vector<1x8x8xf32>
    %42 = tpu.matmul %35, %38, %cst_12 {dimension_numbers = #tpu.dot_dimension_numbers<[2], [2], [1], [1], [0, 0, 0, 1, 1, 1], [0], [0]>} : vector<1x8x8xbf16>, vector<1x8x8xbf16>, vector<1x8x8xf32> -> vector<1x8x8xf32>
    "tpu.trace_stop"() : () -> ()
    %cst_13 = arith.constant dense<0xFF800000> : vector<1x8xf32>
    %43 = vector.multi_reduction <maximumf>, %42, %cst_13 [2] : vector<1x8x8xf32> to vector<1x8xf32>
    %44 = vector.shape_cast %43 : vector<1x8xf32> to vector<1x8x1xf32>
    %45 = vector.broadcast %44 : vector<1x8x1xf32> to vector<1x8x8xf32>
    %46 = arith.subf %42, %45 : vector<1x8x8xf32>
    %47 = math.exp %46 : vector<1x8x8xf32>
    %cst_14 = arith.constant dense<0.000000e+00> : vector<1x8xf32>
    %48 = vector.multi_reduction <add>, %47, %cst_14 [2] : vector<1x8x8xf32> to vector<1x8xf32>
    %49 = vector.shape_cast %48 : vector<1x8xf32> to vector<1x8x1xf32>
    %50 = tpu.reciprocal %49 {approx = true} : vector<1x8x1xf32> -> vector<1x8x1xf32>
    %51 = vector.broadcast %50 : vector<1x8x1xf32> to vector<1x8x8xf32>
    %52 = arith.mulf %47, %51 : vector<1x8x8xf32>
    %53 = arith.truncf %52 : vector<1x8x8xf32> to vector<1x8x8xbf16>
    "tpu.trace_start"() <{level = 10 : i32, message = "bqk,bkd->bqd"}> : () -> ()
    %cst_15 = arith.constant dense<0.000000e+00> : vector<1x8x8xf32>
    %54 = tpu.matmul %53, %41, %cst_15 {dimension_numbers = #tpu.dot_dimension_numbers<[2], [1], [1], [2], [0, 0, 0, 1, 1, 2], [0], [0]>} : vector<1x8x8xbf16>, vector<1x8x8xbf16>, vector<1x8x8xf32> -> vector<1x8x8xf32>
    "tpu.trace_stop"() : () -> ()
    %55 = vector.shape_cast %54 : vector<1x8x8xf32> to vector<8x8xf32>
    %56 = arith.truncf %55 : vector<8x8xf32> to vector<8x8xbf16>
    %c0_16 = arith.constant 0 : index
    %c8 = arith.constant 8 : index
    %57 = vector.load %arg15[%c0_16, %c8] : memref<8x32xbf16, #tpu.memory_space<vmem>>, vector<8x8xbf16>
    tpu.vector_store %arg15[%c0_16, %c8], %56 {strides = array<i32>} : memref<8x32xbf16, #tpu.memory_space<vmem>>, vector<8x8xbf16>,
    %58 = vector.extract_strided_slice %7 {offsets = [0, 16], sizes = [8, 8], strides = [1, 1]} : vector<8x96xf32> to vector<8x8xf32>
    %59 = vector.shape_cast %58 : vector<8x8xf32> to vector<1x8x8xf32>
    %60 = arith.truncf %59 : vector<1x8x8xf32> to vector<1x8x8xbf16>
    %61 = vector.extract_strided_slice %7 {offsets = [0, 48], sizes = [8, 8], strides = [1, 1]} : vector<8x96xf32> to vector<8x8xf32>
    %62 = vector.shape_cast %61 : vector<8x8xf32> to vector<1x8x8xf32>
    %63 = arith.truncf %62 : vector<1x8x8xf32> to vector<1x8x8xbf16>
    %64 = vector.extract_strided_slice %7 {offsets = [0, 80], sizes = [8, 8], strides = [1, 1]} : vector<8x96xf32> to vector<8x8xf32>
    %65 = vector.shape_cast %64 : vector<8x8xf32> to vector<1x8x8xf32>
    %66 = arith.truncf %65 : vector<1x8x8xf32> to vector<1x8x8xbf16>
    "tpu.trace_start"() <{level = 10 : i32, message = "bqd,bkd->bqk"}> : () -> ()
    %cst_17 = arith.constant dense<0.000000e+00> : vector<1x8x8xf32>
    %67 = tpu.matmul %60, %63, %cst_17 {dimension_numbers = #tpu.dot_dimension_numbers<[2], [2], [1], [1], [0, 0, 0, 1, 1, 1], [0], [0]>} : vector<1x8x8xbf16>, vector<1x8x8xbf16>, vector<1x8x8xf32> -> vector<1x8x8xf32>
    "tpu.trace_stop"() : () -> ()
    %cst_18 = arith.constant dense<0xFF800000> : vector<1x8xf32>
    %68 = vector.multi_reduction <maximumf>, %67, %cst_18 [2] : vector<1x8x8xf32> to vector<1x8xf32>
    %69 = vector.shape_cast %68 : vector<1x8xf32> to vector<1x8x1xf32>
    %70 = vector.broadcast %69 : vector<1x8x1xf32> to vector<1x8x8xf32>
    %71 = arith.subf %67, %70 : vector<1x8x8xf32>
    %72 = math.exp %71 : vector<1x8x8xf32>
    %cst_19 = arith.constant dense<0.000000e+00> : vector<1x8xf32>
    %73 = vector.multi_reduction <add>, %72, %cst_19 [2] : vector<1x8x8xf32> to vector<1x8xf32>
    %74 = vector.shape_cast %73 : vector<1x8xf32> to vector<1x8x1xf32>
    %75 = tpu.reciprocal %74 {approx = true} : vector<1x8x1xf32> -> vector<1x8x1xf32>
    %76 = vector.broadcast %75 : vector<1x8x1xf32> to vector<1x8x8xf32>
    %77 = arith.mulf %72, %76 : vector<1x8x8xf32>
    %78 = arith.truncf %77 : vector<1x8x8xf32> to vector<1x8x8xbf16>
    "tpu.trace_start"() <{level = 10 : i32, message = "bqk,bkd->bqd"}> : () -> ()
    %cst_20 = arith.constant dense<0.000000e+00> : vector<1x8x8xf32>
    %79 = tpu.matmul %78, %66, %cst_20 {dimension_numbers = #tpu.dot_dimension_numbers<[2], [1], [1], [2], [0, 0, 0, 1, 1, 2], [0], [0]>} : vector<1x8x8xbf16>, vector<1x8x8xbf16>, vector<1x8x8xf32> -> vector<1x8x8xf32>
    "tpu.trace_stop"() : () -> ()
    %80 = vector.shape_cast %79 : vector<1x8x8xf32> to vector<8x8xf32>
    %81 = arith.truncf %80 : vector<8x8xf32> to vector<8x8xbf16>
    %c0_21 = arith.constant 0 : index
    %c16 = arith.constant 16 : index
    %82 = vector.load %arg15[%c0_21, %c16] : memref<8x32xbf16, #tpu.memory_space<vmem>>, vector<8x8xbf16>
    tpu.vector_store %arg15[%c0_21, %c16], %81 {strides = array<i32>} : memref<8x32xbf16, #tpu.memory_space<vmem>>, vector<8x8xbf16>,
    %83 = vector.extract_strided_slice %7 {offsets = [0, 24], sizes = [8, 8], strides = [1, 1]} : vector<8x96xf32> to vector<8x8xf32>
    %84 = vector.shape_cast %83 : vector<8x8xf32> to vector<1x8x8xf32>
    %85 = arith.truncf %84 : vector<1x8x8xf32> to vector<1x8x8xbf16>
    %86 = vector.extract_strided_slice %7 {offsets = [0, 56], sizes = [8, 8], strides = [1, 1]} : vector<8x96xf32> to vector<8x8xf32>
    %87 = vector.shape_cast %86 : vector<8x8xf32> to vector<1x8x8xf32>
    %88 = arith.truncf %87 : vector<1x8x8xf32> to vector<1x8x8xbf16>
    %89 = vector.extract_strided_slice %7 {offsets = [0, 88], sizes = [8, 8], strides = [1, 1]} : vector<8x96xf32> to vector<8x8xf32>
    %90 = vector.shape_cast %89 : vector<8x8xf32> to vector<1x8x8xf32>
    %91 = arith.truncf %90 : vector<1x8x8xf32> to vector<1x8x8xbf16>
    "tpu.trace_start"() <{level = 10 : i32, message = "bqd,bkd->bqk"}> : () -> ()
    %cst_22 = arith.constant dense<0.000000e+00> : vector<1x8x8xf32>
    %92 = tpu.matmul %85, %88, %cst_22 {dimension_numbers = #tpu.dot_dimension_numbers<[2], [2], [1], [1], [0, 0, 0, 1, 1, 1], [0], [0]>} : vector<1x8x8xbf16>, vector<1x8x8xbf16>, vector<1x8x8xf32> -> vector<1x8x8xf32>
    "tpu.trace_stop"() : () -> ()
    %cst_23 = arith.constant dense<0xFF800000> : vector<1x8xf32>
    %93 = vector.multi_reduction <maximumf>, %92, %cst_23 [2] : vector<1x8x8xf32> to vector<1x8xf32>
    %94 = vector.shape_cast %93 : vector<1x8xf32> to vector<1x8x1xf32>
    %95 = vector.broadcast %94 : vector<1x8x1xf32> to vector<1x8x8xf32>
    %96 = arith.subf %92, %95 : vector<1x8x8xf32>
    %97 = math.exp %96 : vector<1x8x8xf32>
    %cst_24 = arith.constant dense<0.000000e+00> : vector<1x8xf32>
    %98 = vector.multi_reduction <add>, %97, %cst_24 [2] : vector<1x8x8xf32> to vector<1x8xf32>
    %99 = vector.shape_cast %98 : vector<1x8xf32> to vector<1x8x1xf32>
    %100 = tpu.reciprocal %99 {approx = true} : vector<1x8x1xf32> -> vector<1x8x1xf32>
    %101 = vector.broadcast %100 : vector<1x8x1xf32> to vector<1x8x8xf32>
    %102 = arith.mulf %97, %101 : vector<1x8x8xf32>
    %103 = arith.truncf %102 : vector<1x8x8xf32> to vector<1x8x8xbf16>
    "tpu.trace_start"() <{level = 10 : i32, message = "bqk,bkd->bqd"}> : () -> ()
    %cst_25 = arith.constant dense<0.000000e+00> : vector<1x8x8xf32>
    %104 = tpu.matmul %103, %91, %cst_25 {dimension_numbers = #tpu.dot_dimension_numbers<[2], [1], [1], [2], [0, 0, 0, 1, 1, 2], [0], [0]>} : vector<1x8x8xbf16>, vector<1x8x8xbf16>, vector<1x8x8xf32> -> vector<1x8x8xf32>
    "tpu.trace_stop"() : () -> ()
    %105 = vector.shape_cast %104 : vector<1x8x8xf32> to vector<8x8xf32>
    %106 = arith.truncf %105 : vector<8x8xf32> to vector<8x8xbf16>
    %c0_26 = arith.constant 0 : index
    %c24 = arith.constant 24 : index
    %107 = vector.load %arg15[%c0_26, %c24] : memref<8x32xbf16, #tpu.memory_space<vmem>>, vector<8x8xbf16>
    tpu.vector_store %arg15[%c0_26, %c24], %106 {strides = array<i32>} : memref<8x32xbf16, #tpu.memory_space<vmem>>, vector<8x8xbf16>,
    %c0_27 = arith.constant 0 : index
    %c0_28 = arith.constant 0 : index
    %108 = vector.load %arg15[%c0_27, %c0_28] : memref<8x32xbf16, #tpu.memory_space<vmem>>, vector<8x32xbf16>
    %c0_29 = arith.constant 0 : index
    %c0_30 = arith.constant 0 : index
    %109 = vector.load %arg4[%c0_29, %c0_30] : memref<32x32xbf16, #tpu.memory_space<vmem>>, vector<32x32xbf16>
    %cst_31 = arith.constant dense<0.000000e+00> : vector<8x32xf32>
    %110 = tpu.matmul %108, %109, %cst_31 {dimension_numbers = #tpu.dot_dimension_numbers<[1], [0], [0], [1], [0, 0, 1, 1], [], []>} : vector<8x32xbf16>, vector<32x32xbf16>, vector<8x32xf32> -> vector<8x32xf32>
    %c0_32 = arith.constant 0 : index
    %c0_33 = arith.constant 0 : index
    %111 = vector.load %arg5[%c0_32, %c0_33] : memref<1x32xf32, #tpu.memory_space<vmem>>, vector<1x32xf32>
    %112 = vector.broadcast %111 : vector<1x32xf32> to vector<8x32xf32>
    %113 = arith.addf %110, %112 : vector<8x32xf32>
    %114 = arith.addf %1, %113 : vector<8x32xf32>
    %c0_34 = arith.constant 0 : index
    %c0_35 = arith.constant 0 : index
    %115 = vector.load %arg6[%c0_34, %c0_35] : memref<1x32xf32, #tpu.memory_space<vmem>>, vector<1x32xf32>
    %c0_36 = arith.constant 0 : index
    %c0_37 = arith.constant 0 : index
    %116 = vector.load %arg7[%c0_36, %c0_37] : memref<1x32xf32, #tpu.memory_space<vmem>>, vector<1x32xf32>
    %cst_38 = arith.constant dense<0.000000e+00> : vector<8xf32>
    %117 = vector.multi_reduction <add>, %114, %cst_38 [1] : vector<8x32xf32> to vector<8xf32>
    %118 = vector.shape_cast %117 : vector<8xf32> to vector<8x1xf32>
    %cst_39 = arith.constant 3.200000e+01 : f32
    %119 = vector.broadcast %cst_39 : f32 to vector<8x1xf32>
    %120 = arith.divf %118, %119 : vector<8x1xf32>
    %121 = vector.broadcast %120 : vector<8x1xf32> to vector<8x32xf32>
    %122 = arith.subf %114, %121 : vector<8x32xf32>
    %123 = arith.mulf %122, %122 : vector<8x32xf32>
    %cst_40 = arith.constant dense<0.000000e+00> : vector<8xf32>
    %124 = vector.multi_reduction <add>, %123, %cst_40 [1] : vector<8x32xf32> to vector<8xf32>
    %125 = vector.shape_cast %124 : vector<8xf32> to vector<8x1xf32>
    %cst_41 = arith.constant 3.200000e+01 : f32
    %126 = vector.broadcast %cst_41 : f32 to vector<8x1xf32>
    %127 = arith.divf %125, %126 : vector<8x1xf32>
    %cst_42 = arith.constant 9.99999974E-6 : f32
    %128 = vector.broadcast %cst_42 : f32 to vector<8x1xf32>
    %129 = arith.addf %127, %128 : vector<8x1xf32>
    %130 = math.rsqrt %129 : vector<8x1xf32>
    %131 = vector.broadcast %130 : vector<8x1xf32> to vector<8x32xf32>
    %132 = arith.mulf %122, %131 : vector<8x32xf32>
    %133 = vector.broadcast %115 : vector<1x32xf32> to vector<8x32xf32>
    %134 = arith.mulf %132, %133 : vector<8x32xf32>
    %135 = vector.broadcast %116 : vector<1x32xf32> to vector<8x32xf32>
    %136 = arith.addf %134, %135 : vector<8x32xf32>
    %137 = arith.truncf %136 : vector<8x32xf32> to vector<8x32xbf16>
    %cst_43 = arith.constant 0.000000e+00 : f32
    %138 = vector.broadcast %cst_43 : f32 to vector<8x32xf32>
    %c0_44 = arith.constant 0 : index
    %c0_45 = arith.constant 0 : index
    %139 = vector.load %arg8[%c0_44, %c0_45] : memref<32x128xbf16, #tpu.memory_space<vmem>>, vector<32x128xbf16>
    %cst_46 = arith.constant dense<0.000000e+00> : vector<8x128xf32>
    %140 = tpu.matmul %137, %139, %cst_46 {dimension_numbers = #tpu.dot_dimension_numbers<[1], [0], [0], [1], [0, 0, 1, 1], [], []>} : vector<8x32xbf16>, vector<32x128xbf16>, vector<8x128xf32> -> vector<8x128xf32>
    %c0_47 = arith.constant 0 : index
    %c0_48 = arith.constant 0 : index
    %141 = vector.load %arg9[%c0_47, %c0_48] : memref<1x128xf32, #tpu.memory_space<vmem>>, vector<1x128xf32>
    %142 = vector.broadcast %141 : vector<1x128xf32> to vector<8x128xf32>
    %143 = arith.addf %140, %142 : vector<8x128xf32>
    %cst_49 = arith.constant 5.000000e-01 : f32
    %144 = vector.broadcast %cst_49 : f32 to vector<8x128xf32>
    %145 = arith.mulf %144, %143 : vector<8x128xf32>
    %cst_50 = arith.constant 0.707106769 : f32
    %146 = vector.broadcast %cst_50 : f32 to vector<8x128xf32>
    %147 = arith.mulf %143, %146 : vector<8x128xf32>
    %148 = math.erf %147 : vector<8x128xf32>
    %cst_51 = arith.constant 1.000000e+00 : f32
    %149 = vector.broadcast %cst_51 : f32 to vector<8x128xf32>
    %150 = arith.addf %149, %148 : vector<8x128xf32>
    %151 = arith.mulf %145, %150 : vector<8x128xf32>
    %152 = arith.truncf %151 : vector<8x128xf32> to vector<8x128xbf16>
    %c0_52 = arith.constant 0 : index
    %c0_53 = arith.constant 0 : index
    %153 = vector.load %arg10[%c0_52, %c0_53] : memref<128x32xbf16, #tpu.memory_space<vmem>>, vector<128x32xbf16>
    %cst_54 = arith.constant dense<0.000000e+00> : vector<8x32xf32>
    %154 = tpu.matmul %152, %153, %cst_54 {dimension_numbers = #tpu.dot_dimension_numbers<[1], [0], [0], [1], [0, 0, 1, 1], [], []>} : vector<8x128xbf16>, vector<128x32xbf16>, vector<8x32xf32> -> vector<8x32xf32>
    %155 = arith.addf %138, %154 : vector<8x32xf32>
    %c0_55 = arith.constant 0 : index
    %c0_56 = arith.constant 0 : index
    %156 = vector.load %arg11[%c0_55, %c0_56] : memref<1x32xf32, #tpu.memory_space<vmem>>, vector<1x32xf32>
    %157 = vector.broadcast %156 : vector<1x32xf32> to vector<8x32xf32>
    %158 = arith.addf %155, %157 : vector<8x32xf32>
    %159 = arith.addf %136, %158 : vector<8x32xf32>
    %c0_57 = arith.constant 0 : index
    %c0_58 = arith.constant 0 : index
    %160 = vector.load %arg12[%c0_57, %c0_58] : memref<1x32xf32, #tpu.memory_space<vmem>>, vector<1x32xf32>
    %c0_59 = arith.constant 0 : index
    %c0_60 = arith.constant 0 : index
    %161 = vector.load %arg13[%c0_59, %c0_60] : memref<1x32xf32, #tpu.memory_space<vmem>>, vector<1x32xf32>
    %cst_61 = arith.constant dense<0.000000e+00> : vector<8xf32>
    %162 = vector.multi_reduction <add>, %159, %cst_61 [1] : vector<8x32xf32> to vector<8xf32>
    %163 = vector.shape_cast %162 : vector<8xf32> to vector<8x1xf32>
    %cst_62 = arith.constant 3.200000e+01 : f32
    %164 = vector.broadcast %cst_62 : f32 to vector<8x1xf32>
    %165 = arith.divf %163, %164 : vector<8x1xf32>
    %166 = vector.broadcast %165 : vector<8x1xf32> to vector<8x32xf32>
    %167 = arith.subf %159, %166 : vector<8x32xf32>
    %168 = arith.mulf %167, %167 : vector<8x32xf32>
    %cst_63 = arith.constant dense<0.000000e+00> : vector<8xf32>
    %169 = vector.multi_reduction <add>, %168, %cst_63 [1] : vector<8x32xf32> to vector<8xf32>
    %170 = vector.shape_cast %169 : vector<8xf32> to vector<8x1xf32>
    %cst_64 = arith.constant 3.200000e+01 : f32
    %171 = vector.broadcast %cst_64 : f32 to vector<8x1xf32>
    %172 = arith.divf %170, %171 : vector<8x1xf32>
    %cst_65 = arith.constant 9.99999974E-6 : f32
    %173 = vector.broadcast %cst_65 : f32 to vector<8x1xf32>
    %174 = arith.addf %172, %173 : vector<8x1xf32>
    %175 = math.rsqrt %174 : vector<8x1xf32>
    %176 = vector.broadcast %175 : vector<8x1xf32> to vector<8x32xf32>
    %177 = arith.mulf %167, %176 : vector<8x32xf32>
    %178 = vector.broadcast %160 : vector<1x32xf32> to vector<8x32xf32>
    %179 = arith.mulf %177, %178 : vector<8x32xf32>
    %180 = vector.broadcast %161 : vector<1x32xf32> to vector<8x32xf32>
    %181 = arith.addf %179, %180 : vector<8x32xf32>
    %182 = vector.shape_cast %181 : vector<8x32xf32> to vector<1x8x32xf32>
    %c0_66 = arith.constant 0 : index
    %c0_67 = arith.constant 0 : index
    %c0_68 = arith.constant 0 : index
    %183 = vector.load %arg14[%c0_66, %c0_67, %c0_68] : memref<1x8x32xf32, #tpu.memory_space<vmem>>, vector<1x8x32xf32>
    tpu.vector_store %arg14[%c0_66, %c0_67, %c0_68], %182 {strides = array<i32>} : memref<1x8x32xf32, #tpu.memory_space<vmem>>, vector<1x8x32xf32>,
    return
  }
  func.func @transform_0(%arg0: i32) -> (i32, i32, i32) {
    %c0_i32 = arith.constant 0 : i32
    %c0_i32_0 = arith.constant 0 : i32
    %c0_i32_1 = arith.constant 0 : i32
    return %arg0, %c0_i32, %c0_i32_0 : i32, i32, i32
  }
  func.func @transform_1(%arg0: i32) -> (i32, i32) {
    %c0_i32 = arith.constant 0 : i32
    %c0_i32_0 = arith.constant 0 : i32
    %c0_i32_1 = arith.constant 0 : i32
    return %c0_i32, %c0_i32_0 : i32, i32
  }
  func.func @transform_2(%arg0: i32) -> (i32, i32) {
    %c0_i32 = arith.constant 0 : i32
    %c0_i32_0 = arith.constant 0 : i32
    %c0_i32_1 = arith.constant 0 : i32
    return %c0_i32, %c0_i32_0 : i32, i32
  }
  func.func @transform_3(%arg0: i32) -> (i32, i32) {
    %c0_i32 = arith.constant 0 : i32
    %c0_i32_0 = arith.constant 0 : i32
    %c0_i32_1 = arith.constant 0 : i32
    return %c0_i32, %c0_i32_0 : i32, i32
  }
  func.func @transform_4(%arg0: i32) -> (i32, i32) {
    %c0_i32 = arith.constant 0 : i32
    %c0_i32_0 = arith.constant 0 : i32
    %c0_i32_1 = arith.constant 0 : i32
    return %c0_i32, %c0_i32_0 : i32, i32
  }
  func.func @transform_5(%arg0: i32) -> (i32, i32) {
    %c0_i32 = arith.constant 0 : i32
    %c0_i32_0 = arith.constant 0 : i32
    %c0_i32_1 = arith.constant 0 : i32
    return %c0_i32, %c0_i32_0 : i32, i32
  }
  func.func @transform_6(%arg0: i32) -> (i32, i32) {
    %c0_i32 = arith.constant 0 : i32
    %c0_i32_0 = arith.constant 0 : i32
    %c0_i32_1 = arith.constant 0 : i32
    return %c0_i32, %c0_i32_0 : i32, i32
  }
  func.func @transform_7(%arg0: i32) -> (i32, i32) {
    %c0_i32 = arith.constant 0 : i32
    %c0_i32_0 = arith.constant 0 : i32
    %c0_i32_1 = arith.constant 0 : i32
    return %c0_i32, %c0_i32_0 : i32, i32
  }
  func.func @transform_8(%arg0: i32) -> (i32, i32) {
    %c0_i32 = arith.constant 0 : i32
    %c0_i32_0 = arith.constant 0 : i32
    %c0_i32_1 = arith.constant 0 : i32
    return %c0_i32, %c0_i32_0 : i32, i32
  }
  func.func @transform_9(%arg0: i32) -> (i32, i32) {
    %c0_i32 = arith.constant 0 : i32
    %c0_i32_0 = arith.constant 0 : i32
    %c0_i32_1 = arith.constant 0 : i32
    return %c0_i32, %c0_i32_0 : i32, i32
  }
  func.func @transform_10(%arg0: i32) -> (i32, i32) {
    %c0_i32 = arith.constant 0 : i32
    %c0_i32_0 = arith.constant 0 : i32
    %c0_i32_1 = arith.constant 0 : i32
    return %c0_i32, %c0_i32_0 : i32, i32
  }
  func.func @transform_11(%arg0: i32) -> (i32, i32) {
    %c0_i32 = arith.constant 0 : i32
    %c0_i32_0 = arith.constant 0 : i32
    %c0_i32_1 = arith.constant 0 : i32
    return %c0_i32, %c0_i32_0 : i32, i32
  }
  func.func @transform_12(%arg0: i32) -> (i32, i32) {
    %c0_i32 = arith.constant 0 : i32
    %c0_i32_0 = arith.constant 0 : i32
    %c0_i32_1 = arith.constant 0 : i32
    return %c0_i32, %c0_i32_0 : i32, i32
  }
  func.func @transform_13(%arg0: i32) -> (i32, i32, i32) {
    %c0_i32 = arith.constant 0 : i32
    %c0_i32_0 = arith.constant 0 : i32
    %c0_i32_1 = arith.constant 0 : i32
    return %arg0, %c0_i32, %c0_i32_0 : i32, i32, i32
  }
}

module attributes {stable_mosaic.version = 11 : i64} {
  func.func @encoder_layer_kernel(%arg0: i32, %arg1: memref<1x8x32xf32, #tpu.memory_space<vmem>>, %arg2: memref<32x96xbf16, #tpu.memory_space<vmem>>, %arg3: memref<1x96xf32, #tpu.memory_space<vmem>>, %arg4: memref<32x32xbf16, #tpu.memory_space<vmem>>, %arg5: memref<1x32xf32, #tpu.memory_space<vmem>>, %arg6: memref<1x32xf32, #tpu.memory_space<vmem>>, %arg7: memref<1x32xf32, #tpu.memory_space<vmem>>, %arg8: memref<32x128xbf16, #tpu.memory_space<vmem>>, %arg9: memref<1x128xf32, #tpu.memory_space<vmem>>, %arg10: memref<128x32xbf16, #tpu.memory_space<vmem>>, %arg11: memref<1x32xf32, #tpu.memory_space<vmem>>, %arg12: memref<1x32xf32, #tpu.memory_space<vmem>>, %arg13: memref<1x32xf32, #tpu.memory_space<vmem>>, %arg14: memref<1x8x32xf32, #tpu.memory_space<vmem>>, %arg15: memref<8x32xbf16, #tpu.memory_space<vmem>>) attributes {dimension_semantics = [#tpu.dimension_semantics<parallel>], iteration_bounds = array<i64: 2>, scalar_prefetch = 0 : i64, scratch_operands = 1 : i64, tpu.core_type = #tpu.core_type<tc>, window_params = [{transform_indices = @transform_0, window_bounds = array<i64: 1, 8, 32>}, {pipeline_mode = #tpu.pipeline_mode<synchronous>, transform_indices = @transform_1, window_bounds = array<i64: 32, 96>}, {pipeline_mode = #tpu.pipeline_mode<synchronous>, transform_indices = @transform_2, window_bounds = array<i64: 1, 96>}, {pipeline_mode = #tpu.pipeline_mode<synchronous>, transform_indices = @transform_3, window_bounds = array<i64: 32, 32>}, {pipeline_mode = #tpu.pipeline_mode<synchronous>, transform_indices = @transform_4, window_bounds = array<i64: 1, 32>}, {pipeline_mode = #tpu.pipeline_mode<synchronous>, transform_indices = @transform_5, window_bounds = array<i64: 1, 32>}, {pipeline_mode = #tpu.pipeline_mode<synchronous>, transform_indices = @transform_6, window_bounds = array<i64: 1, 32>}, {pipeline_mode = #tpu.pipeline_mode<synchronous>, transform_indices = @transform_7, window_bounds = array<i64: 32, 128>}, {pipeline_mode = #tpu.pipeline_mode<synchronous>, transform_indices = @transform_8, window_bounds = array<i64: 1, 128>}, {pipeline_mode = #tpu.pipeline_mode<synchronous>, transform_indices = @transform_9, window_bounds = array<i64: 128, 32>}, {pipeline_mode = #tpu.pipeline_mode<synchronous>, transform_indices = @transform_10, window_bounds = array<i64: 1, 32>}, {pipeline_mode = #tpu.pipeline_mode<synchronous>, transform_indices = @transform_11, window_bounds = array<i64: 1, 32>}, {pipeline_mode = #tpu.pipeline_mode<synchronous>, transform_indices = @transform_12, window_bounds = array<i64: 1, 32>}, {transform_indices = @transform_13, window_bounds = array<i64: 1, 8, 32>}]} {
    %c0 = arith.constant 0 : index
    %c0_0 = arith.constant 0 : index
    %c0_1 = arith.constant 0 : index
    %0 = vector.load %arg1[%c0, %c0_0, %c0_1] : memref<1x8x32xf32, #tpu.memory_space<vmem>>, vector<1x8x32xf32>
    %1 = vector.shape_cast %0 : vector<1x8x32xf32> to vector<8x32xf32>
    %2 = arith.truncf %1 : vector<8x32xf32> to vector<8x32xbf16>
    %c0_2 = arith.constant 0 : index
    %c0_3 = arith.constant 0 : index
    %3 = vector.load %arg2[%c0_2, %c0_3] : memref<32x96xbf16, #tpu.memory_space<vmem>>, vector<32x96xbf16>
    %cst = arith.constant dense<0.000000e+00> : vector<8x96xf32>
    %4 = tpu.matmul %2, %3, %cst {dimension_numbers = #tpu.dot_dimension_numbers<[1], [0], [0], [1], [0, 0, 1, 1], [], []>} : vector<8x32xbf16>, vector<32x96xbf16>, vector<8x96xf32> -> vector<8x96xf32>
    %c0_4 = arith.constant 0 : index
    %c0_5 = arith.constant 0 : index
    %5 = vector.load %arg3[%c0_4, %c0_5] : memref<1x96xf32, #tpu.memory_space<vmem>>, vector<1x96xf32>
    %6 = vector.broadcast %5 : vector<1x96xf32> to vector<8x96xf32>
    %7 = arith.addf %4, %6 : vector<8x96xf32>
    %8 = vector.extract_strided_slice %7 {offsets = [0, 0], sizes = [8, 8], strides = [1, 1]} : vector<8x96xf32> to vector<8x8xf32>
    %9 = vector.shape_cast %8 : vector<8x8xf32> to vector<1x8x8xf32>
    %10 = arith.truncf %9 : vector<1x8x8xf32> to vector<1x8x8xbf16>
    %11 = vector.extract_strided_slice %7 {offsets = [0, 32], sizes = [8, 8], strides = [1, 1]} : vector<8x96xf32> to vector<8x8xf32>
    %12 = vector.shape_cast %11 : vector<8x8xf32> to vector<1x8x8xf32>
    %13 = arith.truncf %12 : vector<1x8x8xf32> to vector<1x8x8xbf16>
    %14 = vector.extract_strided_slice %7 {offsets = [0, 64], sizes = [8, 8], strides = [1, 1]} : vector<8x96xf32> to vector<8x8xf32>
    %15 = vector.shape_cast %14 : vector<8x8xf32> to vector<1x8x8xf32>
    %16 = arith.truncf %15 : vector<1x8x8xf32> to vector<1x8x8xbf16>
    "tpu.trace_start"() <{level = 10 : i32, message = "bqd,bkd->bqk"}> : () -> ()
    %cst_6 = arith.constant dense<0.000000e+00> : vector<1x8x8xf32>
    %17 = tpu.matmul %10, %13, %cst_6 {dimension_numbers = #tpu.dot_dimension_numbers<[2], [2], [1], [1], [0, 0, 0, 1, 1, 1], [0], [0]>} : vector<1x8x8xbf16>, vector<1x8x8xbf16>, vector<1x8x8xf32> -> vector<1x8x8xf32>
    "tpu.trace_stop"() : () -> ()
    %cst_7 = arith.constant dense<0xFF800000> : vector<1x8xf32>
    %18 = vector.multi_reduction <maximumf>, %17, %cst_7 [2] : vector<1x8x8xf32> to vector<1x8xf32>
    %19 = vector.shape_cast %18 : vector<1x8xf32> to vector<1x8x1xf32>
    %20 = vector.broadcast %19 : vector<1x8x1xf32> to vector<1x8x8xf32>
    %21 = arith.subf %17, %20 : vector<1x8x8xf32>
    %22 = math.exp %21 : vector<1x8x8xf32>
    %cst_8 = arith.constant dense<0.000000e+00> : vector<1x8xf32>
    %23 = vector.multi_reduction <add>, %22, %cst_8 [2] : vector<1x8x8xf32> to vector<1x8xf32>
    %24 = vector.shape_cast %23 : vector<1x8xf32> to vector<1x8x1xf32>
    %25 = tpu.reciprocal %24 {approx = true} : vector<1x8x1xf32> -> vector<1x8x1xf32>
    %26 = vector.broadcast %25 : vector<1x8x1xf32> to vector<1x8x8xf32>
    %27 = arith.mulf %22, %26 : vector<1x8x8xf32>
    %28 = arith.truncf %27 : vector<1x8x8xf32> to vector<1x8x8xbf16>
    "tpu.trace_start"() <{level = 10 : i32, message = "bqk,bkd->bqd"}> : () -> ()
    %cst_9 = arith.constant dense<0.000000e+00> : vector<1x8x8xf32>
    %29 = tpu.matmul %28, %16, %cst_9 {dimension_numbers = #tpu.dot_dimension_numbers<[2], [1], [1], [2], [0, 0, 0, 1, 1, 2], [0], [0]>} : vector<1x8x8xbf16>, vector<1x8x8xbf16>, vector<1x8x8xf32> -> vector<1x8x8xf32>
    "tpu.trace_stop"() : () -> ()
    %30 = vector.shape_cast %29 : vector<1x8x8xf32> to vector<8x8xf32>
    %31 = arith.truncf %30 : vector<8x8xf32> to vector<8x8xbf16>
    %c0_10 = arith.constant 0 : index
    %c0_11 = arith.constant 0 : index
    %32 = vector.load %arg15[%c0_10, %c0_11] : memref<8x32xbf16, #tpu.memory_space<vmem>>, vector<8x8xbf16>
    tpu.vector_store %arg15[%c0_10, %c0_11], %31 {strides = array<i32>} : memref<8x32xbf16, #tpu.memory_space<vmem>>, vector<8x8xbf16>,
    %33 = vector.extract_strided_slice %7 {offsets = [0, 8], sizes = [8, 8], strides = [1, 1]} : vector<8x96xf32> to vector<8x8xf32>
    %34 = vector.shape_cast %33 : vector<8x8xf32> to vector<1x8x8xf32>
    %35 = arith.truncf %34 : vector<1x8x8xf32> to vector<1x8x8xbf16>
    %36 = vector.extract_strided_slice %7 {offsets = [0, 40], sizes = [8, 8], strides = [1, 1]} : vector<8x96xf32> to vector<8x8xf32>
    %37 = vector.shape_cast %36 : vector<8x8xf32> to vector<1x8x8xf32>
    %38 = arith.truncf %37 : vector<1x8x8xf32> to vector<1x8x8xbf16>
    %39 = vector.extract_strided_slice %7 {offsets = [0, 72], sizes = [8, 8], strides = [1, 1]} : vector<8x96xf32> to vector<8x8xf32>
    %40 = vector.shape_cast %39 : vector<8x8xf32> to vector<1x8x8xf32>
    %41 = arith.truncf %40 : vector<1x8x8xf32> to vector<1x8x8xbf16>
    "tpu.trace_start"() <{level = 10 : i32, message = "bqd,bkd->bqk"}> : () -> ()
    %cst_12 = arith.constant dense<0.000000e+00> : vector<1x8x8xf32>
    %42 = tpu.matmul %35, %38, %cst_12 {dimension_numbers = #tpu.dot_dimension_numbers<[2], [2], [1], [1], [0, 0, 0, 1, 1, 1], [0], [0]>} : vector<1x8x8xbf16>, vector<1x8x8xbf16>, vector<1x8x8xf32> -> vector<1x8x8xf32>
    "tpu.trace_stop"() : () -> ()
    %cst_13 = arith.constant dense<0xFF800000> : vector<1x8xf32>
    %43 = vector.multi_reduction <maximumf>, %42, %cst_13 [2] : vector<1x8x8xf32> to vector<1x8xf32>
    %44 = vector.shape_cast %43 : vector<1x8xf32> to vector<1x8x1xf32>
    %45 = vector.broadcast %44 : vector<1x8x1xf32> to vector<1x8x8xf32>
    %46 = arith.subf %42, %45 : vector<1x8x8xf32>
    %47 = math.exp %46 : vector<1x8x8xf32>
    %cst_14 = arith.constant dense<0.000000e+00> : vector<1x8xf32>
    %48 = vector.multi_reduction <add>, %47, %cst_14 [2] : vector<1x8x8xf32> to vector<1x8xf32>
    %49 = vector.shape_cast %48 : vector<1x8xf32> to vector<1x8x1xf32>
    %50 = tpu.reciprocal %49 {approx = true} : vector<1x8x1xf32> -> vector<1x8x1xf32>
    %51 = vector.broadcast %50 : vector<1x8x1xf32> to vector<1x8x8xf32>
    %52 = arith.mulf %47, %51 : vector<1x8x8xf32>
    %53 = arith.truncf %52 : vector<1x8x8xf32> to vector<1x8x8xbf16>
    "tpu.trace_start"() <{level = 10 : i32, message = "bqk,bkd->bqd"}> : () -> ()
    %cst_15 = arith.constant dense<0.000000e+00> : vector<1x8x8xf32>
    %54 = tpu.matmul %53, %41, %cst_15 {dimension_numbers = #tpu.dot_dimension_numbers<[2], [1], [1], [2], [0, 0, 0, 1, 1, 2], [0], [0]>} : vector<1x8x8xbf16>, vector<1x8x8xbf16>, vector<1x8x8xf32> -> vector<1x8x8xf32>
    "tpu.trace_stop"() : () -> ()
    %55 = vector.shape_cast %54 : vector<1x8x8xf32> to vector<8x8xf32>
    %56 = arith.truncf %55 : vector<8x8xf32> to vector<8x8xbf16>
    %c0_16 = arith.constant 0 : index
    %c8 = arith.constant 8 : index
    %57 = vector.load %arg15[%c0_16, %c8] : memref<8x32xbf16, #tpu.memory_space<vmem>>, vector<8x8xbf16>
    tpu.vector_store %arg15[%c0_16, %c8], %56 {strides = array<i32>} : memref<8x32xbf16, #tpu.memory_space<vmem>>, vector<8x8xbf16>,
    %58 = vector.extract_strided_slice %7 {offsets = [0, 16], sizes = [8, 8], strides = [1, 1]} : vector<8x96xf32> to vector<8x8xf32>
    %59 = vector.shape_cast %58 : vector<8x8xf32> to vector<1x8x8xf32>
    %60 = arith.truncf %59 : vector<1x8x8xf32> to vector<1x8x8xbf16>
    %61 = vector.extract_strided_slice %7 {offsets = [0, 48], sizes = [8, 8], strides = [1, 1]} : vector<8x96xf32> to vector<8x8xf32>
    %62 = vector.shape_cast %61 : vector<8x8xf32> to vector<1x8x8xf32>
    %63 = arith.truncf %62 : vector<1x8x8xf32> to vector<1x8x8xbf16>
    %64 = vector.extract_strided_slice %7 {offsets = [0, 80], sizes = [8, 8], strides = [1, 1]} : vector<8x96xf32> to vector<8x8xf32>
    %65 = vector.shape_cast %64 : vector<8x8xf32> to vector<1x8x8xf32>
    %66 = arith.truncf %65 : vector<1x8x8xf32> to vector<1x8x8xbf16>
    "tpu.trace_start"() <{level = 10 : i32, message = "bqd,bkd->bqk"}> : () -> ()
    %cst_17 = arith.constant dense<0.000000e+00> : vector<1x8x8xf32>
    %67 = tpu.matmul %60, %63, %cst_17 {dimension_numbers = #tpu.dot_dimension_numbers<[2], [2], [1], [1], [0, 0, 0, 1, 1, 1], [0], [0]>} : vector<1x8x8xbf16>, vector<1x8x8xbf16>, vector<1x8x8xf32> -> vector<1x8x8xf32>
    "tpu.trace_stop"() : () -> ()
    %cst_18 = arith.constant dense<0xFF800000> : vector<1x8xf32>
    %68 = vector.multi_reduction <maximumf>, %67, %cst_18 [2] : vector<1x8x8xf32> to vector<1x8xf32>
    %69 = vector.shape_cast %68 : vector<1x8xf32> to vector<1x8x1xf32>
    %70 = vector.broadcast %69 : vector<1x8x1xf32> to vector<1x8x8xf32>
    %71 = arith.subf %67, %70 : vector<1x8x8xf32>
    %72 = math.exp %71 : vector<1x8x8xf32>
    %cst_19 = arith.constant dense<0.000000e+00> : vector<1x8xf32>
    %73 = vector.multi_reduction <add>, %72, %cst_19 [2] : vector<1x8x8xf32> to vector<1x8xf32>
    %74 = vector.shape_cast %73 : vector<1x8xf32> to vector<1x8x1xf32>
    %75 = tpu.reciprocal %74 {approx = true} : vector<1x8x1xf32> -> vector<1x8x1xf32>
    %76 = vector.broadcast %75 : vector<1x8x1xf32> to vector<1x8x8xf32>
    %77 = arith.mulf %72, %76 : vector<1x8x8xf32>
    %78 = arith.truncf %77 : vector<1x8x8xf32> to vector<1x8x8xbf16>
    "tpu.trace_start"() <{level = 10 : i32, message = "bqk,bkd->bqd"}> : () -> ()
    %cst_20 = arith.constant dense<0.000000e+00> : vector<1x8x8xf32>
    %79 = tpu.matmul %78, %66, %cst_20 {dimension_numbers = #tpu.dot_dimension_numbers<[2], [1], [1], [2], [0, 0, 0, 1, 1, 2], [0], [0]>} : vector<1x8x8xbf16>, vector<1x8x8xbf16>, vector<1x8x8xf32> -> vector<1x8x8xf32>
    "tpu.trace_stop"() : () -> ()
    %80 = vector.shape_cast %79 : vector<1x8x8xf32> to vector<8x8xf32>
    %81 = arith.truncf %80 : vector<8x8xf32> to vector<8x8xbf16>
    %c0_21 = arith.constant 0 : index
    %c16 = arith.constant 16 : index
    %82 = vector.load %arg15[%c0_21, %c16] : memref<8x32xbf16, #tpu.memory_space<vmem>>, vector<8x8xbf16>
    tpu.vector_store %arg15[%c0_21, %c16], %81 {strides = array<i32>} : memref<8x32xbf16, #tpu.memory_space<vmem>>, vector<8x8xbf16>,
    %83 = vector.extract_strided_slice %7 {offsets = [0, 24], sizes = [8, 8], strides = [1, 1]} : vector<8x96xf32> to vector<8x8xf32>
    %84 = vector.shape_cast %83 : vector<8x8xf32> to vector<1x8x8xf32>
    %85 = arith.truncf %84 : vector<1x8x8xf32> to vector<1x8x8xbf16>
    %86 = vector.extract_strided_slice %7 {offsets = [0, 56], sizes = [8, 8], strides = [1, 1]} : vector<8x96xf32> to vector<8x8xf32>
    %87 = vector.shape_cast %86 : vector<8x8xf32> to vector<1x8x8xf32>
    %88 = arith.truncf %87 : vector<1x8x8xf32> to vector<1x8x8xbf16>
    %89 = vector.extract_strided_slice %7 {offsets = [0, 88], sizes = [8, 8], strides = [1, 1]} : vector<8x96xf32> to vector<8x8xf32>
    %90 = vector.shape_cast %89 : vector<8x8xf32> to vector<1x8x8xf32>
    %91 = arith.truncf %90 : vector<1x8x8xf32> to vector<1x8x8xbf16>
    "tpu.trace_start"() <{level = 10 : i32, message = "bqd,bkd->bqk"}> : () -> ()
    %cst_22 = arith.constant dense<0.000000e+00> : vector<1x8x8xf32>
    %92 = tpu.matmul %85, %88, %cst_22 {dimension_numbers = #tpu.dot_dimension_numbers<[2], [2], [1], [1], [0, 0, 0, 1, 1, 1], [0], [0]>} : vector<1x8x8xbf16>, vector<1x8x8xbf16>, vector<1x8x8xf32> -> vector<1x8x8xf32>
    "tpu.trace_stop"() : () -> ()
    %cst_23 = arith.constant dense<0xFF800000> : vector<1x8xf32>
    %93 = vector.multi_reduction <maximumf>, %92, %cst_23 [2] : vector<1x8x8xf32> to vector<1x8xf32>
    %94 = vector.shape_cast %93 : vector<1x8xf32> to vector<1x8x1xf32>
    %95 = vector.broadcast %94 : vector<1x8x1xf32> to vector<1x8x8xf32>
    %96 = arith.subf %92, %95 : vector<1x8x8xf32>
    %97 = math.exp %96 : vector<1x8x8xf32>
    %cst_24 = arith.constant dense<0.000000e+00> : vector<1x8xf32>
    %98 = vector.multi_reduction <add>, %97, %cst_24 [2] : vector<1x8x8xf32> to vector<1x8xf32>
    %99 = vector.shape_cast %98 : vector<1x8xf32> to vector<1x8x1xf32>
    %100 = tpu.reciprocal %99 {approx = true} : vector<1x8x1xf32> -> vector<1x8x1xf32>
    %101 = vector.broadcast %100 : vector<1x8x1xf32> to vector<1x8x8xf32>
    %102 = arith.mulf %97, %101 : vector<1x8x8xf32>
    %103 = arith.truncf %102 : vector<1x8x8xf32> to vector<1x8x8xbf16>
    "tpu.trace_start"() <{level = 10 : i32, message = "bqk,bkd->bqd"}> : () -> ()
    %cst_25 = arith.constant dense<0.000000e+00> : vector<1x8x8xf32>
    %104 = tpu.matmul %103, %91, %cst_25 {dimension_numbers = #tpu.dot_dimension_numbers<[2], [1], [1], [2], [0, 0, 0, 1, 1, 2], [0], [0]>} : vector<1x8x8xbf16>, vector<1x8x8xbf16>, vector<1x8x8xf32> -> vector<1x8x8xf32>
    "tpu.trace_stop"() : () -> ()
    %105 = vector.shape_cast %104 : vector<1x8x8xf32> to vector<8x8xf32>
    %106 = arith.truncf %105 : vector<8x8xf32> to vector<8x8xbf16>
    %c0_26 = arith.constant 0 : index
    %c24 = arith.constant 24 : index
    %107 = vector.load %arg15[%c0_26, %c24] : memref<8x32xbf16, #tpu.memory_space<vmem>>, vector<8x8xbf16>
    tpu.vector_store %arg15[%c0_26, %c24], %106 {strides = array<i32>} : memref<8x32xbf16, #tpu.memory_space<vmem>>, vector<8x8xbf16>,
    %c0_27 = arith.constant 0 : index
    %c0_28 = arith.constant 0 : index
    %108 = vector.load %arg15[%c0_27, %c0_28] : memref<8x32xbf16, #tpu.memory_space<vmem>>, vector<8x32xbf16>
    %c0_29 = arith.constant 0 : index
    %c0_30 = arith.constant 0 : index
    %109 = vector.load %arg4[%c0_29, %c0_30] : memref<32x32xbf16, #tpu.memory_space<vmem>>, vector<32x32xbf16>
    %cst_31 = arith.constant dense<0.000000e+00> : vector<8x32xf32>
    %110 = tpu.matmul %108, %109, %cst_31 {dimension_numbers = #tpu.dot_dimension_numbers<[1], [0], [0], [1], [0, 0, 1, 1], [], []>} : vector<8x32xbf16>, vector<32x32xbf16>, vector<8x32xf32> -> vector<8x32xf32>
    %c0_32 = arith.constant 0 : index
    %c0_33 = arith.constant 0 : index
    %111 = vector.load %arg5[%c0_32, %c0_33] : memref<1x32xf32, #tpu.memory_space<vmem>>, vector<1x32xf32>
    %112 = vector.broadcast %111 : vector<1x32xf32> to vector<8x32xf32>
    %113 = arith.addf %110, %112 : vector<8x32xf32>
    %114 = arith.addf %1, %113 : vector<8x32xf32>
    %c0_34 = arith.constant 0 : index
    %c0_35 = arith.constant 0 : index
    %115 = vector.load %arg6[%c0_34, %c0_35] : memref<1x32xf32, #tpu.memory_space<vmem>>, vector<1x32xf32>
    %c0_36 = arith.constant 0 : index
    %c0_37 = arith.constant 0 : index
    %116 = vector.load %arg7[%c0_36, %c0_37] : memref<1x32xf32, #tpu.memory_space<vmem>>, vector<1x32xf32>
    %cst_38 = arith.constant dense<0.000000e+00> : vector<8xf32>
    %117 = vector.multi_reduction <add>, %114, %cst_38 [1] : vector<8x32xf32> to vector<8xf32>
    %118 = vector.shape_cast %117 : vector<8xf32> to vector<8x1xf32>
    %cst_39 = arith.constant 3.200000e+01 : f32
    %119 = vector.broadcast %cst_39 : f32 to vector<8x1xf32>
    %120 = arith.divf %118, %119 : vector<8x1xf32>
    %121 = vector.broadcast %120 : vector<8x1xf32> to vector<8x32xf32>
    %122 = arith.subf %114, %121 : vector<8x32xf32>
    %123 = arith.mulf %122, %122 : vector<8x32xf32>
    %cst_40 = arith.constant dense<0.000000e+00> : vector<8xf32>
    %124 = vector.multi_reduction <add>, %123, %cst_40 [1] : vector<8x32xf32> to vector<8xf32>
    %125 = vector.shape_cast %124 : vector<8xf32> to vector<8x1xf32>
    %cst_41 = arith.constant 3.200000e+01 : f32
    %126 = vector.broadcast %cst_41 : f32 to vector<8x1xf32>
    %127 = arith.divf %125, %126 : vector<8x1xf32>
    %cst_42 = arith.constant 9.99999974E-6 : f32
    %128 = vector.broadcast %cst_42 : f32 to vector<8x1xf32>
    %129 = arith.addf %127, %128 : vector<8x1xf32>
    %130 = math.rsqrt %129 : vector<8x1xf32>
    %131 = vector.broadcast %130 : vector<8x1xf32> to vector<8x32xf32>
    %132 = arith.mulf %122, %131 : vector<8x32xf32>
    %133 = vector.broadcast %115 : vector<1x32xf32> to vector<8x32xf32>
    %134 = arith.mulf %132, %133 : vector<8x32xf32>
    %135 = vector.broadcast %116 : vector<1x32xf32> to vector<8x32xf32>
    %136 = arith.addf %134, %135 : vector<8x32xf32>
    %137 = arith.truncf %136 : vector<8x32xf32> to vector<8x32xbf16>
    %cst_43 = arith.constant 0.000000e+00 : f32
    %138 = vector.broadcast %cst_43 : f32 to vector<8x32xf32>
    %c0_44 = arith.constant 0 : index
    %c0_45 = arith.constant 0 : index
    %139 = vector.load %arg8[%c0_44, %c0_45] : memref<32x128xbf16, #tpu.memory_space<vmem>>, vector<32x128xbf16>
    %cst_46 = arith.constant dense<0.000000e+00> : vector<8x128xf32>
    %140 = tpu.matmul %137, %139, %cst_46 {dimension_numbers = #tpu.dot_dimension_numbers<[1], [0], [0], [1], [0, 0, 1, 1], [], []>} : vector<8x32xbf16>, vector<32x128xbf16>, vector<8x128xf32> -> vector<8x128xf32>
    %c0_47 = arith.constant 0 : index
    %c0_48 = arith.constant 0 : index
    %141 = vector.load %arg9[%c0_47, %c0_48] : memref<1x128xf32, #tpu.memory_space<vmem>>, vector<1x128xf32>
    %142 = vector.broadcast %141 : vector<1x128xf32> to vector<8x128xf32>
    %143 = arith.addf %140, %142 : vector<8x128xf32>
    %cst_49 = arith.constant 5.000000e-01 : f32
    %144 = vector.broadcast %cst_49 : f32 to vector<8x128xf32>
    %145 = arith.mulf %144, %143 : vector<8x128xf32>
    %cst_50 = arith.constant 0.707106769 : f32
    %146 = vector.broadcast %cst_50 : f32 to vector<8x128xf32>
    %147 = arith.mulf %143, %146 : vector<8x128xf32>
    %148 = math.erf %147 : vector<8x128xf32>
    %cst_51 = arith.constant 1.000000e+00 : f32
    %149 = vector.broadcast %cst_51 : f32 to vector<8x128xf32>
    %150 = arith.addf %149, %148 : vector<8x128xf32>
    %151 = arith.mulf %145, %150 : vector<8x128xf32>
    %152 = arith.truncf %151 : vector<8x128xf32> to vector<8x128xbf16>
    %c0_52 = arith.constant 0 : index
    %c0_53 = arith.constant 0 : index
    %153 = vector.load %arg10[%c0_52, %c0_53] : memref<128x32xbf16, #tpu.memory_space<vmem>>, vector<128x32xbf16>
    %cst_54 = arith.constant dense<0.000000e+00> : vector<8x32xf32>
    %154 = tpu.matmul %152, %153, %cst_54 {dimension_numbers = #tpu.dot_dimension_numbers<[1], [0], [0], [1], [0, 0, 1, 1], [], []>} : vector<8x128xbf16>, vector<128x32xbf16>, vector<8x32xf32> -> vector<8x32xf32>
    %155 = arith.addf %138, %154 : vector<8x32xf32>
    %c0_55 = arith.constant 0 : index
    %c0_56 = arith.constant 0 : index
    %156 = vector.load %arg11[%c0_55, %c0_56] : memref<1x32xf32, #tpu.memory_space<vmem>>, vector<1x32xf32>
    %157 = vector.broadcast %156 : vector<1x32xf32> to vector<8x32xf32>
    %158 = arith.addf %155, %157 : vector<8x32xf32>
    %159 = arith.addf %136, %158 : vector<8x32xf32>
    %c0_57 = arith.constant 0 : index
    %c0_58 = arith.constant 0 : index
    %160 = vector.load %arg12[%c0_57, %c0_58] : memref<1x32xf32, #tpu.memory_space<vmem>>, vector<1x32xf32>
    %c0_59 = arith.constant 0 : index
    %c0_60 = arith.constant 0 : index
    %161 = vector.load %arg13[%c0_59, %c0_60] : memref<1x32xf32, #tpu.memory_space<vmem>>, vector<1x32xf32>
    %cst_61 = arith.constant dense<0.000000e+00> : vector<8xf32>
    %162 = vector.multi_reduction <add>, %159, %cst_61 [1] : vector<8x32xf32> to vector<8xf32>
    %163 = vector.shape_cast %162 : vector<8xf32> to vector<8x1xf32>
    %cst_62 = arith.constant 3.200000e+01 : f32
    %164 = vector.broadcast %cst_62 : f32 to vector<8x1xf32>
    %165 = arith.divf %163, %164 : vector<8x1xf32>
    %166 = vector.broadcast %165 : vector<8x1xf32> to vector<8x32xf32>
    %167 = arith.subf %159, %166 : vector<8x32xf32>
    %168 = arith.mulf %167, %167 : vector<8x32xf32>
    %cst_63 = arith.constant dense<0.000000e+00> : vector<8xf32>
    %169 = vector.multi_reduction <add>, %168, %cst_63 [1] : vector<8x32xf32> to vector<8xf32>
    %170 = vector.shape_cast %169 : vector<8xf32> to vector<8x1xf32>
    %cst_64 = arith.constant 3.200000e+01 : f32
    %171 = vector.broadcast %cst_64 : f32 to vector<8x1xf32>
    %172 = arith.divf %170, %171 : vector<8x1xf32>
    %cst_65 = arith.constant 9.99999974E-6 : f32
    %173 = vector.broadcast %cst_65 : f32 to vector<8x1xf32>
    %174 = arith.addf %172, %173 : vector<8x1xf32>
    %175 = math.rsqrt %174 : vector<8x1xf32>
    %176 = vector.broadcast %175 : vector<8x1xf32> to vector<8x32xf32>
    %177 = arith.mulf %167, %176 : vector<8x32xf32>
    %178 = vector.broadcast %160 : vector<1x32xf32> to vector<8x32xf32>
    %179 = arith.mulf %177, %178 : vector<8x32xf32>
    %180 = vector.broadcast %161 : vector<1x32xf32> to vector<8x32xf32>
    %181 = arith.addf %179, %180 : vector<8x32xf32>
    %182 = vector.shape_cast %181 : vector<8x32xf32> to vector<1x8x32xf32>
    %c0_66 = arith.constant 0 : index
    %c0_67 = arith.constant 0 : index
    %c0_68 = arith.constant 0 : index
    %183 = vector.load %arg14[%c0_66, %c0_67, %c0_68] : memref<1x8x32xf32, #tpu.memory_space<vmem>>, vector<1x8x32xf32>
    tpu.vector_store %arg14[%c0_66, %c0_67, %c0_68], %182 {strides = array<i32>} : memref<1x8x32xf32, #tpu.memory_space<vmem>>, vector<1x8x32xf32>,
    return
  }
  func.func @transform_0(%arg0: i32) -> (i32, i32, i32) {
    %c0_i32 = arith.constant 0 : i32
    %c0_i32_0 = arith.constant 0 : i32
    %c0_i32_1 = arith.constant 0 : i32
    return %arg0, %c0_i32, %c0_i32_0 : i32, i32, i32
  }
  func.func @transform_1(%arg0: i32) -> (i32, i32) {
    %c0_i32 = arith.constant 0 : i32
    %c0_i32_0 = arith.constant 0 : i32
    %c0_i32_1 = arith.constant 0 : i32
    return %c0_i32, %c0_i32_0 : i32, i32
  }
  func.func @transform_2(%arg0: i32) -> (i32, i32) {
    %c0_i32 = arith.constant 0 : i32
    %c0_i32_0 = arith.constant 0 : i32
    %c0_i32_1 = arith.constant 0 : i32
    return %c0_i32, %c0_i32_0 : i32, i32
  }
  func.func @transform_3(%arg0: i32) -> (i32, i32) {
    %c0_i32 = arith.constant 0 : i32
    %c0_i32_0 = arith.constant 0 : i32
    %c0_i32_1 = arith.constant 0 : i32
    return %c0_i32, %c0_i32_0 : i32, i32
  }
  func.func @transform_4(%arg0: i32) -> (i32, i32) {
    %c0_i32 = arith.constant 0 : i32
    %c0_i32_0 = arith.constant 0 : i32
    %c0_i32_1 = arith.constant 0 : i32
    return %c0_i32, %c0_i32_0 : i32, i32
  }
  func.func @transform_5(%arg0: i32) -> (i32, i32) {
    %c0_i32 = arith.constant 0 : i32
    %c0_i32_0 = arith.constant 0 : i32
    %c0_i32_1 = arith.constant 0 : i32
    return %c0_i32, %c0_i32_0 : i32, i32
  }
  func.func @transform_6(%arg0: i32) -> (i32, i32) {
    %c0_i32 = arith.constant 0 : i32
    %c0_i32_0 = arith.constant 0 : i32
    %c0_i32_1 = arith.constant 0 : i32
    return %c0_i32, %c0_i32_0 : i32, i32
  }
  func.func @transform_7(%arg0: i32) -> (i32, i32) {
    %c0_i32 = arith.constant 0 : i32
    %c0_i32_0 = arith.constant 0 : i32
    %c0_i32_1 = arith.constant 0 : i32
    return %c0_i32, %c0_i32_0 : i32, i32
  }
  func.func @transform_8(%arg0: i32) -> (i32, i32) {
    %c0_i32 = arith.constant 0 : i32
    %c0_i32_0 = arith.constant 0 : i32
    %c0_i32_1 = arith.constant 0 : i32
    return %c0_i32, %c0_i32_0 : i32, i32
  }
  func.func @transform_9(%arg0: i32) -> (i32, i32) {
    %c0_i32 = arith.constant 0 : i32
    %c0_i32_0 = arith.constant 0 : i32
    %c0_i32_1 = arith.constant 0 : i32
    return %c0_i32, %c0_i32_0 : i32, i32
  }
  func.func @transform_10(%arg0: i32) -> (i32, i32) {
    %c0_i32 = arith.constant 0 : i32
    %c0_i32_0 = arith.constant 0 : i32
    %c0_i32_1 = arith.constant 0 : i32
    return %c0_i32, %c0_i32_0 : i32, i32
  }
  func.func @transform_11(%arg0: i32) -> (i32, i32) {
    %c0_i32 = arith.constant 0 : i32
    %c0_i32_0 = arith.constant 0 : i32
    %c0_i32_1 = arith.constant 0 : i32
    return %c0_i32, %c0_i32_0 : i32, i32
  }
  func.func @transform_12(%arg0: i32) -> (i32, i32) {
    %c0_i32 = arith.constant 0 : i32
    %c0_i32_0 = arith.constant 0 : i32
    %c0_i32_1 = arith.constant 0 : i32
    return %c0_i32, %c0_i32_0 : i32, i32
  }
  func.func @transform_13(%arg0: i32) -> (i32, i32, i32) {
    %c0_i32 = arith.constant 0 : i32
    %c0_i32_0 = arith.constant 0 : i32
    %c0_i32_1 = arith.constant 0 : i32
    return %arg0, %c0_i32, %c0_i32_0 : i32, i32, i32
  }
}

</mosaic_0001>

<bundles_post_ra>
// kernel: tpu_custom_call.1
= control target key start
LH: loop header
LB: loop body
LE: loop exit
PB: predicated region body
PF: predicated region fallthrough
CT: control target
= control target key end

     0   :  { %s3203_s0 = inlined_call_operand.hbm [shape: f32[2,8,32], index: 0, kind: input, shape index: {}]   ;;  %s3204_s1 = inlined_call_operand.hbm [shape: bf16[32,96], index: 1, kind: input, shape index: {}]   ;;  %s3205_s2 = inlined_call_operand.hbm [shape: f32[1,96], index: 2, kind: input, shape index: {}]   ;;  %s3206_s3 = inlined_call_operand.hbm [shape: bf16[32,32], index: 3, kind: input, shape index: {}]   ;;  %s3207_s4 = inlined_call_operand.hbm [shape: f32[1,32], index: 4, kind: input, shape index: {}]   ;;  %s3208_s5 = inlined_call_operand.hbm [shape: f32[1,32], index: 5, kind: input, shape index: {}]   ;;  %s3209_s6 = inlined_call_operand.hbm [shape: f32[1,32], index: 6, kind: input, shape index: {}]   ;;  %s3210_s7 = inlined_call_operand.hbm [shape: bf16[32,128], index: 7, kind: input, shape index: {}]   ;;  %s3211_s8 = inlined_call_operand.hbm [shape: f32[1,128], index: 8, kind: input, shape index: {}]   ;;  %s3212_s9 = inlined_call_operand.hbm [shape: bf16[128,32], index: 9, kind: input, shape index: {}]   ;;  %s3213_s10 = inlined_call_operand.hbm [shape: f32[1,32], index: 10, kind: input, shape index: {}]   ;;  %s3214_s11 = inlined_call_operand.hbm [shape: f32[1,32], index: 11, kind: input, shape index: {}]   ;;  %s3215_s12 = inlined_call_operand.hbm [shape: f32[1,32], index: 12, kind: input, shape index: {}]   ;;  %s3216_s13 = inlined_call_operand.hbm [shape: f32[2,8,32], index: 13, kind: output, shape index: {}]  }
   0x1   :  { %3228 = sst [smem:[#allocation36_spill]] %s3203_s0 }
   0x2   :  { %3229 = sst [smem:[#allocation37_spill]] %s3204_s1 }
   0x3   :  { %3230 = sst [smem:[#allocation38_spill]] %s3205_s2 }
   0x4   :  { %3231 = sst [smem:[#allocation39_spill]] %s3216_s13 }
   0x5   :  { %18 = vsyncpa [#allocation4], 0 }
   0x6   :  { %20 = vsyncpa [#allocation4 + $0x1], 0 }
   0x7   :  { %21 = vsyncpa [#allocation7], 0 }
   0x8   :  { %22 = vsyncpa [#allocation10], 0 }
   0x9   :  { %23 = vsyncpa [#allocation13], 0 }
   0xa   :  { %24 = vsyncpa [#allocation16], 0 }
   0xb   :  { %25 = vsyncpa [#allocation19], 0 }
   0xc   :  { %26 = vsyncpa [#allocation22], 0 }
   0xd   :  { %27 = vsyncpa [#allocation5], 0 }
   0xe   :  { %29 = vsyncpa [#allocation5 + $0x1], 0  ;;  %s2649_s25 = smov 0   ;;  %s2651_s26 = smov 0  }
   0xf   :  { %s2653_s27 = smov 0   ;;  %s2655_s28 = smov 0  }
  0x10 LB: > { %3232 = sst [smem:[#allocation33_spill]] %s2533_s25  ;;  %s2547_s29 = smov [#allocation6]   ;;  %s2545_s28 = sphi %s2655_s28, %s3273_s28   ;;  %s2541_s27 = sphi %s2653_s27, %s3272_s27   ;;  %s2537_s26 = sphi %s2651_s26, %s3271_s26   ;;  %s2533_s25 = sphi %s2649_s25, %s3270_s25  }
  0x11   : > { %s356_s30 = sshll.u32 %s2547_s29, 4  ;;  %s2670_s14 = sadd.s32 4294967295, %s2545_s28   ;;  %s2675_s30 = int_to_ptr.vmem [resolvable:$true] %s356_s30 }
  0x12   : > { %3233 = sst [smem:[#allocation34_spill]] %s2670_s14  ;;  %p1668_p0 = scmp.ge.s32.totalorder %s2545_s28, 1 }
  0x13   : > { %p3225_p1 = scmp.eq.s32.totalorder %s2670_s14, 0  ;;  %p344_p2 = scmp.lt.s32.totalorder %s2545_s28, 3 }
  0x14   : > { %s2548_s16 = smov [#allocation9]   ;;  %s2549_s19 = smov [#allocation12]  }
  0x15   : > { %p2677_p3 = pnand %p1668_p0, %p344_p2  ;;  %s380_s17 = sshll.u32 %s2548_s16, 4  ;;  %s2690_s17 = int_to_ptr.vmem [resolvable:$true] %s380_s17 }
  0x16   : > { %s405_s20 = sshll.u32 %s2549_s19, 4  ;;  %s3237_s1 = sld [smem:[#allocation37_spill]]  ;;  %s2692_s20 = int_to_ptr.vmem [resolvable:$true] %s405_s20 }
  0x17   : > { %s3234_s15 = scalar_select %p2677_p3, 1, 0 }
  0x18   : > { %p1920_p5 = pneg %p2677_p3 }
  0x19   : > { %3235 = sst [smem:[#allocation35_spill]] %s3234_s15 }
  0x1a   : > { %p2686_p6 = pnand %p1920_p5, %p3225_p1 }
  0x1c   : > { %s2089_s23 = scalar_lea.hbm %s3237_s1, 256  ;;  %p2702_p8 = pneg %p2686_p6 }
  0x1d   : > { %p2090_p7 = scmp.ne.s32.totalorder %s3237_s1, %s2089_s23  ;;  %p2096_p11 = scmp.lt.u32.totalorder %s2089_s23, %s3237_s1 }
  0x1f   : > { %p2092_p9 = pnand %p2702_p8, %p2090_p7 }
  0x21   : > { %p2093_p10 = pneg %p2092_p9 }
  0x23   : > { %p2098_p12 = pnand %p2096_p11, %p2093_p10 }
  0x25   : > { %2101 = shalt.err (!%p2098_p12)
}
  0x26   : > { %s2102_s21 = scalar_lea.vmem %s2675_s30, 256  ;;  %p2110_p5 = scmp.lt.s32.totalorder %s2675_s30, %s2675_s30 }
  0x27   : > { %p2103_p13 = scmp.ne.s32.totalorder %s2675_s30, %s2102_s21  ;;  %p2111_p4 = scmp.lt.s32.totalorder %s2102_s21, %s2102_s21 }
  0x29   : > { %p2105_p0 = pnand %p2103_p13, %p2702_p8  ;;  %p2112_p7 = por %p2111_p4, %p2110_p5 }
  0x2b   : > { %p2106_p2 = pneg %p2105_p0 }
  0x2d   : > { %p2113_p9 = pnand %p2112_p7, %p2106_p2 }
  0x2f   : > { %2116 = shalt.err (!%p2113_p9)
}
  0x30   : > { %s3223_s22 = smov 64   ;;  %s2551_s13 = smov 4  }
  0x31   : > { %1923 = dma.hbm_to_vmem [thread:$0]  (!%p2686_p6), %s3237_s1, 256, %s2675_s30, [#allocation7], %s3223_s22, %s3223_s22, %s2551_s13  }
  0x32   : > { %s2117_s21 = scalar_lea.hbm %s3206_s3, 256 }
  0x33   : > { %p2118_p4 = scmp.ne.s32.totalorder %s3206_s3, %s2117_s21  ;;  %p2124_p12 = scmp.lt.u32.totalorder %s2117_s21, %s3206_s3 }
  0x35   : > { %p2120_p10 = pnand %p2118_p4, %p2702_p8 }
  0x37   : > { %p2121_p11 = pneg %p2120_p10 }
  0x39   : > { %p2126_p13 = pnand %p2124_p12, %p2121_p11 }
  0x3b   : > { %2129 = shalt.err (!%p2126_p13)
}
  0x3c   : > { %s2130_s30 = scalar_lea.vmem %s2690_s17, 256  ;;  %p2138_p7 = scmp.lt.s32.totalorder %s2690_s17, %s2690_s17 }
  0x3d   : > { %p2131_p0 = scmp.ne.s32.totalorder %s2690_s17, %s2130_s30  ;;  %p2139_p9 = scmp.lt.s32.totalorder %s2130_s30, %s2130_s30 }
  0x3f   : > { %p2133_p2 = pnand %p2131_p0, %p2702_p8  ;;  %p2140_p4 = por %p2139_p9, %p2138_p7 }
  0x41   : > { %p2134_p5 = pneg %p2133_p2 }
  0x43   : > { %p2141_p10 = pnand %p2140_p4, %p2134_p5 }
  0x45   : > { %2144 = shalt.err (!%p2141_p10)
}
  0x46   : > { %1929 = dma.hbm_to_vmem [thread:$0]  (!%p2686_p6), %s3206_s3, 256, %s2690_s17, [#allocation10], %s3223_s22, %s3223_s22, %s2551_s13  }
  0x47   : > { %s2145_s23 = scalar_lea.hbm %s3208_s5, 16 }
  0x48   : > { %p2146_p11 = scmp.ne.s32.totalorder %s3208_s5, %s2145_s23  ;;  %p2152_p0 = scmp.lt.u32.totalorder %s2145_s23, %s3208_s5 }
  0x4a   : > { %p2148_p12 = pnand %p2146_p11, %p2702_p8 }
  0x4c   : > { %p2149_p13 = pneg %p2148_p12 }
  0x4e   : > { %p2154_p2 = pnand %p2152_p0, %p2149_p13 }
  0x50   : > { %2157 = shalt.err (!%p2154_p2)
}
  0x51   : > { %s2158_s17 = scalar_lea.vmem %s2692_s20, 16  ;;  %s2165_s30 = scalar_lea.vmem %s2692_s20, 32 }
  0x52   : > { %p2159_p5 = scmp.ne.s32.totalorder %s2692_s20, %s2158_s17  ;;  %p2166_p4 = scmp.lt.s32.totalorder %s2692_s20, %s2692_s20 }
  0x53   : > { %p2167_p10 = scmp.lt.s32.totalorder %s2165_s30, %s2158_s17 }
  0x54   : > { %p2161_p7 = pnand %p2159_p5, %p2702_p8 }
  0x55   : > { %p2168_p11 = por %p2167_p10, %p2166_p4 }
  0x56   : > { %p2162_p9 = pneg %p2161_p7 }
  0x58   : > { %p2169_p12 = pnand %p2168_p11, %p2162_p9 }
  0x5a   : > { %2172 = shalt.err (!%p2169_p12)
}
  0x5b   : > { %1935 = dma.hbm_to_vmem [thread:$0]  (!%p2686_p6), %s3208_s5, 16, %s2692_s20, [#allocation13]  }
  0x5c   : > { %s2552_s14 = smov [#allocation15]   ;;  %s2553_s23 = smov [#allocation18]  }
  0x5d   : > { %s426_s15 = sshll.u32 %s2552_s14, 4  ;;  %s450_s24 = sshll.u32 %s2553_s23, 4  ;;  %s427_s15 = int_to_ptr.vmem [resolvable:$true] %s426_s15  ;;  %s451_s24 = int_to_ptr.vmem [resolvable:$true] %s450_s24 }
  0x5e   : > { %s2173_s21 = scalar_lea.hbm %s3210_s7, 256 }
  0x5f   : > { %p2174_p13 = scmp.ne.s32.totalorder %s3210_s7, %s2173_s21  ;;  %p2180_p5 = scmp.lt.u32.totalorder %s2173_s21, %s3210_s7 }
  0x61   : > { %p2176_p0 = pnand %p2174_p13, %p2702_p8 }
  0x63   : > { %p2177_p2 = pneg %p2176_p0 }
  0x65   : > { %p2182_p7 = pnand %p2180_p5, %p2177_p2 }
  0x67   : > { %2185 = shalt.err (!%p2182_p7)
}
  0x68   : > { %s2186_s20 = scalar_lea.vmem %s427_s15, 256  ;;  %p2194_p11 = scmp.lt.s32.totalorder %s427_s15, %s427_s15 }
  0x69   : > { %p2187_p9 = scmp.ne.s32.totalorder %s427_s15, %s2186_s20  ;;  %p2195_p12 = scmp.lt.s32.totalorder %s2186_s20, %s2186_s20 }
  0x6b   : > { %p2189_p4 = pnand %p2187_p9, %p2702_p8  ;;  %p2196_p1 = por %p2195_p12, %p2194_p11 }
  0x6d   : > { %p2190_p10 = pneg %p2189_p4 }
  0x6f   : > { %p2197_p3 = pnand %p2196_p1, %p2190_p10 }
  0x71   : > { %2200 = shalt.err (!%p2197_p3)
}
  0x72   : > { %s3239_s25 = smov 64   ;;  %s2201_s19 = scalar_lea.hbm %s3212_s9, 1024 }
  0x73   : > { %1941 = dma.hbm_to_vmem [thread:$0]  (!%p2686_p6), %s3210_s7, 256, %s427_s15, [#allocation16], %s3239_s25, %s3239_s25, %s2551_s13  }
  0x74   : > { %p2202_p1 = scmp.ne.s32.totalorder %s3212_s9, %s2201_s19  ;;  %p2208_p0 = scmp.lt.u32.totalorder %s2201_s19, %s3212_s9 }
  0x76   : > { %p2204_p3 = pnand %p2202_p1, %p2702_p8 }
  0x78   : > { %p2205_p13 = pneg %p2204_p3 }
  0x7a   : > { %p2210_p2 = pnand %p2208_p0, %p2205_p13 }
  0x7c   : > { %2213 = shalt.err (!%p2210_p2)
}
  0x7d   : > { %s2214_s20 = scalar_lea.vmem %s451_s24, 1024  ;;  %p2222_p4 = scmp.lt.s32.totalorder %s451_s24, %s451_s24 }
  0x7e   : > { %p2215_p5 = scmp.ne.s32.totalorder %s451_s24, %s2214_s20  ;;  %p2223_p10 = scmp.lt.s32.totalorder %s2214_s20, %s2214_s20 }
  0x80   : > { %p2217_p7 = pnand %p2215_p5, %p2702_p8  ;;  %p2224_p11 = por %p2223_p10, %p2222_p4 }
  0x82   : > { %p2218_p9 = pneg %p2217_p7 }
  0x84   : > { %p2225_p12 = pnand %p2224_p11, %p2218_p9 }
  0x86   : > { %2228 = shalt.err (!%p2225_p12)
}
  0x87   : > { %1947 = dma.hbm_to_vmem [thread:$0]  (!%p2686_p6), %s3212_s9, 1024, %s451_s24, [#allocation19], %s3239_s25, %s3239_s25, %s2551_s13  }
  0x88   : > { %s2554_s14 = smov [#allocation21]   ;;  %s2555_s29 = smov [#allocation8]  }
  0x89   : > { %s475_s23 = sshll.u32 %s2554_s14, 4  ;;  %s370_s19 = sshll.u32 %s2555_s29, 4  ;;  %s476_s23 = int_to_ptr.vmem [resolvable:$true] %s475_s23  ;;  %s371_s19 = int_to_ptr.vmem [resolvable:$true] %s370_s19 }
  0x8a   : > { %s2229_s30 = scalar_lea.hbm %s3214_s11, 16 }
  0x8b   : > { %p2230_p1 = scmp.ne.s32.totalorder %s3214_s11, %s2229_s30  ;;  %p2236_p0 = scmp.lt.u32.totalorder %s2229_s30, %s3214_s11 }
  0x8d   : > { %p2232_p3 = pnand %p2230_p1, %p2702_p8 }
  0x8f   : > { %p2233_p13 = pneg %p2232_p3 }
  0x91   : > { %p2238_p2 = pnand %p2236_p0, %p2233_p13 }
  0x93   : > { %2241 = shalt.err (!%p2238_p2)
}
  0x94   : > { %s2242_s13 = scalar_lea.vmem %s476_s23, 16  ;;  %s2249_s24 = scalar_lea.vmem %s476_s23, 32 }
  0x95   : > { %p2243_p5 = scmp.ne.s32.totalorder %s476_s23, %s2242_s13  ;;  %p2250_p4 = scmp.lt.s32.totalorder %s476_s23, %s476_s23 }
  0x96   : > { %p2251_p10 = scmp.lt.s32.totalorder %s2249_s24, %s2242_s13 }
  0x97   : > { %p2245_p7 = pnand %p2243_p5, %p2702_p8 }
  0x98   : > { %p2252_p11 = por %p2251_p10, %p2250_p4 }
  0x99   : > { %p2246_p9 = pneg %p2245_p7 }
  0x9b   : > { %p2253_p12 = pnand %p2252_p11, %p2246_p9 }
  0x9d   : > { %2256 = shalt.err (!%p2253_p12)
}
  0x9e   : > { %1953 = dma.hbm_to_vmem [thread:$0]  (!%p2686_p6), %s3214_s11, 16, %s476_s23, [#allocation22]  }
  0x9f   : > { %s3240_s2 = sld [smem:[#allocation38_spill]] }
  0xa5   : > { %s2257_s29 = scalar_lea.hbm %s3240_s2, 16 }
  0xa6   : > { %p2258_p1 = scmp.ne.s32.totalorder %s3240_s2, %s2257_s29  ;;  %p2264_p0 = scmp.lt.u32.totalorder %s2257_s29, %s3240_s2 }
  0xa8   : > { %p2260_p3 = pnand %p2258_p1, %p2702_p8 }
  0xaa   : > { %p2261_p13 = pneg %p2260_p3 }
  0xac   : > { %p2266_p2 = pnand %p2264_p0, %p2261_p13 }
  0xae   : > { %2269 = shalt.err (!%p2266_p2)
}
  0xaf   : > { %s2270_s20 = scalar_lea.vmem %s371_s19, 16  ;;  %s2277_s23 = scalar_lea.vmem %s371_s19, 32 }
  0xb0   : > { %p2271_p5 = scmp.ne.s32.totalorder %s371_s19, %s2270_s20  ;;  %p2278_p4 = scmp.lt.s32.totalorder %s371_s19, %s371_s19 }
  0xb1   : > { %p2279_p10 = scmp.lt.s32.totalorder %s2277_s23, %s2270_s20 }
  0xb2   : > { %p2273_p7 = pnand %p2271_p5, %p2702_p8 }
  0xb3   : > { %p2280_p11 = por %p2279_p10, %p2278_p4 }
  0xb4   : > { %p2274_p9 = pneg %p2273_p7 }
  0xb6   : > { %p2281_p12 = pnand %p2280_p11, %p2274_p9 }
  0xb8   : > { %2284 = shalt.err (!%p2281_p12)
}
  0xb9   : > { %1926 = dma.hbm_to_vmem [thread:$0]  (!%p2686_p6), %s3240_s2, 16, %s371_s19, [#allocation7]  }
  0xba   : > { %s2556_s24 = smov [#allocation11]   ;;  %s2557_s22 = smov [#allocation14]  }
  0xbb   : > { %s394_s25 = sshll.u32 %s2556_s24, 4  ;;  %s416_s1 = sshll.u32 %s2557_s22, 4  ;;  %s395_s25 = int_to_ptr.vmem [resolvable:$true] %s394_s25  ;;  %s417_s1 = int_to_ptr.vmem [resolvable:$true] %s416_s1 }
  0xbc   : > { %s2285_s21 = scalar_lea.hbm %s3207_s4, 16 }
  0xbd   : > { %p2286_p1 = scmp.ne.s32.totalorder %s3207_s4, %s2285_s21  ;;  %p2292_p0 = scmp.lt.u32.totalorder %s2285_s21, %s3207_s4 }
  0xbf   : > { %p2288_p3 = pnand %p2286_p1, %p2702_p8 }
  0xc1   : > { %p2289_p13 = pneg %p2288_p3 }
  0xc3   : > { %p2294_p2 = pnand %p2292_p0, %p2289_p13 }
  0xc5   : > { %2297 = shalt.err (!%p2294_p2)
}
  0xc6   : > { %s2298_s19 = scalar_lea.vmem %s395_s25, 16  ;;  %s2305_s23 = scalar_lea.vmem %s395_s25, 32 }
  0xc7   : > { %p2299_p5 = scmp.ne.s32.totalorder %s395_s25, %s2298_s19  ;;  %p2306_p4 = scmp.lt.s32.totalorder %s395_s25, %s395_s25 }
  0xc8   : > { %p2307_p10 = scmp.lt.s32.totalorder %s2305_s23, %s2298_s19 }
  0xc9   : > { %p2301_p7 = pnand %p2299_p5, %p2702_p8 }
  0xca   : > { %p2308_p11 = por %p2307_p10, %p2306_p4 }
  0xcb   : > { %p2302_p9 = pneg %p2301_p7 }
  0xcd   : > { %p2309_p12 = pnand %p2308_p11, %p2302_p9 }
  0xcf   : > { %2312 = shalt.err (!%p2309_p12)
}
  0xd0   : > { %1932 = dma.hbm_to_vmem [thread:$0]  (!%p2686_p6), %s3207_s4, 16, %s395_s25, [#allocation10]  }
  0xd1   : > { %s2313_s14 = scalar_lea.hbm %s3209_s6, 16 }
  0xd2   : > { %p2314_p1 = scmp.ne.s32.totalorder %s3209_s6, %s2313_s14  ;;  %p2320_p0 = scmp.lt.u32.totalorder %s2313_s14, %s3209_s6 }
  0xd4   : > { %p2316_p3 = pnand %p2314_p1, %p2702_p8 }
  0xd6   : > { %p2317_p13 = pneg %p2316_p3 }
  0xd8   : > { %p2322_p2 = pnand %p2320_p0, %p2317_p13 }
  0xda   : > { %2325 = shalt.err (!%p2322_p2)
}
  0xdb   : > { %s2326_s0 = scalar_lea.vmem %s417_s1, 16  ;;  %s2333_s25 = scalar_lea.vmem %s417_s1, 32 }
  0xdc   : > { %p2327_p5 = scmp.ne.s32.totalorder %s417_s1, %s2326_s0  ;;  %p2334_p4 = scmp.lt.s32.totalorder %s417_s1, %s417_s1 }
  0xdd   : > { %p2335_p10 = scmp.lt.s32.totalorder %s2333_s25, %s2326_s0 }
  0xde   : > { %p2329_p7 = pnand %p2327_p5, %p2702_p8 }
  0xdf   : > { %p2336_p11 = por %p2335_p10, %p2334_p4 }
  0xe0   : > { %p2330_p9 = pneg %p2329_p7 }
  0xe2   : > { %p2337_p12 = pnand %p2336_p11, %p2330_p9 }
  0xe4   : > { %2340 = shalt.err (!%p2337_p12)
}
  0xe5   : > { %1938 = dma.hbm_to_vmem [thread:$0]  (!%p2686_p6), %s3209_s6, 16, %s417_s1, [#allocation13]  }
  0xe6   : > { %s2558_s23 = smov [#allocation17]   ;;  %s2559_s13 = smov [#allocation20]  }
  0xe7   : > { %s440_s15 = sshll.u32 %s2558_s23, 4  ;;  %s464_s24 = sshll.u32 %s2559_s13, 4  ;;  %s441_s15 = int_to_ptr.vmem [resolvable:$true] %s440_s15  ;;  %s465_s24 = int_to_ptr.vmem [resolvable:$true] %s464_s24 }
  0xe8   : > { %s2341_s29 = scalar_lea.hbm %s3211_s8, 16 }
  0xe9   : > { %p2342_p1 = scmp.ne.s32.totalorder %s3211_s8, %s2341_s29  ;;  %p2348_p0 = scmp.lt.u32.totalorder %s2341_s29, %s3211_s8 }
  0xeb   : > { %p2344_p3 = pnand %p2342_p1, %p2702_p8 }
  0xed   : > { %p2345_p13 = pneg %p2344_p3 }
  0xef   : > { %p2350_p2 = pnand %p2348_p0, %p2345_p13 }
  0xf1   : > { %2353 = shalt.err (!%p2350_p2)
}
  0xf2   : > { %s2354_s1 = scalar_lea.vmem %s441_s15, 16  ;;  %s2361_s25 = scalar_lea.vmem %s441_s15, 32 }
  0xf3   : > { %p2355_p5 = scmp.ne.s32.totalorder %s441_s15, %s2354_s1  ;;  %p2362_p4 = scmp.lt.s32.totalorder %s441_s15, %s441_s15 }
  0xf4   : > { %p2363_p10 = scmp.lt.s32.totalorder %s2361_s25, %s2354_s1 }
  0xf5   : > { %p2357_p7 = pnand %p2355_p5, %p2702_p8 }
  0xf6   : > { %p2364_p11 = por %p2363_p10, %p2362_p4 }
  0xf7   : > { %p2358_p9 = pneg %p2357_p7 }
  0xf9   : > { %p2365_p12 = pnand %p2364_p11, %p2358_p9 }
  0xfb   : > { %2368 = shalt.err (!%p2365_p12)
}
  0xfc   : > { %1944 = dma.hbm_to_vmem [thread:$0]  (!%p2686_p6), %s3211_s8, 16, %s441_s15, [#allocation16]  }
  0xfd   : > { %s2369_s22 = scalar_lea.hbm %s3213_s10, 16 }
  0xfe   : > { %p2370_p1 = scmp.ne.s32.totalorder %s3213_s10, %s2369_s22  ;;  %p2376_p0 = scmp.lt.u32.totalorder %s2369_s22, %s3213_s10 }
 0x100   : > { %p2372_p3 = pnand %p2370_p1, %p2702_p8 }
 0x102   : > { %p2373_p13 = pneg %p2372_p3 }
 0x104   : > { %p2378_p2 = pnand %p2376_p0, %p2373_p13 }
 0x106   : > { %2381 = shalt.err (!%p2378_p2)
}
 0x107   : > { %s2382_s30 = scalar_lea.vmem %s465_s24, 16  ;;  %s2389_s15 = scalar_lea.vmem %s465_s24, 32 }
 0x108   : > { %p2383_p5 = scmp.ne.s32.totalorder %s465_s24, %s2382_s30  ;;  %p2390_p4 = scmp.lt.s32.totalorder %s465_s24, %s465_s24 }
 0x109   : > { %p2391_p10 = scmp.lt.s32.totalorder %s2389_s15, %s2382_s30 }
 0x10a   : > { %p2385_p7 = pnand %p2383_p5, %p2702_p8 }
 0x10b   : > { %p2392_p11 = por %p2391_p10, %p2390_p4 }
 0x10c   : > { %p2386_p9 = pneg %p2385_p7 }
 0x10e   : > { %p2393_p12 = pnand %p2392_p11, %p2386_p9 }
 0x110   : > { %2396 = shalt.err (!%p2393_p12)
}
 0x111   : > { %1950 = dma.hbm_to_vmem [thread:$0]  (!%p2686_p6), %s3213_s10, 16, %s465_s24, [#allocation19]  }
 0x112   : > { %s2560_s25 = smov [#allocation23]   ;;  %s2397_s13 = scalar_lea.hbm %s3215_s12, 16 }
 0x113   : > { %s486_s20 = sshll.u32 %s2560_s25, 4  ;;  %p2398_p1 = scmp.ne.s32.totalorder %s3215_s12, %s2397_s13  ;;  %s487_s20 = int_to_ptr.vmem [resolvable:$true] %s486_s20 }
 0x114   : > { %p2404_p0 = scmp.lt.u32.totalorder %s2397_s13, %s3215_s12 }
 0x115   : > { %p2400_p3 = pnand %p2398_p1, %p2702_p8 }
 0x117   : > { %p2401_p13 = pneg %p2400_p3 }
 0x119   : > { %p2406_p2 = pnand %p2404_p0, %p2401_p13 }
 0x11b   : > { %2409 = shalt.err (!%p2406_p2)
}
 0x11c   : > { %s2410_s24 = scalar_lea.vmem %s487_s20, 16  ;;  %s2417_s17 = scalar_lea.vmem %s487_s20, 32 }
 0x11d   : > { %p2411_p5 = scmp.ne.s32.totalorder %s487_s20, %s2410_s24  ;;  %p2418_p4 = scmp.lt.s32.totalorder %s487_s20, %s487_s20 }
 0x11e   : > { %p2419_p10 = scmp.lt.s32.totalorder %s2417_s17, %s2410_s24 }
 0x11f   : > { %p2413_p7 = pnand %p2411_p5, %p2702_p8 }
 0x120   : > { %p2420_p11 = por %p2419_p10, %p2418_p4 }
 0x121   : > { %p2414_p9 = pneg %p2413_p7 }
 0x123   : > { %p2421_p12 = pnand %p2420_p11, %p2414_p9 }
 0x125   : > { %2424 = shalt.err (!%p2421_p12)
}
 0x126   : > { %s3241_s16 = sld [smem:[#allocation33_spill]]  ;;  %s3242_s0 = sld [smem:[#allocation34_spill]] }
 0x127   : > { %1956 = dma.hbm_to_vmem [thread:$0]  (!%p2686_p6), %s3215_s12, 16, %s487_s20, [#allocation22]  }
 0x128   : > { %s1667_s1 = sadd.s32 4294967294, %s2545_s28   ;;  %s2946_s18 = sadd.s32 1, %s2545_s28  }
 0x129   : > { %s39_s25 = ssub.s32 %s2545_s28, %s2946_s18  ;;  %s42_s19 = sadd.s32 1, %s2541_s27 }
 0x12a   : > { %p40_p8 = scmp.eq.s32.totalorder %s39_s25, 0  ;;  %p49_p1 = scmp.ne.s32.totalorder %s2541_s27, %s2537_s26 }
 0x12b   : > { %p50_p3 = scmp.eq.s32.totalorder %s2545_s28, 0  ;;  %p337_p7 = scmp.eq.s32.totalorder %s1667_s1, 1 }
 0x12c   : > { %p55_p13 = scmp.ne.s32.totalorder %s2537_s26, %s3241_s16  ;;  %p3244_p2 = scmp.eq.s32.totalorder %s3242_s0, 0 }
 0x12d   : > { %s2957_s23 = scalar_select %p40_p8, %s2541_s27, %s42_s19  }
 0x12e   : > { %p2959_p0 = por %p50_p3, %p49_p1  ;;  %p2965_p6 = por %p3244_p2, %p55_p13 }
 0x12f   : > { %p331_p5 = scmp.eq.s32.totalorder %s3242_s0, 1  ;;  %p1977_p9 = scmp.lt.s32.totalorder %s2545_s28, 2 }
 0x130   : > { %s497_s22 = sand.u32 1, %s2541_s27   ;;  %p2976_p10 = por %p337_p7, %p55_p13 }
 0x131   : > { %p2972_p4 = por %p331_p5, %p49_p1  ;;  %s1682_s21 = sshll.u32 %s497_s22, 3 }
 0x132   : > { %s3247_s29 = scalar_select %p2976_p10, 1, 0 }
 0x133   : > { %s3246_s14 = scalar_select %p2972_p4, 1, 0 }
 0x134   : > { %s1683_s24 = sshll.u32 %s2545_s28, 7  ;;  %s3248_s15 = sld [smem:[#allocation36_spill]] }
 0x135   : > { %s501_s0 = scalar_lea.vmem [#allocation3], %s1682_s21  ;;  %p2990_p11 = pnand %p1977_p9, %p2959_p0 }
 0x136   : > { %s508_s1 = sshll.u32 %s501_s0, 4  ;;  %s498_s19 = scalar_lea.sflag [#allocation4], %s497_s22  ;;  %s2986_s1 = int_to_ptr.vmem [resolvable:$true] %s508_s1 }
 0x137   : > { %p2427_p8 = pneg %p2990_p11 }
 0x13a   : > { %s2984_s16 = scalar_lea.hbm %s3248_s15, %s1683_s24  ;;  %s2430_s17 = scalar_lea.hbm %s3248_s15, 256 }
 0x13b   : > { %s2425_s2 = scalar_lea.hbm %s2984_s16, 128  ;;  %p2431_p13 = scmp.lt.u32.totalorder %s2984_s16, %s3248_s15 }
 0x13c   : > { %p2426_p12 = scmp.ne.s32.totalorder %s2984_s16, %s2425_s2  ;;  %p2432_p0 = scmp.lt.u32.totalorder %s2430_s17, %s2425_s2 }
 0x13d   : > { %p2434_p5 = scmp.lt.u32.totalorder %s2425_s2, %s2984_s16 }
 0x13e   : > { %p2428_p1 = pnand %p2427_p8, %p2426_p12  ;;  %p2433_p2 = por %p2432_p0, %p2431_p13 }
 0x140   : > { %p2429_p3 = pneg %p2428_p1  ;;  %p2435_p7 = por %p2434_p5, %p2433_p2 }
 0x142   : > { %p2436_p9 = pnand %p2435_p7, %p2429_p3 }
 0x144   : > { %2439 = shalt.err (!%p2436_p9)
}
 0x145   : > { %s2440_s22 = scalar_lea.vmem %s2986_s1, 128  ;;  %s2561_s0 = smov [#allocation3]  }
 0x146   : > { %p2441_p12 = scmp.ne.s32.totalorder %s2986_s1, %s2440_s22  ;;  %s2445_s21 = sshll.u32 %s2561_s0, 4  ;;  %s2446_s21 = int_to_ptr.vmem [resolvable:$false] %s2445_s21 }
 0x147   : > { %s2447_s24 = scalar_lea.vmem %s2446_s21, 256  ;;  %p2448_p4 = scmp.lt.s32.totalorder %s2986_s1, %s2446_s21 }
 0x148   : > { %p2443_p1 = pnand %p2441_p12, %p2427_p8  ;;  %p2449_p13 = scmp.lt.s32.totalorder %s2447_s24, %s2440_s22 }
 0x14a   : > { %p2444_p10 = pneg %p2443_p1  ;;  %p2450_p0 = por %p2449_p13, %p2448_p4 }
 0x14c   : > { %p2451_p2 = pnand %p2450_p0, %p2444_p10 }
 0x14e   : > { %2454 = shalt.err (!%p2451_p2)
}
 0x14f   : > { %1960 = dma.hbm_to_vmem [thread:$0]  (!%p2990_p11), %s2984_s16, 128, %s2986_s1, %s498_s19  }
 0x150   : > { %s3250_s2 = sld [smem:[#allocation35_spill]] }
 0x156   : > { %p3251_p3 = scmp.ne.s32.totalorder %s3250_s2, 0 }
 0x157   : > { %s3022_s17 = sand.u32 (!%p3251_p3), 1, %s2537_s26  }
 0x158   : > { %517 = sbr.rel (%p3251_p3) target bundleno = 2956 (0xb8c), region = 72  ;;  %s1685_s13 = sshll.u32 (!%p3251_p3), %s3022_s17, 3 }
 0x159   : > { %s520_s30 = scalar_lea.sflag (!%p3251_p3), [#allocation4], %s3022_s17  ;;  %s523_s22 = scalar_lea.vmem (!%p3251_p3), [#allocation3], %s1685_s13 }
 0x15f   : > { %2500 = dma.done.wait (%p2965_p6), %s520_s30, 128  }
 0x160   : > { %2502 = vsyncadd (%p2965_p6), %s520_s30, 4294967168  ;;  %s3252_s16 = sld [smem:[#allocation34_spill]] }
 0x166   : > { %p3253_p4 = scmp.eq.s32.totalorder %s3252_s16, 0 }
 0x168   : > { %2504 = dma.done.wait (%p3253_p4), [#allocation7], 272   ;;  %p3254_p10 = pmov %p3253_p4 }
 0x169   : > { %p3255_p11 = pmov %p3253_p4 }
 0x16a   : > { %2506 = vsyncadd (%p3254_p10), [#allocation7], 4294967024 }
 0x16b   : > { %2508 = dma.done.wait (%p3255_p11), [#allocation10], 272   ;;  %p3256_p8 = pmov %p3253_p4 }
 0x16c   : > { %p3257_p5 = pmov %p3253_p4 }
 0x16d   : > { %2510 = vsyncadd (%p3256_p8), [#allocation10], 4294967024 }
 0x16e   : > { %2512 = dma.done.wait (%p3257_p5), [#allocation13], 32   ;;  %p3258_p7 = pmov %p3253_p4 }
 0x16f   : > { %p3259_p6 = pmov %p3253_p4 }
 0x170   : > { %2514 = vsyncadd (%p3258_p7), [#allocation13], 4294967264 }
 0x171   : > { %2516 = dma.done.wait (%p3259_p6), [#allocation16], 272   ;;  %p3260_p9 = pmov %p3253_p4 }
 0x172   : > { %p3261_p12 = pmov %p3253_p4 }
 0x173   : > { %2518 = vsyncadd (%p3260_p9), [#allocation16], 4294967024 }
 0x174   : > { %2520 = dma.done.wait (%p3261_p12), [#allocation19], 1040   ;;  %p3262_p1 = pmov %p3253_p4 }
 0x176   : > { %2522 = vsyncadd (%p3262_p1), [#allocation19], 4294966256  ;;  %p3263_p13 = pmov %p3262_p1 }
 0x177   : > { %p3264_p0 = pmov %p3262_p1 }
 0x178   : > { %2524 = dma.done.wait (%p3263_p13), [#allocation22], 32  }
 0x179   : > { %2526 = vsyncadd (%p3264_p0), [#allocation22], 4294967264  ;;  %v2562_v0 = vmov 0.0   ;;  %vm2563_vm0 = vmmov 0   ;;  %v2053_v1 = vld [vmem:[#allocation6] sm:$0xff]   ;;  %v2054_v2 = vld [vmem:[#allocation6 + $0x8] sm:$0xff]  }
 0x17a   : > { %1776 = vmatprep.subr.bf16.mxu0 %v2562_v0  ;;  %1780 = vmatprep.mubr.msk.bf16.mxu0 %vm2563_vm0, %v2562_v0  ;;  %v3062_v3 = vld [vmem:[%s523_s22] sm:$0xff]  ;;  %vm640_vm1 = vcmask 261120   ;;  %s2564_s20 = smov 120   ;;  %s2565_s1 = smov 96   ;;  %vm688_vm2 = vcmask 64512   ;;  %vm752_vm3 = vcmask 1043456  }
 0x17b   : > { %1796 = vmatprep.subr.bf16.mxu1 %v2562_v0  ;;  %1798 = vmatprep.mubr.msk.bf16.mxu1 %vm2563_vm0, %v2562_v0  ;;  %v616_v4 = vpack.c.bf16 %v3062_v3, %v3062_v3  ;;  %v1699_v5 = vld [vmem:[#allocation8] ss:$0 sm:$0xff]  ;;  %s2566_s25 = smov 80   ;;  %s2567_s19 = smov 88   ;;  %vm797_vm4 = vcmask 60416   ;;  %vm916_vm5 = vcmask 126016  }
 0x17c   : > { %1777 = vmatpush3.bf16.msra.mxu0 %v2053_v1  ;;  %s2568_s0 = smov 72   ;;  %s2569_s21 = smov 112   ;;  %vm1035_vm6 = vcmask 191616   ;;  %vm1154_vm7 = vcmask 257216  }
 0x17d   : > { %1778 = vmatprep.subr.bf16.mxu0 %v2562_v0  ;;  %s2570_s24 = smov 104   ;;  %s2571_s2 = smov 56  }
 0x17e   : > { %s2572_s30 = smov 64   ;;  %s2573_s22 = smov 40  }
 0x17f   : > { %p3266_p3 = scmp.ne.s32.totalorder %s3246_s14, 0 }
 0x180   : > { %1779 = vmatpush3.bf16.msra.mxu0 %v2054_v2 }
 0x181   : > { %1784 = vmatprep.subr.bf16.mxu0 %v2562_v0 }
 0x183   : > { %1781 = vmatmul.mubr.msk.bf16.vlgmr.msra.gmra.mrb[0].mxu0 %vm640_vm1, %v616_v4 }
 0x184   : > { %1786 = vmatprep.mubr.msk.bf16.mxu0 %vm2563_vm0, %v2562_v0 }
 0x256   : > { %v678_v6 = vpop.f32.mrb[0].mxu0 }
 0x257   : > { %v679_v7 = vadd.f32 %v1699_v5, %v678_v6  ;;  %v1782_v8 = vpop.f32.mrb[1].mxu0 }
 0x258   : > { %v681_v9 = vpop.f32.mrb[2].mxu0 }
 0x259   : > { %v3071_v10 = vpack.c.bf16 %v679_v7, %v679_v7  ;;  %v1783_v11 = vpop.f32.mrb[3].mxu0 }
 0x25b   : > { %799 = vrot.lane.b32.xlu1 %v3071_v10, %s2564_s20  ;;  %686 = vrot.lane.b32.xlu0 %v3071_v10, %s2565_s1  ;;  %s2574_s20 = smov 48   ;;  %s2575_s1 = smov 8  }
 0x25f   : > { %920 = vrot.lane.b32.xlu1 %v3071_v10, %s2566_s25  ;;  %801 = vrot.lane.b32.xlu0 %v3071_v10, %s2567_s19  ;;  %s2576_s25 = smov 16   ;;  %s2577_s19 = smov 24  }
 0x263   : > { %1039 = vrot.lane.b32.xlu1 %v3071_v10, %s2568_s0  ;;  %918 = vrot.lane.b32.xlu0 %v3071_v10, %s2569_s21  ;;  %s1736_s0 = sshll.u32 %s3252_s16, 7  ;;  %s613_s21 = scalar_lea.vmem [#allocation24], %s1685_s13 }
 0x264   : > { %s2578_s13 = smov [#allocation24]  }
 0x265   : > { %s2459_s16 = sshll.u32 %s2578_s13, 4  ;;  %s2460_s16 = int_to_ptr.vmem [resolvable:$false] %s2459_s16 }
 0x267   : > { %1037 = vrot.lane.b32.xlu0 %v3071_v10, %s2570_s24  ;;  %s1483_s24 = sshll.u32 %s613_s21, 4  ;;  %s3160_s24 = int_to_ptr.vmem [resolvable:$true] %s1483_s24 }
 0x268   : > { %p2462_p11 = scmp.lt.s32.totalorder %s3160_s24, %s2460_s16 }
 0x2cd   : > { %v687_v12 = vpop.permute.xlu0 %686  ;;  %v800_v14 = vpop.permute.xlu1 %799 }
 0x2ce   : > { %v693_v13 = vsel %vm688_vm2, %v687_v12, 0 }
 0x2cf   : > { %1785 = vmatpush3.bf16.xpose.msra.mxu0 %v693_v13 }
 0x2d0   : > { %1790 = vmatprep.subr.bf16.mxu0 %v2562_v0 }
 0x2d1   : > { %v802_v15 = vpop.permute.xlu0 %801  ;;  %v921_v17 = vpop.permute.xlu1 %920 }
 0x2d2   : > { %v807_v16 = vsel %vm688_vm2, %v802_v15, 0  ;;  %v926_v18 = vsel %vm688_vm2, %v921_v17, 0 }
 0x2d3   : > { %1797 = vmatpush3.bf16.xpose.msra.mxu1 %v807_v16 }
 0x2d4   : > { %1808 = vmatprep.subr.bf16.mxu1 %v2562_v0 }
 0x2d5   : > { %v1040_v19 = vpop.permute.xlu1 %1039  ;;  %v919_v20 = vpop.permute.xlu0 %918 }
 0x2d6   : > { %1787 = vmatmul.mubr.msk.bf16.vlgmr.msra.gmra.mrb[4].mxu0 %vm688_vm2, %v3071_v10  ;;  %v1045_v21 = vsel %vm688_vm2, %v1040_v19, 0 }
 0x2d7   : > { %1792 = vmatprep.mubr.msk.bf16.mxu0 %vm2563_vm0, %v2562_v0 }
 0x2d9   : > { %v1038_v22 = vpop.permute.xlu0 %1037 }
 0x2da   : > { %1799 = vmatmul.mubr.msk.bf16.vlgmr.msra.gmra.mrb[0].mxu1 %vm688_vm2, %v800_v14 }
 0x2db   : > { %1809 = vmatpush3.bf16.xpose.msra.mxu1 %v926_v18  ;;  %1810 = vmatprep.mubr.msk.bf16.mxu1 %vm2563_vm0, %v2562_v0 }
 0x2dc   : > { %1820 = vmatprep.subr.bf16.mxu1 %v2562_v0 }
 0x2e2   : > { %1811 = vmatmul.mubr.msk.bf16.vlgmr.msra.gmra.mrb[4].mxu1 %vm688_vm2, %v919_v20 }
 0x2e3   : > { %1821 = vmatpush3.bf16.xpose.msra.mxu1 %v1045_v21  ;;  %1822 = vmatprep.mubr.msk.bf16.mxu1 %vm2563_vm0, %v2562_v0 }
 0x2e4   : > { %1832 = vmatprep.subr.bf16.mxu1 %v2562_v0 }
 0x2ea   : > { %1823 = vmatmul.mubr.msk.bf16.vlgmr.msra.gmra.mrb[8].mxu1 %vm688_vm2, %v1038_v22 }
 0x2eb   : > { %1836 = vmatprep.mubr.msk.bf16.mxu1 %vm2563_vm0, %v2562_v0 }
 0x3a9   : > { %v729_v23 = vpop.f32.mrb[4].mxu0 }
 0x3aa   : > { %v1788_v24 = vpop.f32.mrb[5].mxu0  ;;  %v735_v25 = vsel %vm688_vm2, %v729_v23, -inf }
 0x3ab   : > { %736 = vmax.xlane.f32.xlu1 %v735_v25  ;;  %v732_v26 = vpop.f32.mrb[6].mxu0 }
 0x3ac   : > { %v1789_v27 = vpop.f32.mrb[7].mxu0 }
 0x3ad   : > { %v843_v28 = vpop.f32.mrb[0].mxu1 }
 0x3ae   : > { %v1800_v29 = vpop.f32.mrb[1].mxu1  ;;  %v849_v30 = vsel %vm688_vm2, %v843_v28, -inf }
 0x3af   : > { %850 = vmax.xlane.f32.xlu0 %v849_v30  ;;  %v846_v31 = vpop.f32.mrb[2].mxu1 }
 0x3b0   : > { %v1801_v32 = vpop.f32.mrb[3].mxu1 }
 0x3b5   : > { %v962_v33 = vpop.f32.mrb[4].mxu1 }
 0x3b6   : > { %v1812_v34 = vpop.f32.mrb[5].mxu1  ;;  %v968_v35 = vsel %vm688_vm2, %v962_v33, -inf }
 0x3b7   : > { %969 = vmax.xlane.f32.xlu0 %v968_v35  ;;  %v965_v36 = vpop.f32.mrb[6].mxu1  ;;  %v2055_v35 = vld [vmem:[#allocation9] sm:$0xff]  }
 0x3b8   : > { %v1813_v37 = vpop.f32.mrb[7].mxu1  ;;  %1833 = vmatpush3.bf16.msra.mxu1 %v2055_v35  ;;  %v2056_v36 = vld [vmem:[#allocation9 + $0x8] sm:$0xff]  }
 0x3b9   : > { %1834 = vmatprep.subr.bf16.mxu1 %v2562_v0 }
 0x3bc   : > { %1835 = vmatpush3.bf16.msra.mxu1 %v2056_v36 }
 0x3bd   : > { %v1081_v38 = vpop.f32.mrb[8].mxu1  ;;  %1848 = vmatprep.subr.bf16.mxu1 %v2562_v0 }
 0x3be   : > { %v1824_v39 = vpop.f32.mrb[9].mxu1  ;;  %v1087_v40 = vsel %vm688_vm2, %v1081_v38, -inf }
 0x3bf   : > { %v1084_v41 = vpop.f32.mrb[10].mxu1  ;;  %1088 = vmax.xlane.f32.xlu1 %v1087_v40 }
 0x3c0   : > { %v1825_v42 = vpop.f32.mrb[11].mxu1 }
 0x438   : > { %v737_v43 = vpop.xlane.xlu1 %736 }
 0x439   : > { %v738_v44 = vsub.f32 %v729_v23, %v737_v43 }
 0x43b   : > { %v739_v45 = vmul.f32 1.442695, %v738_v44 }
 0x43c   : > { %v851_v46 = vpop.xlane.xlu0 %850 }
 0x43d   : > { %2067 = vpow2.f32 %v739_v45  ;;  %v852_v47 = vsub.f32 %v843_v28, %v851_v46 }
 0x43f   : > { %v853_v48 = vmul.f32 1.442695, %v852_v47 }
 0x441   : > { %2069 = vpow2.f32 %v853_v48 }
 0x444   : > { %v970_v49 = vpop.xlane.xlu0 %969 }
 0x445   : > { %v971_v50 = vsub.f32 %v962_v33, %v970_v49 }
 0x447   : > { %v2068_v51 = vpop.eup %2067  ;;  %v972_v52 = vmul.f32 1.442695, %v971_v50 }
 0x448   : > { %v741_v53 = vsel %vm688_vm2, %v2068_v51, 0.0 }
 0x449   : > { %2071 = vpow2.f32 %v972_v52  ;;  %742 = vadd.xlane.f32.xlu0 %v741_v53 }
 0x44b   : > { %v2070_v54 = vpop.eup %2069 }
 0x44c   : > { %v855_v55 = vsel %vm688_vm2, %v2070_v54, 0.0  ;;  %v1089_v58 = vpop.xlane.xlu1 %1088 }
 0x44d   : > { %856 = vadd.xlane.f32.xlu1 %v855_v55  ;;  %v1090_v59 = vsub.f32 %v1081_v38, %v1089_v58 }
 0x44f   : > { %v1091_v60 = vmul.f32 1.442695, %v1090_v59 }
 0x451   : > { %2073 = vpow2.f32 %v1091_v60 }
 0x453   : > { %v2072_v56 = vpop.eup %2071 }
 0x454   : > { %v974_v57 = vsel %vm688_vm2, %v2072_v56, 0.0 }
 0x455   : > { %975 = vadd.xlane.f32.xlu0 %v974_v57 }
 0x45b   : > { %v2074_v61 = vpop.eup %2073 }
 0x45c   : > { %v1093_v62 = vsel %vm688_vm2, %v2074_v61, 0.0 }
 0x45e   : > { %861 = vrot.lane.b32.xlu1 %v3071_v10, %s2571_s2 }
 0x46b   : > { %747 = vrot.lane.b32.xlu0 %v3071_v10, %s2572_s30 }
 0x46f   : > { %1099 = vrot.lane.b32.xlu0 %v3071_v10, %s2573_s22  ;;  %s3265_s22 = sld [smem:[#allocation39_spill]] }
 0x482   : > { %1094 = vadd.xlane.f32.xlu1 %v1093_v62 }
 0x493   : > { %980 = vrot.lane.b32.xlu1 %v3071_v10, %s2574_s20  ;;  %s3158_s20 = scalar_lea.hbm %s3265_s22, %s1736_s0 }
 0x4d6   : > { %v743_v63 = vpop.xlane.xlu0 %742 }
 0x4d7   : > { %2075 = vrcp.f32 %v743_v63 }
 0x4da   : > { %v857_v1 = vpop.xlane.xlu1 %856 }
 0x4db   : > { %2077 = vrcp.f32 %v857_v1  ;;  %v2057_v1 = vld [vmem:[#allocation15] sm:$0xff]  }
 0x4de   : > { %v862_v8 = vpop.permute.xlu1 %861 }
 0x4df   : > { %v867_v12 = vsel %vm752_vm3, %v862_v8, 0 }
 0x4e1   : > { %v2076_v2 = vpop.eup %2075 }
 0x4e2   : > { %v976_v4 = vpop.xlane.xlu0 %975  ;;  %v745_v5 = vmul.f32 %v2076_v2, %v2068_v51  ;;  %v1714_v51 = vld [vmem:[#allocation11] ss:$0 sm:$0xff]  ;;  %v2058_v2 = vld [vmem:[#allocation15 + $0x8] sm:$0xff]  }
 0x4e3   : > { %2079 = vrcp.f32 %v976_v4  ;;  %v2059_v4 = vld [vmem:[#allocation18] sm:$0xff]  }
 0x4e4   : > { %v746_v9 = vpack.c.bf16 %v745_v5, %v745_v5  ;;  %v2060_v5 = vld [vmem:[#allocation18 + $0x8] sm:$0xff]  }
 0x4e5   : > { %v2078_v11 = vpop.eup %2077 }
 0x4e6   : > { %v748_v6 = vpop.permute.xlu0 %747  ;;  %v859_v10 = vmul.f32 %v2078_v11, %v2070_v54  ;;  %v1718_v11 = vld [vmem:[#allocation12] ss:$0 sm:$0xff] }
 0x4e7   : > { %v754_v7 = vsel %vm752_vm3, %v748_v6, 0 }
 0x4e8   : > { %1791 = vmatpush3.bf16.msra.mxu0 %v754_v7  ;;  %v860_v13 = vpack.c.bf16 %v859_v10, %v859_v10  ;;  %v1719_v10 = vld [vmem:[#allocation14] ss:$0 sm:$0xff] }
 0x4e9   : > { %1802 = vmatprep.subr.bf16.mxu0 %v2562_v0 }
 0x4ea   : > { %v1100_v19 = vpop.permute.xlu0 %1099 }
 0x4eb   : > { %1793 = vmatmul.mubr.msk.bf16.vlgmr.msra.gmra.mrb[8].mxu0 %vm688_vm2, %v746_v9  ;;  %v1105_v21 = vsel %vm752_vm3, %v1100_v19, 0  ;;  %v2065_v19 = vld [vmem:[#allocation18 + $0x30] sm:$0xff]  }
 0x4ec   : > { %1803 = vmatpush3.bf16.msra.mxu0 %v867_v12  ;;  %1804 = vmatprep.mubr.msk.bf16.mxu0 %vm2563_vm0, %v2562_v0 }
 0x4ed   : > { %1814 = vmatprep.subr.bf16.mxu0 %v2562_v0  ;;  %v2080_v14 = vpop.eup %2079 }
 0x4ee   : > { %v978_v16 = vmul.f32 %v2080_v14, %v2072_v56 }
 0x4f0   : > { %v979_v20 = vpack.c.bf16 %v978_v16, %v978_v16  ;;  %v2062_v16 = vld [vmem:[#allocation18 + $0x18] sm:$0xff]  }
 0x4f3   : > { %1805 = vmatmul.mubr.msk.bf16.vlgmr.msra.gmra.mrb[12].mxu0 %vm688_vm2, %v860_v13 }
 0x4f4   : > { %1816 = vmatprep.mubr.msk.bf16.mxu0 %vm2563_vm0, %v2562_v0 }
 0x50f   : > { %v1095_v15 = vpop.xlane.xlu1 %1094 }
 0x510   : > { %2081 = vrcp.f32 %v1095_v15 }
 0x513   : > { %v981_v17 = vpop.permute.xlu1 %980 }
 0x514   : > { %v986_v18 = vsel %vm752_vm3, %v981_v17, 0  ;;  %v2063_v17 = vld [vmem:[#allocation18 + $0x20] sm:$0xff]  }
 0x515   : > { %1815 = vmatpush3.bf16.msra.mxu0 %v986_v18  ;;  %v2064_v18 = vld [vmem:[#allocation18 + $0x28] sm:$0xff]  }
 0x516   : > { %1826 = vmatprep.subr.bf16.mxu0 %v2562_v0 }
 0x518   : > { %1817 = vmatmul.mubr.msk.bf16.vlgmr.msra.gmra.mrb[16].mxu0 %vm688_vm2, %v979_v20  ;;  %v2066_v20 = vld [vmem:[#allocation18 + $0x38] sm:$0xff]  }
 0x519   : > { %1827 = vmatpush3.bf16.msra.mxu0 %v1105_v21  ;;  %1828 = vmatprep.mubr.msk.bf16.mxu0 %vm2563_vm0, %v2562_v0  ;;  %v1720_v21 = vld [vmem:[#allocation17] ss:$0 sm:$0xff] }
 0x51a   : > { %v2082_v22 = vpop.eup %2081  ;;  %1840 = vmatprep.subr.bf16.mxu0 %v2562_v0 }
 0x51b   : > { %v1097_v23 = vmul.f32 %v2082_v22, %v2074_v61 }
 0x51d   : > { %v1098_v24 = vpack.c.bf16 %v1097_v23, %v1097_v23 }
 0x520   : > { %1829 = vmatmul.mubr.msk.bf16.vlgmr.msra.gmra.mrb[20].mxu0 %vm688_vm2, %v1098_v24 }
 0x521   : > { %1844 = vmatprep.mubr.msk.bf16.mxu0 %vm2563_vm0, %v2562_v0  ;;  %1841 = vmatpush3.bf16.msra.mxu0 %v2057_v1 }
 0x522   : > { %1842 = vmatprep.subr.bf16.mxu0 %v2562_v0 }
 0x525   : > { %1843 = vmatpush3.bf16.msra.mxu0 %v2058_v2 }
 0x5be   : > { %v790_v25 = vpop.f32.mrb[8].mxu0 }
 0x5bf   : > { %v796_v26 = vpack.c.bf16 %v790_v25, %v790_v25  ;;  %v1794_v27 = vpop.f32.mrb[9].mxu0 }
 0x5c0   : > { %v793_v28 = vpop.f32.mrb[10].mxu0 }
 0x5c1   : > { %798 = vst.msk [vmem:[#allocation2] sm:$0xf] %vm797_vm4, %v796_v26  ;;  %v1795_v29 = vpop.f32.mrb[11].mxu0 }
 0x5c6   : > { %v903_v30 = vpop.f32.mrb[12].mxu0 }
 0x5c7   : > { %v1739_v31 = vpack.c.bf16 %v903_v30, %v903_v30  ;;  %v1806_v32 = vpop.f32.mrb[13].mxu0 }
 0x5c8   : > { %v906_v33 = vpop.f32.mrb[14].mxu0 }
 0x5c9   : > { %913 = vrot.lane.b32.xlu1 %v1739_v31, %s2575_s1  ;;  %v1807_v34 = vpop.f32.mrb[15].mxu0  ;;  %v1724_v33 = vld [vmem:[#allocation20] ss:$0 sm:$0xff]  ;;  %s1470_s1 = scalar_lea.sflag [#allocation5], %s3022_s17 }
 0x5eb   : > { %v1022_v37 = vpop.f32.mrb[16].mxu0 }
 0x5ec   : > { %v1740_v38 = vpack.c.bf16 %v1022_v37, %v1022_v37  ;;  %v1818_v39 = vpop.f32.mrb[17].mxu0 }
 0x5ed   : > { %v1025_v40 = vpop.f32.mrb[18].mxu0 }
 0x5ee   : > { %1032 = vrot.lane.b32.xlu0 %v1740_v38, %s2576_s25  ;;  %v1819_v41 = vpop.f32.mrb[19].mxu0  ;;  %s2455_s25 = scalar_lea.vmem %s3160_s24, 128 }
 0x5ef   : > { %p2456_p2 = scmp.ne.s32.totalorder %s3160_s24, %s2455_s25 }
 0x5f1   : > { %p2457_p4 = pnand %p2456_p2, %p3266_p3 }
 0x5f3   : > { %v1141_v42 = vpop.f32.mrb[20].mxu0  ;;  %p2458_p10 = pneg %p2457_p4 }
 0x5f4   : > { %v1741_v43 = vpack.c.bf16 %v1141_v42, %v1141_v42  ;;  %v1830_v44 = vpop.f32.mrb[21].mxu0 }
 0x5f5   : > { %v1144_v45 = vpop.f32.mrb[22].mxu0 }
 0x5f6   : > { %1151 = vrot.lane.b32.xlu1 %v1741_v43, %s2577_s19  ;;  %v1831_v46 = vpop.f32.mrb[23].mxu0  ;;  %s2461_s19 = scalar_lea.vmem %s2460_s16, 256 }
 0x5f7   : > { %p2463_p8 = scmp.lt.s32.totalorder %s2461_s19, %s2455_s25 }
 0x5f9   : > { %p2464_p5 = por %p2463_p8, %p2462_p11 }
 0x5fb   : > { %p2465_p7 = pnand %p2464_p5, %p2458_p10 }
 0x63b   : > { %v914_v47 = vpop.permute.xlu1 %913 }
 0x63c   : > { %917 = vst.msk [vmem:[#allocation2] sm:$0xf] %vm916_vm5, %v914_v47 }
 0x660   : > { %v1033_v48 = vpop.permute.xlu0 %1032 }
 0x661   : > { %1036 = vst.msk [vmem:[#allocation2] sm:$0xf] %vm1035_vm6, %v1033_v48 }
 0x668   : > { %v1152_v49 = vpop.permute.xlu1 %1151 }
 0x669   : > { %1155 = vst.msk [vmem:[#allocation2] sm:$0xf] %vm1154_vm7, %v1152_v49  ;;  %v1733_v49 = vld [vmem:[#allocation21] ss:$0 sm:$0xff] }
 0x670   : > { %v1156_v50 = vld [vmem:[#allocation2] sm:$0xf] }
 0x671   : > { %1837 = vmatmul.mubr.msk.bf16.vlgmr.msra.gmra.mrb[12].mxu1 %vm640_vm1, %v1156_v50 }
 0x672   : > { %1864 = vmatprep.mubr.msk.bf16.mxu1 %vm2563_vm0, %v2562_v0  ;;  %1849 = vmatpush3.bf16.msra.mxu1 %v2059_v4 }
 0x673   : > { %1850 = vmatprep.subr.bf16.mxu1 %v2562_v0 }
 0x676   : > { %1851 = vmatpush3.bf16.msra.mxu1 %v2060_v5 }
 0x677   : > { %1852 = vmatprep.subr.bf16.mxu1 %v2562_v0 }
 0x744   : > { %v1217_v52 = vpop.f32.mrb[12].mxu1 }
 0x745   : > { %v1218_v53 = vadd.f32 %v1714_v51, %v1217_v52  ;;  %v1838_v54 = vpop.f32.mrb[13].mxu1  ;;  %v1734_v51 = vld [vmem:[#allocation23] ss:$0 sm:$0xff] }
 0x746   : > { %v1220_v55 = vpop.f32.mrb[14].mxu1 }
 0x747   : > { %v1839_v56 = vpop.f32.mrb[15].mxu1  ;;  %v1223_v57 = vadd.f32 %v1218_v53, %v3062_v3  ;;  %v2061_v3 = vld [vmem:[#allocation18 + $0x10] sm:$0xff]  }
 0x748   : > { %1853 = vmatpush3.bf16.msra.mxu1 %v2061_v3 }
 0x749   : > { %v1226_v58 = vsel %vm640_vm1, %v1223_v57, 0.0  ;;  %1854 = vmatprep.subr.bf16.mxu1 %v2562_v0 }
 0x74a   : > { %1227 = vadd.xlane.f32.xlu0 %v1226_v58 }
 0x74c   : > { %1855 = vmatpush3.bf16.msra.mxu1 %v2062_v16 }
 0x74d   : > { %1856 = vmatprep.subr.bf16.mxu1 %v2562_v0 }
 0x750   : > { %1857 = vmatpush3.bf16.msra.mxu1 %v2063_v17 }
 0x751   : > { %1858 = vmatprep.subr.bf16.mxu1 %v2562_v0 }
 0x754   : > { %1859 = vmatpush3.bf16.msra.mxu1 %v2064_v18 }
 0x755   : > { %1860 = vmatprep.subr.bf16.mxu1 %v2562_v0 }
 0x758   : > { %1861 = vmatpush3.bf16.msra.mxu1 %v2065_v19 }
 0x759   : > { %1862 = vmatprep.subr.bf16.mxu1 %v2562_v0 }
 0x75c   : > { %1863 = vmatpush3.bf16.msra.mxu1 %v2066_v20 }
 0x7d7   : > { %v1228_v59 = vpop.xlane.xlu0 %1227 }
 0x7d8   : > { %v1230_v60 = vmul.f32 0.03125, %v1228_v59 }
 0x7da   : > { %v1231_v61 = vsub.f32 %v1223_v57, %v1230_v60 }
 0x7dc   : > { %v1232_v62 = vmul.f32 %v1231_v61, %v1231_v61 }
 0x7de   : > { %v1233_v63 = vsel %vm640_vm1, %v1232_v62, 0.0 }
 0x7df   : > { %1234 = vadd.xlane.f32.xlu1 %v1233_v63 }
 0x86c   : > { %v1235_v6 = vpop.xlane.xlu1 %1234 }
 0x86d   : > { %v1236_v7 = vmul.f32 0.03125, %v1235_v6 }
 0x86f   : > { %v1237_v8 = vadd.f32 1e-05, %v1236_v7 }
 0x871   : > { %2083 = vrsqrt.f32 %v1237_v8 }
 0x87b   : > { %v2084_v9 = vpop.eup %2083 }
 0x87c   : > { %v1239_v12 = vmul.f32 %v2084_v9, %v1231_v61 }
 0x87e   : > { %v1246_v13 = vmul.f32 %v1718_v11, %v1239_v12 }
 0x880   : > { %v1253_v14 = vadd.f32 %v1719_v10, %v1246_v13 }
 0x882   : > { %v1254_v15 = vpack.c.bf16 %v1253_v14, %v1253_v14 }
 0x884   : > { %1845 = vmatmul.mubr.msk.bf16.vlgmr.msra.gmra.mrb[24].mxu0 %vm640_vm1, %v1254_v15 }
 0x957   : > { %v1315_v22 = vpop.f32.mrb[24].mxu0 }
 0x958   : > { %v1316_v23 = vadd.f32 %v1720_v21, %v1315_v22  ;;  %v1846_v24 = vpop.f32.mrb[25].mxu0 }
 0x959   : > { %v1318_v25 = vpop.f32.mrb[26].mxu0 }
 0x95a   : > { %v1322_v26 = vmul.f32 0.70710677, %v1316_v23  ;;  %v1847_v27 = vpop.f32.mrb[27].mxu0  ;;  %v1321_v29 = vmul.f32 0.5, %v1316_v23 }
 0x95c   : > { %2085 = verf.f32 %v1322_v26 }
 0x966   : > { %v2086_v28 = vpop.eup %2085 }
 0x967   : > { %v1324_v30 = vadd.f32 1.0, %v2086_v28 }
 0x969   : > { %v1325_v31 = vmul.f32 %v1324_v30, %v1321_v29 }
 0x96b   : > { %v1326_v32 = vpack.c.bf16 %v1325_v31, %v1325_v31 }
 0x96d   : > { %1865 = vmatmul.mubr.bf16.vlgmr.msra.gmra.mrb[16].mxu1 %v1326_v32 }
 0xa40   : > { %v1432_v34 = vpop.f32.mrb[16].mxu1 }
 0xa41   : > { %v1433_v35 = vadd.f32 %v1724_v33, %v1432_v34  ;;  %v1866_v0 = vpop.f32.mrb[17].mxu1 }
 0xa42   : > { %v1435_v36 = vpop.f32.mrb[18].mxu1 }
 0xa43   : > { %v1867_v37 = vpop.f32.mrb[19].mxu1  ;;  %v1438_v38 = vadd.f32 %v1433_v35, %v1253_v14 }
 0xa45   : > { %v1441_v39 = vsel %vm640_vm1, %v1438_v38, 0.0 }
 0xa46   : > { %1442 = vadd.xlane.f32.xlu0 %v1441_v39 }
 0xad3   : > { %v1443_v40 = vpop.xlane.xlu0 %1442 }
 0xad4   : > { %v1444_v41 = vmul.f32 0.03125, %v1443_v40 }
 0xad6   : > { %v1445_v42 = vsub.f32 %v1438_v38, %v1444_v41 }
 0xad8   : > { %v1446_v43 = vmul.f32 %v1445_v42, %v1445_v42 }
 0xada   : > { %v1447_v44 = vsel %vm640_vm1, %v1446_v43, 0.0 }
 0xadb   : > { %1448 = vadd.xlane.f32.xlu0 %v1447_v44 }
 0xb68   : > { %v1449_v45 = vpop.xlane.xlu0 %1448 }
 0xb69   : > { %v1450_v46 = vmul.f32 0.03125, %v1449_v45 }
 0xb6b   : > { %v1451_v47 = vadd.f32 1e-05, %v1450_v46 }
 0xb6d   : > { %2087 = vrsqrt.f32 %v1451_v47 }
 0xb77   : > { %v2088_v48 = vpop.eup %2087 }
 0xb78   : > { %v1453_v50 = vmul.f32 %v2088_v48, %v1445_v42 }
 0xb7a   : > { %v1460_v52 = vmul.f32 %v1733_v49, %v1453_v50 }
 0xb7c   : > { %v1467_v53 = vadd.f32 %v1734_v51, %v1460_v52 }
 0xb7e   : > { %1468 = vst.msk [vmem:[%s613_s21] sm:$0xff] %vm640_vm1, %v1467_v53 }
 0xb7f   : > { %2468 = shalt.err (!%p2465_p7)
}
 0xb80   : > { %s2469_s17 = scalar_lea.hbm %s3158_s20, 128  ;;  %s2473_s2 = scalar_lea.hbm %s3265_s22, 256 }
 0xb81   : > { %p2470_p6 = scmp.ne.s32.totalorder %s3158_s20, %s2469_s17  ;;  %p2474_p1 = scmp.lt.u32.totalorder %s3158_s20, %s3265_s22 }
 0xb82   : > { %p2475_p13 = scmp.lt.u32.totalorder %s2473_s2, %s2469_s17  ;;  %p2477_p2 = scmp.lt.u32.totalorder %s2469_s17, %s3158_s20 }
 0xb83   : > { %p2471_p9 = pnand %p2470_p6, %p3266_p3 }
 0xb84   : > { %p2476_p0 = por %p2475_p13, %p2474_p1 }
 0xb85   : > { %p2472_p12 = pneg %p2471_p9 }
 0xb86   : > { %p2478_p4 = por %p2477_p2, %p2476_p0 }
 0xb88   : > { %p2479_p10 = pnand %p2478_p4, %p2472_p12 }
 0xb8a   : > { %2482 = shalt.err (!%p2479_p10)
}
 0xb8b   : > { %1918 = dma.vmem_to_hbm [thread:$0]  (%p3266_p3), %s3160_s24, 128, %s3158_s20, %s1470_s1  }
 0xb8c PF: > { %s3267_s25 = sld [smem:[#allocation33_spill]]  ;;  %p3268_p11 = scmp.ne.s32.totalorder %s3247_s29, 0 }
 0xb8d   : > { %p3269_p8 = scmp.ge.s32.totalorder %s2545_s28, 2 }
 0xb8f   : > { %p1962_p5 = pnand %p3269_p8, %p3268_p11 }
 0xb92   : > { %s1495_s16 = sand.u32 1, %s3267_s25  }
 0xb93   : > { %s1496_s19 = scalar_lea.sflag [#allocation5], %s1495_s16 }
 0xb94   : > { %2528 = dma.done.wait (!%p1962_p5), %s1496_s19, 128  }
 0xb95   : > { %2530 = vsyncadd (!%p1962_p5), %s1496_s19, 4294967168  ;;  %p32_p7 = scmp.ge.s32.totalorder %s2946_s18, 4   ;;  %s3270_s25 = smov %s2537_s26 }
 0xb96   : > { %s3271_s26 = smov %s2541_s27  ;;  %s3272_s27 = smov %s2957_s23 }
 0xb97   : > { %s3273_s28 = smov %s2946_s18  ;;  %34 = sbr.rel (!%p32_p7) target bundleno = 16 (0x10), region = 165 }
 0xb9e   :  { %1501 = vsyncpa [#allocation4], 1 }
 0xb9f   :  { %1503 = vsyncpa [#allocation4 + $0x1], 1 }
 0xba0   :  { %1504 = vsyncpa [#allocation7], 1 }
 0xba1   :  { %1505 = vsyncpa [#allocation10], 1 }
 0xba2   :  { %1506 = vsyncpa [#allocation13], 1 }
 0xba3   :  { %1507 = vsyncpa [#allocation16], 1 }
 0xba4   :  { %1508 = vsyncpa [#allocation19], 1 }
 0xba5   :  { %1509 = vsyncpa [#allocation22], 1 }
 0xba6   :  { %1510 = vsyncpa [#allocation5], 1 }
 0xba7   :  { %1512 = vsyncpa [#allocation5 + $0x1], 1 }

// kernel: tpu_custom_call.1
= control target key start
LH: loop header
LB: loop body
LE: loop exit
PB: predicated region body
PF: predicated region fallthrough
CT: control target
= control target key end

     0   :  { %s3203_s0 = inlined_call_operand.hbm [shape: f32[2,8,32], index: 0, kind: input, shape index: {}]   ;;  %s3204_s1 = inlined_call_operand.hbm [shape: bf16[32,96], index: 1, kind: input, shape index: {}]   ;;  %s3205_s2 = inlined_call_operand.hbm [shape: f32[1,96], index: 2, kind: input, shape index: {}]   ;;  %s3206_s3 = inlined_call_operand.hbm [shape: bf16[32,32], index: 3, kind: input, shape index: {}]   ;;  %s3207_s4 = inlined_call_operand.hbm [shape: f32[1,32], index: 4, kind: input, shape index: {}]   ;;  %s3208_s5 = inlined_call_operand.hbm [shape: f32[1,32], index: 5, kind: input, shape index: {}]   ;;  %s3209_s6 = inlined_call_operand.hbm [shape: f32[1,32], index: 6, kind: input, shape index: {}]   ;;  %s3210_s7 = inlined_call_operand.hbm [shape: bf16[32,128], index: 7, kind: input, shape index: {}]   ;;  %s3211_s8 = inlined_call_operand.hbm [shape: f32[1,128], index: 8, kind: input, shape index: {}]   ;;  %s3212_s9 = inlined_call_operand.hbm [shape: bf16[128,32], index: 9, kind: input, shape index: {}]   ;;  %s3213_s10 = inlined_call_operand.hbm [shape: f32[1,32], index: 10, kind: input, shape index: {}]   ;;  %s3214_s11 = inlined_call_operand.hbm [shape: f32[1,32], index: 11, kind: input, shape index: {}]   ;;  %s3215_s12 = inlined_call_operand.hbm [shape: f32[1,32], index: 12, kind: input, shape index: {}]   ;;  %s3216_s13 = inlined_call_operand.hbm [shape: f32[2,8,32], index: 13, kind: output, shape index: {}]  }
   0x1   :  { %3228 = sst [smem:[#allocation36_spill]] %s3203_s0 }
   0x2   :  { %3229 = sst [smem:[#allocation37_spill]] %s3204_s1 }
   0x3   :  { %3230 = sst [smem:[#allocation38_spill]] %s3205_s2 }
   0x4   :  { %3231 = sst [smem:[#allocation39_spill]] %s3216_s13 }
   0x5   :  { %18 = vsyncpa [#allocation4], 0 }
   0x6   :  { %20 = vsyncpa [#allocation4 + $0x1], 0 }
   0x7   :  { %21 = vsyncpa [#allocation7], 0 }
   0x8   :  { %22 = vsyncpa [#allocation10], 0 }
   0x9   :  { %23 = vsyncpa [#allocation13], 0 }
   0xa   :  { %24 = vsyncpa [#allocation16], 0 }
   0xb   :  { %25 = vsyncpa [#allocation19], 0 }
   0xc   :  { %26 = vsyncpa [#allocation22], 0 }
   0xd   :  { %27 = vsyncpa [#allocation5], 0 }
   0xe   :  { %29 = vsyncpa [#allocation5 + $0x1], 0  ;;  %s2649_s25 = smov 0   ;;  %s2651_s26 = smov 0  }
   0xf   :  { %s2653_s27 = smov 0   ;;  %s2655_s28 = smov 0  }
  0x10 LB: > { %3232 = sst [smem:[#allocation33_spill]] %s2533_s25  ;;  %s2547_s29 = smov [#allocation6]   ;;  %s2545_s28 = sphi %s2655_s28, %s3273_s28   ;;  %s2541_s27 = sphi %s2653_s27, %s3272_s27   ;;  %s2537_s26 = sphi %s2651_s26, %s3271_s26   ;;  %s2533_s25 = sphi %s2649_s25, %s3270_s25  }
  0x11   : > { %s356_s30 = sshll.u32 %s2547_s29, 4  ;;  %s2670_s14 = sadd.s32 4294967295, %s2545_s28   ;;  %s2675_s30 = int_to_ptr.vmem [resolvable:$true] %s356_s30 }
  0x12   : > { %3233 = sst [smem:[#allocation34_spill]] %s2670_s14  ;;  %p1668_p0 = scmp.ge.s32.totalorder %s2545_s28, 1 }
  0x13   : > { %p3225_p1 = scmp.eq.s32.totalorder %s2670_s14, 0  ;;  %p344_p2 = scmp.lt.s32.totalorder %s2545_s28, 3 }
  0x14   : > { %s2548_s16 = smov [#allocation9]   ;;  %s2549_s19 = smov [#allocation12]  }
  0x15   : > { %p2677_p3 = pnand %p1668_p0, %p344_p2  ;;  %s380_s17 = sshll.u32 %s2548_s16, 4  ;;  %s2690_s17 = int_to_ptr.vmem [resolvable:$true] %s380_s17 }
  0x16   : > { %s405_s20 = sshll.u32 %s2549_s19, 4  ;;  %s3237_s1 = sld [smem:[#allocation37_spill]]  ;;  %s2692_s20 = int_to_ptr.vmem [resolvable:$true] %s405_s20 }
  0x17   : > { %s3234_s15 = scalar_select %p2677_p3, 1, 0 }
  0x18   : > { %p1920_p5 = pneg %p2677_p3 }
  0x19   : > { %3235 = sst [smem:[#allocation35_spill]] %s3234_s15 }
  0x1a   : > { %p2686_p6 = pnand %p1920_p5, %p3225_p1 }
  0x1c   : > { %s2089_s23 = scalar_lea.hbm %s3237_s1, 256  ;;  %p2702_p8 = pneg %p2686_p6 }
  0x1d   : > { %p2090_p7 = scmp.ne.s32.totalorder %s3237_s1, %s2089_s23  ;;  %p2096_p11 = scmp.lt.u32.totalorder %s2089_s23, %s3237_s1 }
  0x1f   : > { %p2092_p9 = pnand %p2702_p8, %p2090_p7 }
  0x21   : > { %p2093_p10 = pneg %p2092_p9 }
  0x23   : > { %p2098_p12 = pnand %p2096_p11, %p2093_p10 }
  0x25   : > { %2101 = shalt.err (!%p2098_p12)
}
  0x26   : > { %s2102_s21 = scalar_lea.vmem %s2675_s30, 256  ;;  %p2110_p5 = scmp.lt.s32.totalorder %s2675_s30, %s2675_s30 }
  0x27   : > { %p2103_p13 = scmp.ne.s32.totalorder %s2675_s30, %s2102_s21  ;;  %p2111_p4 = scmp.lt.s32.totalorder %s2102_s21, %s2102_s21 }
  0x29   : > { %p2105_p0 = pnand %p2103_p13, %p2702_p8  ;;  %p2112_p7 = por %p2111_p4, %p2110_p5 }
  0x2b   : > { %p2106_p2 = pneg %p2105_p0 }
  0x2d   : > { %p2113_p9 = pnand %p2112_p7, %p2106_p2 }
  0x2f   : > { %2116 = shalt.err (!%p2113_p9)
}
  0x30   : > { %s3223_s22 = smov 64   ;;  %s2551_s13 = smov 4  }
  0x31   : > { %1923 = dma.hbm_to_vmem [thread:$0]  (!%p2686_p6), %s3237_s1, 256, %s2675_s30, [#allocation7], %s3223_s22, %s3223_s22, %s2551_s13  }
  0x32   : > { %s2117_s21 = scalar_lea.hbm %s3206_s3, 256 }
  0x33   : > { %p2118_p4 = scmp.ne.s32.totalorder %s3206_s3, %s2117_s21  ;;  %p2124_p12 = scmp.lt.u32.totalorder %s2117_s21, %s3206_s3 }
  0x35   : > { %p2120_p10 = pnand %p2118_p4, %p2702_p8 }
  0x37   : > { %p2121_p11 = pneg %p2120_p10 }
  0x39   : > { %p2126_p13 = pnand %p2124_p12, %p2121_p11 }
  0x3b   : > { %2129 = shalt.err (!%p2126_p13)
}
  0x3c   : > { %s2130_s30 = scalar_lea.vmem %s2690_s17, 256  ;;  %p2138_p7 = scmp.lt.s32.totalorder %s2690_s17, %s2690_s17 }
  0x3d   : > { %p2131_p0 = scmp.ne.s32.totalorder %s2690_s17, %s2130_s30  ;;  %p2139_p9 = scmp.lt.s32.totalorder %s2130_s30, %s2130_s30 }
  0x3f   : > { %p2133_p2 = pnand %p2131_p0, %p2702_p8  ;;  %p2140_p4 = por %p2139_p9, %p2138_p7 }
  0x41   : > { %p2134_p5 = pneg %p2133_p2 }
  0x43   : > { %p2141_p10 = pnand %p2140_p4, %p2134_p5 }
  0x45   : > { %2144 = shalt.err (!%p2141_p10)
}
  0x46   : > { %1929 = dma.hbm_to_vmem [thread:$0]  (!%p2686_p6), %s3206_s3, 256, %s2690_s17, [#allocation10], %s3223_s22, %s3223_s22, %s2551_s13  }
  0x47   : > { %s2145_s23 = scalar_lea.hbm %s3208_s5, 16 }
  0x48   : > { %p2146_p11 = scmp.ne.s32.totalorder %s3208_s5, %s2145_s23  ;;  %p2152_p0 = scmp.lt.u32.totalorder %s2145_s23, %s3208_s5 }
  0x4a   : > { %p2148_p12 = pnand %p2146_p11, %p2702_p8 }
  0x4c   : > { %p2149_p13 = pneg %p2148_p12 }
  0x4e   : > { %p2154_p2 = pnand %p2152_p0, %p2149_p13 }
  0x50   : > { %2157 = shalt.err (!%p2154_p2)
}
  0x51   : > { %s2158_s17 = scalar_lea.vmem %s2692_s20, 16  ;;  %s2165_s30 = scalar_lea.vmem %s2692_s20, 32 }
  0x52   : > { %p2159_p5 = scmp.ne.s32.totalorder %s2692_s20, %s2158_s17  ;;  %p2166_p4 = scmp.lt.s32.totalorder %s2692_s20, %s2692_s20 }
  0x53   : > { %p2167_p10 = scmp.lt.s32.totalorder %s2165_s30, %s2158_s17 }
  0x54   : > { %p2161_p7 = pnand %p2159_p5, %p2702_p8 }
  0x55   : > { %p2168_p11 = por %p2167_p10, %p2166_p4 }
  0x56   : > { %p2162_p9 = pneg %p2161_p7 }
  0x58   : > { %p2169_p12 = pnand %p2168_p11, %p2162_p9 }
  0x5a   : > { %2172 = shalt.err (!%p2169_p12)
}
  0x5b   : > { %1935 = dma.hbm_to_vmem [thread:$0]  (!%p2686_p6), %s3208_s5, 16, %s2692_s20, [#allocation13]  }
  0x5c   : > { %s2552_s14 = smov [#allocation15]   ;;  %s2553_s23 = smov [#allocation18]  }
  0x5d   : > { %s426_s15 = sshll.u32 %s2552_s14, 4  ;;  %s450_s24 = sshll.u32 %s2553_s23, 4  ;;  %s427_s15 = int_to_ptr.vmem [resolvable:$true] %s426_s15  ;;  %s451_s24 = int_to_ptr.vmem [resolvable:$true] %s450_s24 }
  0x5e   : > { %s2173_s21 = scalar_lea.hbm %s3210_s7, 256 }
  0x5f   : > { %p2174_p13 = scmp.ne.s32.totalorder %s3210_s7, %s2173_s21  ;;  %p2180_p5 = scmp.lt.u32.totalorder %s2173_s21, %s3210_s7 }
  0x61   : > { %p2176_p0 = pnand %p2174_p13, %p2702_p8 }
  0x63   : > { %p2177_p2 = pneg %p2176_p0 }
  0x65   : > { %p2182_p7 = pnand %p2180_p5, %p2177_p2 }
  0x67   : > { %2185 = shalt.err (!%p2182_p7)
}
  0x68   : > { %s2186_s20 = scalar_lea.vmem %s427_s15, 256  ;;  %p2194_p11 = scmp.lt.s32.totalorder %s427_s15, %s427_s15 }
  0x69   : > { %p2187_p9 = scmp.ne.s32.totalorder %s427_s15, %s2186_s20  ;;  %p2195_p12 = scmp.lt.s32.totalorder %s2186_s20, %s2186_s20 }
  0x6b   : > { %p2189_p4 = pnand %p2187_p9, %p2702_p8  ;;  %p2196_p1 = por %p2195_p12, %p2194_p11 }
  0x6d   : > { %p2190_p10 = pneg %p2189_p4 }
  0x6f   : > { %p2197_p3 = pnand %p2196_p1, %p2190_p10 }
  0x71   : > { %2200 = shalt.err (!%p2197_p3)
}
  0x72   : > { %s3239_s25 = smov 64   ;;  %s2201_s19 = scalar_lea.hbm %s3212_s9, 1024 }
  0x73   : > { %1941 = dma.hbm_to_vmem [thread:$0]  (!%p2686_p6), %s3210_s7, 256, %s427_s15, [#allocation16], %s3239_s25, %s3239_s25, %s2551_s13  }
  0x74   : > { %p2202_p1 = scmp.ne.s32.totalorder %s3212_s9, %s2201_s19  ;;  %p2208_p0 = scmp.lt.u32.totalorder %s2201_s19, %s3212_s9 }
  0x76   : > { %p2204_p3 = pnand %p2202_p1, %p2702_p8 }
  0x78   : > { %p2205_p13 = pneg %p2204_p3 }
  0x7a   : > { %p2210_p2 = pnand %p2208_p0, %p2205_p13 }
  0x7c   : > { %2213 = shalt.err (!%p2210_p2)
}
  0x7d   : > { %s2214_s20 = scalar_lea.vmem %s451_s24, 1024  ;;  %p2222_p4 = scmp.lt.s32.totalorder %s451_s24, %s451_s24 }
  0x7e   : > { %p2215_p5 = scmp.ne.s32.totalorder %s451_s24, %s2214_s20  ;;  %p2223_p10 = scmp.lt.s32.totalorder %s2214_s20, %s2214_s20 }
  0x80   : > { %p2217_p7 = pnand %p2215_p5, %p2702_p8  ;;  %p2224_p11 = por %p2223_p10, %p2222_p4 }
  0x82   : > { %p2218_p9 = pneg %p2217_p7 }
  0x84   : > { %p2225_p12 = pnand %p2224_p11, %p2218_p9 }
  0x86   : > { %2228 = shalt.err (!%p2225_p12)
}
  0x87   : > { %1947 = dma.hbm_to_vmem [thread:$0]  (!%p2686_p6), %s3212_s9, 1024, %s451_s24, [#allocation19], %s3239_s25, %s3239_s25, %s2551_s13  }
  0x88   : > { %s2554_s14 = smov [#allocation21]   ;;  %s2555_s29 = smov [#allocation8]  }
  0x89   : > { %s475_s23 = sshll.u32 %s2554_s14, 4  ;;  %s370_s19 = sshll.u32 %s2555_s29, 4  ;;  %s476_s23 = int_to_ptr.vmem [resolvable:$true] %s475_s23  ;;  %s371_s19 = int_to_ptr.vmem [resolvable:$true] %s370_s19 }
  0x8a   : > { %s2229_s30 = scalar_lea.hbm %s3214_s11, 16 }
  0x8b   : > { %p2230_p1 = scmp.ne.s32.totalorder %s3214_s11, %s2229_s30  ;;  %p2236_p0 = scmp.lt.u32.totalorder %s2229_s30, %s3214_s11 }
  0x8d   : > { %p2232_p3 = pnand %p2230_p1, %p2702_p8 }
  0x8f   : > { %p2233_p13 = pneg %p2232_p3 }
  0x91   : > { %p2238_p2 = pnand %p2236_p0, %p2233_p13 }
  0x93   : > { %2241 = shalt.err (!%p2238_p2)
}
  0x94   : > { %s2242_s13 = scalar_lea.vmem %s476_s23, 16  ;;  %s2249_s24 = scalar_lea.vmem %s476_s23, 32 }
  0x95   : > { %p2243_p5 = scmp.ne.s32.totalorder %s476_s23, %s2242_s13  ;;  %p2250_p4 = scmp.lt.s32.totalorder %s476_s23, %s476_s23 }
  0x96   : > { %p2251_p10 = scmp.lt.s32.totalorder %s2249_s24, %s2242_s13 }
  0x97   : > { %p2245_p7 = pnand %p2243_p5, %p2702_p8 }
  0x98   : > { %p2252_p11 = por %p2251_p10, %p2250_p4 }
  0x99   : > { %p2246_p9 = pneg %p2245_p7 }
  0x9b   : > { %p2253_p12 = pnand %p2252_p11, %p2246_p9 }
  0x9d   : > { %2256 = shalt.err (!%p2253_p12)
}
  0x9e   : > { %1953 = dma.hbm_to_vmem [thread:$0]  (!%p2686_p6), %s3214_s11, 16, %s476_s23, [#allocation22]  }
  0x9f   : > { %s3240_s2 = sld [smem:[#allocation38_spill]] }
  0xa5   : > { %s2257_s29 = scalar_lea.hbm %s3240_s2, 16 }
  0xa6   : > { %p2258_p1 = scmp.ne.s32.totalorder %s3240_s2, %s2257_s29  ;;  %p2264_p0 = scmp.lt.u32.totalorder %s2257_s29, %s3240_s2 }
  0xa8   : > { %p2260_p3 = pnand %p2258_p1, %p2702_p8 }
  0xaa   : > { %p2261_p13 = pneg %p2260_p3 }
  0xac   : > { %p2266_p2 = pnand %p2264_p0, %p2261_p13 }
  0xae   : > { %2269 = shalt.err (!%p2266_p2)
}
  0xaf   : > { %s2270_s20 = scalar_lea.vmem %s371_s19, 16  ;;  %s2277_s23 = scalar_lea.vmem %s371_s19, 32 }
  0xb0   : > { %p2271_p5 = scmp.ne.s32.totalorder %s371_s19, %s2270_s20  ;;  %p2278_p4 = scmp.lt.s32.totalorder %s371_s19, %s371_s19 }
  0xb1   : > { %p2279_p10 = scmp.lt.s32.totalorder %s2277_s23, %s2270_s20 }
  0xb2   : > { %p2273_p7 = pnand %p2271_p5, %p2702_p8 }
  0xb3   : > { %p2280_p11 = por %p2279_p10, %p2278_p4 }
  0xb4   : > { %p2274_p9 = pneg %p2273_p7 }
  0xb6   : > { %p2281_p12 = pnand %p2280_p11, %p2274_p9 }
  0xb8   : > { %2284 = shalt.err (!%p2281_p12)
}
  0xb9   : > { %1926 = dma.hbm_to_vmem [thread:$0]  (!%p2686_p6), %s3240_s2, 16, %s371_s19, [#allocation7]  }
  0xba   : > { %s2556_s24 = smov [#allocation11]   ;;  %s2557_s22 = smov [#allocation14]  }
  0xbb   : > { %s394_s25 = sshll.u32 %s2556_s24, 4  ;;  %s416_s1 = sshll.u32 %s2557_s22, 4  ;;  %s395_s25 = int_to_ptr.vmem [resolvable:$true] %s394_s25  ;;  %s417_s1 = int_to_ptr.vmem [resolvable:$true] %s416_s1 }
  0xbc   : > { %s2285_s21 = scalar_lea.hbm %s3207_s4, 16 }
  0xbd   : > { %p2286_p1 = scmp.ne.s32.totalorder %s3207_s4, %s2285_s21  ;;  %p2292_p0 = scmp.lt.u32.totalorder %s2285_s21, %s3207_s4 }
  0xbf   : > { %p2288_p3 = pnand %p2286_p1, %p2702_p8 }
  0xc1   : > { %p2289_p13 = pneg %p2288_p3 }
  0xc3   : > { %p2294_p2 = pnand %p2292_p0, %p2289_p13 }
  0xc5   : > { %2297 = shalt.err (!%p2294_p2)
}
  0xc6   : > { %s2298_s19 = scalar_lea.vmem %s395_s25, 16  ;;  %s2305_s23 = scalar_lea.vmem %s395_s25, 32 }
  0xc7   : > { %p2299_p5 = scmp.ne.s32.totalorder %s395_s25, %s2298_s19  ;;  %p2306_p4 = scmp.lt.s32.totalorder %s395_s25, %s395_s25 }
  0xc8   : > { %p2307_p10 = scmp.lt.s32.totalorder %s2305_s23, %s2298_s19 }
  0xc9   : > { %p2301_p7 = pnand %p2299_p5, %p2702_p8 }
  0xca   : > { %p2308_p11 = por %p2307_p10, %p2306_p4 }
  0xcb   : > { %p2302_p9 = pneg %p2301_p7 }
  0xcd   : > { %p2309_p12 = pnand %p2308_p11, %p2302_p9 }
  0xcf   : > { %2312 = shalt.err (!%p2309_p12)
}
  0xd0   : > { %1932 = dma.hbm_to_vmem [thread:$0]  (!%p2686_p6), %s3207_s4, 16, %s395_s25, [#allocation10]  }
  0xd1   : > { %s2313_s14 = scalar_lea.hbm %s3209_s6, 16 }
  0xd2   : > { %p2314_p1 = scmp.ne.s32.totalorder %s3209_s6, %s2313_s14  ;;  %p2320_p0 = scmp.lt.u32.totalorder %s2313_s14, %s3209_s6 }
  0xd4   : > { %p2316_p3 = pnand %p2314_p1, %p2702_p8 }
  0xd6   : > { %p2317_p13 = pneg %p2316_p3 }
  0xd8   : > { %p2322_p2 = pnand %p2320_p0, %p2317_p13 }
  0xda   : > { %2325 = shalt.err (!%p2322_p2)
}
  0xdb   : > { %s2326_s0 = scalar_lea.vmem %s417_s1, 16  ;;  %s2333_s25 = scalar_lea.vmem %s417_s1, 32 }
  0xdc   : > { %p2327_p5 = scmp.ne.s32.totalorder %s417_s1, %s2326_s0  ;;  %p2334_p4 = scmp.lt.s32.totalorder %s417_s1, %s417_s1 }
  0xdd   : > { %p2335_p10 = scmp.lt.s32.totalorder %s2333_s25, %s2326_s0 }
  0xde   : > { %p2329_p7 = pnand %p2327_p5, %p2702_p8 }
  0xdf   : > { %p2336_p11 = por %p2335_p10, %p2334_p4 }
  0xe0   : > { %p2330_p9 = pneg %p2329_p7 }
  0xe2   : > { %p2337_p12 = pnand %p2336_p11, %p2330_p9 }
  0xe4   : > { %2340 = shalt.err (!%p2337_p12)
}
  0xe5   : > { %1938 = dma.hbm_to_vmem [thread:$0]  (!%p2686_p6), %s3209_s6, 16, %s417_s1, [#allocation13]  }
  0xe6   : > { %s2558_s23 = smov [#allocation17]   ;;  %s2559_s13 = smov [#allocation20]  }
  0xe7   : > { %s440_s15 = sshll.u32 %s2558_s23, 4  ;;  %s464_s24 = sshll.u32 %s2559_s13, 4  ;;  %s441_s15 = int_to_ptr.vmem [resolvable:$true] %s440_s15  ;;  %s465_s24 = int_to_ptr.vmem [resolvable:$true] %s464_s24 }
  0xe8   : > { %s2341_s29 = scalar_lea.hbm %s3211_s8, 16 }
  0xe9   : > { %p2342_p1 = scmp.ne.s32.totalorder %s3211_s8, %s2341_s29  ;;  %p2348_p0 = scmp.lt.u32.totalorder %s2341_s29, %s3211_s8 }
  0xeb   : > { %p2344_p3 = pnand %p2342_p1, %p2702_p8 }
  0xed   : > { %p2345_p13 = pneg %p2344_p3 }
  0xef   : > { %p2350_p2 = pnand %p2348_p0, %p2345_p13 }
  0xf1   : > { %2353 = shalt.err (!%p2350_p2)
}
  0xf2   : > { %s2354_s1 = scalar_lea.vmem %s441_s15, 16  ;;  %s2361_s25 = scalar_lea.vmem %s441_s15, 32 }
  0xf3   : > { %p2355_p5 = scmp.ne.s32.totalorder %s441_s15, %s2354_s1  ;;  %p2362_p4 = scmp.lt.s32.totalorder %s441_s15, %s441_s15 }
  0xf4   : > { %p2363_p10 = scmp.lt.s32.totalorder %s2361_s25, %s2354_s1 }
  0xf5   : > { %p2357_p7 = pnand %p2355_p5, %p2702_p8 }
  0xf6   : > { %p2364_p11 = por %p2363_p10, %p2362_p4 }
  0xf7   : > { %p2358_p9 = pneg %p2357_p7 }
  0xf9   : > { %p2365_p12 = pnand %p2364_p11, %p2358_p9 }
  0xfb   : > { %2368 = shalt.err (!%p2365_p12)
}
  0xfc   : > { %1944 = dma.hbm_to_vmem [thread:$0]  (!%p2686_p6), %s3211_s8, 16, %s441_s15, [#allocation16]  }
  0xfd   : > { %s2369_s22 = scalar_lea.hbm %s3213_s10, 16 }
  0xfe   : > { %p2370_p1 = scmp.ne.s32.totalorder %s3213_s10, %s2369_s22  ;;  %p2376_p0 = scmp.lt.u32.totalorder %s2369_s22, %s3213_s10 }
 0x100   : > { %p2372_p3 = pnand %p2370_p1, %p2702_p8 }
 0x102   : > { %p2373_p13 = pneg %p2372_p3 }
 0x104   : > { %p2378_p2 = pnand %p2376_p0, %p2373_p13 }
 0x106   : > { %2381 = shalt.err (!%p2378_p2)
}
 0x107   : > { %s2382_s30 = scalar_lea.vmem %s465_s24, 16  ;;  %s2389_s15 = scalar_lea.vmem %s465_s24, 32 }
 0x108   : > { %p2383_p5 = scmp.ne.s32.totalorder %s465_s24, %s2382_s30  ;;  %p2390_p4 = scmp.lt.s32.totalorder %s465_s24, %s465_s24 }
 0x109   : > { %p2391_p10 = scmp.lt.s32.totalorder %s2389_s15, %s2382_s30 }
 0x10a   : > { %p2385_p7 = pnand %p2383_p5, %p2702_p8 }
 0x10b   : > { %p2392_p11 = por %p2391_p10, %p2390_p4 }
 0x10c   : > { %p2386_p9 = pneg %p2385_p7 }
 0x10e   : > { %p2393_p12 = pnand %p2392_p11, %p2386_p9 }
 0x110   : > { %2396 = shalt.err (!%p2393_p12)
}
 0x111   : > { %1950 = dma.hbm_to_vmem [thread:$0]  (!%p2686_p6), %s3213_s10, 16, %s465_s24, [#allocation19]  }
 0x112   : > { %s2560_s25 = smov [#allocation23]   ;;  %s2397_s13 = scalar_lea.hbm %s3215_s12, 16 }
 0x113   : > { %s486_s20 = sshll.u32 %s2560_s25, 4  ;;  %p2398_p1 = scmp.ne.s32.totalorder %s3215_s12, %s2397_s13  ;;  %s487_s20 = int_to_ptr.vmem [resolvable:$true] %s486_s20 }
 0x114   : > { %p2404_p0 = scmp.lt.u32.totalorder %s2397_s13, %s3215_s12 }
 0x115   : > { %p2400_p3 = pnand %p2398_p1, %p2702_p8 }
 0x117   : > { %p2401_p13 = pneg %p2400_p3 }
 0x119   : > { %p2406_p2 = pnand %p2404_p0, %p2401_p13 }
 0x11b   : > { %2409 = shalt.err (!%p2406_p2)
}
 0x11c   : > { %s2410_s24 = scalar_lea.vmem %s487_s20, 16  ;;  %s2417_s17 = scalar_lea.vmem %s487_s20, 32 }
 0x11d   : > { %p2411_p5 = scmp.ne.s32.totalorder %s487_s20, %s2410_s24  ;;  %p2418_p4 = scmp.lt.s32.totalorder %s487_s20, %s487_s20 }
 0x11e   : > { %p2419_p10 = scmp.lt.s32.totalorder %s2417_s17, %s2410_s24 }
 0x11f   : > { %p2413_p7 = pnand %p2411_p5, %p2702_p8 }
 0x120   : > { %p2420_p11 = por %p2419_p10, %p2418_p4 }
 0x121   : > { %p2414_p9 = pneg %p2413_p7 }
 0x123   : > { %p2421_p12 = pnand %p2420_p11, %p2414_p9 }
 0x125   : > { %2424 = shalt.err (!%p2421_p12)
}
 0x126   : > { %s3241_s16 = sld [smem:[#allocation33_spill]]  ;;  %s3242_s0 = sld [smem:[#allocation34_spill]] }
 0x127   : > { %1956 = dma.hbm_to_vmem [thread:$0]  (!%p2686_p6), %s3215_s12, 16, %s487_s20, [#allocation22]  }
 0x128   : > { %s1667_s1 = sadd.s32 4294967294, %s2545_s28   ;;  %s2946_s18 = sadd.s32 1, %s2545_s28  }
 0x129   : > { %s39_s25 = ssub.s32 %s2545_s28, %s2946_s18  ;;  %s42_s19 = sadd.s32 1, %s2541_s27 }
 0x12a   : > { %p40_p8 = scmp.eq.s32.totalorder %s39_s25, 0  ;;  %p49_p1 = scmp.ne.s32.totalorder %s2541_s27, %s2537_s26 }
 0x12b   : > { %p50_p3 = scmp.eq.s32.totalorder %s2545_s28, 0  ;;  %p337_p7 = scmp.eq.s32.totalorder %s1667_s1, 1 }
 0x12c   : > { %p55_p13 = scmp.ne.s32.totalorder %s2537_s26, %s3241_s16  ;;  %p3244_p2 = scmp.eq.s32.totalorder %s3242_s0, 0 }
 0x12d   : > { %s2957_s23 = scalar_select %p40_p8, %s2541_s27, %s42_s19  }
 0x12e   : > { %p2959_p0 = por %p50_p3, %p49_p1  ;;  %p2965_p6 = por %p3244_p2, %p55_p13 }
 0x12f   : > { %p331_p5 = scmp.eq.s32.totalorder %s3242_s0, 1  ;;  %p1977_p9 = scmp.lt.s32.totalorder %s2545_s28, 2 }
 0x130   : > { %s497_s22 = sand.u32 1, %s2541_s27   ;;  %p2976_p10 = por %p337_p7, %p55_p13 }
 0x131   : > { %p2972_p4 = por %p331_p5, %p49_p1  ;;  %s1682_s21 = sshll.u32 %s497_s22, 3 }
 0x132   : > { %s3247_s29 = scalar_select %p2976_p10, 1, 0 }
 0x133   : > { %s3246_s14 = scalar_select %p2972_p4, 1, 0 }
 0x134   : > { %s1683_s24 = sshll.u32 %s2545_s28, 7  ;;  %s3248_s15 = sld [smem:[#allocation36_spill]] }
 0x135   : > { %s501_s0 = scalar_lea.vmem [#allocation3], %s1682_s21  ;;  %p2990_p11 = pnand %p1977_p9, %p2959_p0 }
 0x136   : > { %s508_s1 = sshll.u32 %s501_s0, 4  ;;  %s498_s19 = scalar_lea.sflag [#allocation4], %s497_s22  ;;  %s2986_s1 = int_to_ptr.vmem [resolvable:$true] %s508_s1 }
 0x137   : > { %p2427_p8 = pneg %p2990_p11 }
 0x13a   : > { %s2984_s16 = scalar_lea.hbm %s3248_s15, %s1683_s24  ;;  %s2430_s17 = scalar_lea.hbm %s3248_s15, 256 }
 0x13b   : > { %s2425_s2 = scalar_lea.hbm %s2984_s16, 128  ;;  %p2431_p13 = scmp.lt.u32.totalorder %s2984_s16, %s3248_s15 }
 0x13c   : > { %p2426_p12 = scmp.ne.s32.totalorder %s2984_s16, %s2425_s2  ;;  %p2432_p0 = scmp.lt.u32.totalorder %s2430_s17, %s2425_s2 }
 0x13d   : > { %p2434_p5 = scmp.lt.u32.totalorder %s2425_s2, %s2984_s16 }
 0x13e   : > { %p2428_p1 = pnand %p2427_p8, %p2426_p12  ;;  %p2433_p2 = por %p2432_p0, %p2431_p13 }
 0x140   : > { %p2429_p3 = pneg %p2428_p1  ;;  %p2435_p7 = por %p2434_p5, %p2433_p2 }
 0x142   : > { %p2436_p9 = pnand %p2435_p7, %p2429_p3 }
 0x144   : > { %2439 = shalt.err (!%p2436_p9)
}
 0x145   : > { %s2440_s22 = scalar_lea.vmem %s2986_s1, 128  ;;  %s2561_s0 = smov [#allocation3]  }
 0x146   : > { %p2441_p12 = scmp.ne.s32.totalorder %s2986_s1, %s2440_s22  ;;  %s2445_s21 = sshll.u32 %s2561_s0, 4  ;;  %s2446_s21 = int_to_ptr.vmem [resolvable:$false] %s2445_s21 }
 0x147   : > { %s2447_s24 = scalar_lea.vmem %s2446_s21, 256  ;;  %p2448_p4 = scmp.lt.s32.totalorder %s2986_s1, %s2446_s21 }
 0x148   : > { %p2443_p1 = pnand %p2441_p12, %p2427_p8  ;;  %p2449_p13 = scmp.lt.s32.totalorder %s2447_s24, %s2440_s22 }
 0x14a   : > { %p2444_p10 = pneg %p2443_p1  ;;  %p2450_p0 = por %p2449_p13, %p2448_p4 }
 0x14c   : > { %p2451_p2 = pnand %p2450_p0, %p2444_p10 }
 0x14e   : > { %2454 = shalt.err (!%p2451_p2)
}
 0x14f   : > { %1960 = dma.hbm_to_vmem [thread:$0]  (!%p2990_p11), %s2984_s16, 128, %s2986_s1, %s498_s19  }
 0x150   : > { %s3250_s2 = sld [smem:[#allocation35_spill]] }
 0x156   : > { %p3251_p3 = scmp.ne.s32.totalorder %s3250_s2, 0 }
 0x157   : > { %s3022_s17 = sand.u32 (!%p3251_p3), 1, %s2537_s26  }
 0x158   : > { %517 = sbr.rel (%p3251_p3) target bundleno = 2956 (0xb8c), region = 72  ;;  %s1685_s13 = sshll.u32 (!%p3251_p3), %s3022_s17, 3 }
 0x159   : > { %s520_s30 = scalar_lea.sflag (!%p3251_p3), [#allocation4], %s3022_s17  ;;  %s523_s22 = scalar_lea.vmem (!%p3251_p3), [#allocation3], %s1685_s13 }
 0x15f   : > { %2500 = dma.done.wait (%p2965_p6), %s520_s30, 128  }
 0x160   : > { %2502 = vsyncadd (%p2965_p6), %s520_s30, 4294967168  ;;  %s3252_s16 = sld [smem:[#allocation34_spill]] }
 0x166   : > { %p3253_p4 = scmp.eq.s32.totalorder %s3252_s16, 0 }
 0x168   : > { %2504 = dma.done.wait (%p3253_p4), [#allocation7], 272   ;;  %p3254_p10 = pmov %p3253_p4 }
 0x169   : > { %p3255_p11 = pmov %p3253_p4 }
 0x16a   : > { %2506 = vsyncadd (%p3254_p10), [#allocation7], 4294967024 }
 0x16b   : > { %2508 = dma.done.wait (%p3255_p11), [#allocation10], 272   ;;  %p3256_p8 = pmov %p3253_p4 }
 0x16c   : > { %p3257_p5 = pmov %p3253_p4 }
 0x16d   : > { %2510 = vsyncadd (%p3256_p8), [#allocation10], 4294967024 }
 0x16e   : > { %2512 = dma.done.wait (%p3257_p5), [#allocation13], 32   ;;  %p3258_p7 = pmov %p3253_p4 }
 0x16f   : > { %p3259_p6 = pmov %p3253_p4 }
 0x170   : > { %2514 = vsyncadd (%p3258_p7), [#allocation13], 4294967264 }
 0x171   : > { %2516 = dma.done.wait (%p3259_p6), [#allocation16], 272   ;;  %p3260_p9 = pmov %p3253_p4 }
 0x172   : > { %p3261_p12 = pmov %p3253_p4 }
 0x173   : > { %2518 = vsyncadd (%p3260_p9), [#allocation16], 4294967024 }
 0x174   : > { %2520 = dma.done.wait (%p3261_p12), [#allocation19], 1040   ;;  %p3262_p1 = pmov %p3253_p4 }
 0x176   : > { %2522 = vsyncadd (%p3262_p1), [#allocation19], 4294966256  ;;  %p3263_p13 = pmov %p3262_p1 }
 0x177   : > { %p3264_p0 = pmov %p3262_p1 }
 0x178   : > { %2524 = dma.done.wait (%p3263_p13), [#allocation22], 32  }
 0x179   : > { %2526 = vsyncadd (%p3264_p0), [#allocation22], 4294967264  ;;  %v2562_v0 = vmov 0.0   ;;  %vm2563_vm0 = vmmov 0   ;;  %v2053_v1 = vld [vmem:[#allocation6] sm:$0xff]   ;;  %v2054_v2 = vld [vmem:[#allocation6 + $0x8] sm:$0xff]  }
 0x17a   : > { %1776 = vmatprep.subr.bf16.mxu0 %v2562_v0  ;;  %1780 = vmatprep.mubr.msk.bf16.mxu0 %vm2563_vm0, %v2562_v0  ;;  %v3062_v3 = vld [vmem:[%s523_s22] sm:$0xff]  ;;  %vm640_vm1 = vcmask 261120   ;;  %s2564_s20 = smov 120   ;;  %s2565_s1 = smov 96   ;;  %vm688_vm2 = vcmask 64512   ;;  %vm752_vm3 = vcmask 1043456  }
 0x17b   : > { %1796 = vmatprep.subr.bf16.mxu1 %v2562_v0  ;;  %1798 = vmatprep.mubr.msk.bf16.mxu1 %vm2563_vm0, %v2562_v0  ;;  %v616_v4 = vpack.c.bf16 %v3062_v3, %v3062_v3  ;;  %v1699_v5 = vld [vmem:[#allocation8] ss:$0 sm:$0xff]  ;;  %s2566_s25 = smov 80   ;;  %s2567_s19 = smov 88   ;;  %vm797_vm4 = vcmask 60416   ;;  %vm916_vm5 = vcmask 126016  }
 0x17c   : > { %1777 = vmatpush3.bf16.msra.mxu0 %v2053_v1  ;;  %s2568_s0 = smov 72   ;;  %s2569_s21 = smov 112   ;;  %vm1035_vm6 = vcmask 191616   ;;  %vm1154_vm7 = vcmask 257216  }
 0x17d   : > { %1778 = vmatprep.subr.bf16.mxu0 %v2562_v0  ;;  %s2570_s24 = smov 104   ;;  %s2571_s2 = smov 56  }
 0x17e   : > { %s2572_s30 = smov 64   ;;  %s2573_s22 = smov 40  }
 0x17f   : > { %p3266_p3 = scmp.ne.s32.totalorder %s3246_s14, 0 }
 0x180   : > { %1779 = vmatpush3.bf16.msra.mxu0 %v2054_v2 }
 0x181   : > { %1784 = vmatprep.subr.bf16.mxu0 %v2562_v0 }
 0x183   : > { %1781 = vmatmul.mubr.msk.bf16.vlgmr.msra.gmra.mrb[0].mxu0 %vm640_vm1, %v616_v4 }
 0x184   : > { %1786 = vmatprep.mubr.msk.bf16.mxu0 %vm2563_vm0, %v2562_v0 }
 0x256   : > { %v678_v6 = vpop.f32.mrb[0].mxu0 }
 0x257   : > { %v679_v7 = vadd.f32 %v1699_v5, %v678_v6  ;;  %v1782_v8 = vpop.f32.mrb[1].mxu0 }
 0x258   : > { %v681_v9 = vpop.f32.mrb[2].mxu0 }
 0x259   : > { %v3071_v10 = vpack.c.bf16 %v679_v7, %v679_v7  ;;  %v1783_v11 = vpop.f32.mrb[3].mxu0 }
 0x25b   : > { %799 = vrot.lane.b32.xlu1 %v3071_v10, %s2564_s20  ;;  %686 = vrot.lane.b32.xlu0 %v3071_v10, %s2565_s1  ;;  %s2574_s20 = smov 48   ;;  %s2575_s1 = smov 8  }
 0x25f   : > { %920 = vrot.lane.b32.xlu1 %v3071_v10, %s2566_s25  ;;  %801 = vrot.lane.b32.xlu0 %v3071_v10, %s2567_s19  ;;  %s2576_s25 = smov 16   ;;  %s2577_s19 = smov 24  }
 0x263   : > { %1039 = vrot.lane.b32.xlu1 %v3071_v10, %s2568_s0  ;;  %918 = vrot.lane.b32.xlu0 %v3071_v10, %s2569_s21  ;;  %s1736_s0 = sshll.u32 %s3252_s16, 7  ;;  %s613_s21 = scalar_lea.vmem [#allocation24], %s1685_s13 }
 0x264   : > { %s2578_s13 = smov [#allocation24]  }
 0x265   : > { %s2459_s16 = sshll.u32 %s2578_s13, 4  ;;  %s2460_s16 = int_to_ptr.vmem [resolvable:$false] %s2459_s16 }
 0x267   : > { %1037 = vrot.lane.b32.xlu0 %v3071_v10, %s2570_s24  ;;  %s1483_s24 = sshll.u32 %s613_s21, 4  ;;  %s3160_s24 = int_to_ptr.vmem [resolvable:$true] %s1483_s24 }
 0x268   : > { %p2462_p11 = scmp.lt.s32.totalorder %s3160_s24, %s2460_s16 }
 0x2cd   : > { %v687_v12 = vpop.permute.xlu0 %686  ;;  %v800_v14 = vpop.permute.xlu1 %799 }
 0x2ce   : > { %v693_v13 = vsel %vm688_vm2, %v687_v12, 0 }
 0x2cf   : > { %1785 = vmatpush3.bf16.xpose.msra.mxu0 %v693_v13 }
 0x2d0   : > { %1790 = vmatprep.subr.bf16.mxu0 %v2562_v0 }
 0x2d1   : > { %v802_v15 = vpop.permute.xlu0 %801  ;;  %v921_v17 = vpop.permute.xlu1 %920 }
 0x2d2   : > { %v807_v16 = vsel %vm688_vm2, %v802_v15, 0  ;;  %v926_v18 = vsel %vm688_vm2, %v921_v17, 0 }
 0x2d3   : > { %1797 = vmatpush3.bf16.xpose.msra.mxu1 %v807_v16 }
 0x2d4   : > { %1808 = vmatprep.subr.bf16.mxu1 %v2562_v0 }
 0x2d5   : > { %v1040_v19 = vpop.permute.xlu1 %1039  ;;  %v919_v20 = vpop.permute.xlu0 %918 }
 0x2d6   : > { %1787 = vmatmul.mubr.msk.bf16.vlgmr.msra.gmra.mrb[4].mxu0 %vm688_vm2, %v3071_v10  ;;  %v1045_v21 = vsel %vm688_vm2, %v1040_v19, 0 }
 0x2d7   : > { %1792 = vmatprep.mubr.msk.bf16.mxu0 %vm2563_vm0, %v2562_v0 }
 0x2d9   : > { %v1038_v22 = vpop.permute.xlu0 %1037 }
 0x2da   : > { %1799 = vmatmul.mubr.msk.bf16.vlgmr.msra.gmra.mrb[0].mxu1 %vm688_vm2, %v800_v14 }
 0x2db   : > { %1809 = vmatpush3.bf16.xpose.msra.mxu1 %v926_v18  ;;  %1810 = vmatprep.mubr.msk.bf16.mxu1 %vm2563_vm0, %v2562_v0 }
 0x2dc   : > { %1820 = vmatprep.subr.bf16.mxu1 %v2562_v0 }
 0x2e2   : > { %1811 = vmatmul.mubr.msk.bf16.vlgmr.msra.gmra.mrb[4].mxu1 %vm688_vm2, %v919_v20 }
 0x2e3   : > { %1821 = vmatpush3.bf16.xpose.msra.mxu1 %v1045_v21  ;;  %1822 = vmatprep.mubr.msk.bf16.mxu1 %vm2563_vm0, %v2562_v0 }
 0x2e4   : > { %1832 = vmatprep.subr.bf16.mxu1 %v2562_v0 }
 0x2ea   : > { %1823 = vmatmul.mubr.msk.bf16.vlgmr.msra.gmra.mrb[8].mxu1 %vm688_vm2, %v1038_v22 }
 0x2eb   : > { %1836 = vmatprep.mubr.msk.bf16.mxu1 %vm2563_vm0, %v2562_v0 }
 0x3a9   : > { %v729_v23 = vpop.f32.mrb[4].mxu0 }
 0x3aa   : > { %v1788_v24 = vpop.f32.mrb[5].mxu0  ;;  %v735_v25 = vsel %vm688_vm2, %v729_v23, -inf }
 0x3ab   : > { %736 = vmax.xlane.f32.xlu1 %v735_v25  ;;  %v732_v26 = vpop.f32.mrb[6].mxu0 }
 0x3ac   : > { %v1789_v27 = vpop.f32.mrb[7].mxu0 }
 0x3ad   : > { %v843_v28 = vpop.f32.mrb[0].mxu1 }
 0x3ae   : > { %v1800_v29 = vpop.f32.mrb[1].mxu1  ;;  %v849_v30 = vsel %vm688_vm2, %v843_v28, -inf }
 0x3af   : > { %850 = vmax.xlane.f32.xlu0 %v849_v30  ;;  %v846_v31 = vpop.f32.mrb[2].mxu1 }
 0x3b0   : > { %v1801_v32 = vpop.f32.mrb[3].mxu1 }
 0x3b5   : > { %v962_v33 = vpop.f32.mrb[4].mxu1 }
 0x3b6   : > { %v1812_v34 = vpop.f32.mrb[5].mxu1  ;;  %v968_v35 = vsel %vm688_vm2, %v962_v33, -inf }
 0x3b7   : > { %969 = vmax.xlane.f32.xlu0 %v968_v35  ;;  %v965_v36 = vpop.f32.mrb[6].mxu1  ;;  %v2055_v35 = vld [vmem:[#allocation9] sm:$0xff]  }
 0x3b8   : > { %v1813_v37 = vpop.f32.mrb[7].mxu1  ;;  %1833 = vmatpush3.bf16.msra.mxu1 %v2055_v35  ;;  %v2056_v36 = vld [vmem:[#allocation9 + $0x8] sm:$0xff]  }
 0x3b9   : > { %1834 = vmatprep.subr.bf16.mxu1 %v2562_v0 }
 0x3bc   : > { %1835 = vmatpush3.bf16.msra.mxu1 %v2056_v36 }
 0x3bd   : > { %v1081_v38 = vpop.f32.mrb[8].mxu1  ;;  %1848 = vmatprep.subr.bf16.mxu1 %v2562_v0 }
 0x3be   : > { %v1824_v39 = vpop.f32.mrb[9].mxu1  ;;  %v1087_v40 = vsel %vm688_vm2, %v1081_v38, -inf }
 0x3bf   : > { %v1084_v41 = vpop.f32.mrb[10].mxu1  ;;  %1088 = vmax.xlane.f32.xlu1 %v1087_v40 }
 0x3c0   : > { %v1825_v42 = vpop.f32.mrb[11].mxu1 }
 0x438   : > { %v737_v43 = vpop.xlane.xlu1 %736 }
 0x439   : > { %v738_v44 = vsub.f32 %v729_v23, %v737_v43 }
 0x43b   : > { %v739_v45 = vmul.f32 1.442695, %v738_v44 }
 0x43c   : > { %v851_v46 = vpop.xlane.xlu0 %850 }
 0x43d   : > { %2067 = vpow2.f32 %v739_v45  ;;  %v852_v47 = vsub.f32 %v843_v28, %v851_v46 }
 0x43f   : > { %v853_v48 = vmul.f32 1.442695, %v852_v47 }
 0x441   : > { %2069 = vpow2.f32 %v853_v48 }
 0x444   : > { %v970_v49 = vpop.xlane.xlu0 %969 }
 0x445   : > { %v971_v50 = vsub.f32 %v962_v33, %v970_v49 }
 0x447   : > { %v2068_v51 = vpop.eup %2067  ;;  %v972_v52 = vmul.f32 1.442695, %v971_v50 }
 0x448   : > { %v741_v53 = vsel %vm688_vm2, %v2068_v51, 0.0 }
 0x449   : > { %2071 = vpow2.f32 %v972_v52  ;;  %742 = vadd.xlane.f32.xlu0 %v741_v53 }
 0x44b   : > { %v2070_v54 = vpop.eup %2069 }
 0x44c   : > { %v855_v55 = vsel %vm688_vm2, %v2070_v54, 0.0  ;;  %v1089_v58 = vpop.xlane.xlu1 %1088 }
 0x44d   : > { %856 = vadd.xlane.f32.xlu1 %v855_v55  ;;  %v1090_v59 = vsub.f32 %v1081_v38, %v1089_v58 }
 0x44f   : > { %v1091_v60 = vmul.f32 1.442695, %v1090_v59 }
 0x451   : > { %2073 = vpow2.f32 %v1091_v60 }
 0x453   : > { %v2072_v56 = vpop.eup %2071 }
 0x454   : > { %v974_v57 = vsel %vm688_vm2, %v2072_v56, 0.0 }
 0x455   : > { %975 = vadd.xlane.f32.xlu0 %v974_v57 }
 0x45b   : > { %v2074_v61 = vpop.eup %2073 }
 0x45c   : > { %v1093_v62 = vsel %vm688_vm2, %v2074_v61, 0.0 }
 0x45e   : > { %861 = vrot.lane.b32.xlu1 %v3071_v10, %s2571_s2 }
 0x46b   : > { %747 = vrot.lane.b32.xlu0 %v3071_v10, %s2572_s30 }
 0x46f   : > { %1099 = vrot.lane.b32.xlu0 %v3071_v10, %s2573_s22  ;;  %s3265_s22 = sld [smem:[#allocation39_spill]] }
 0x482   : > { %1094 = vadd.xlane.f32.xlu1 %v1093_v62 }
 0x493   : > { %980 = vrot.lane.b32.xlu1 %v3071_v10, %s2574_s20  ;;  %s3158_s20 = scalar_lea.hbm %s3265_s22, %s1736_s0 }
 0x4d6   : > { %v743_v63 = vpop.xlane.xlu0 %742 }
 0x4d7   : > { %2075 = vrcp.f32 %v743_v63 }
 0x4da   : > { %v857_v1 = vpop.xlane.xlu1 %856 }
 0x4db   : > { %2077 = vrcp.f32 %v857_v1  ;;  %v2057_v1 = vld [vmem:[#allocation15] sm:$0xff]  }
 0x4de   : > { %v862_v8 = vpop.permute.xlu1 %861 }
 0x4df   : > { %v867_v12 = vsel %vm752_vm3, %v862_v8, 0 }
 0x4e1   : > { %v2076_v2 = vpop.eup %2075 }
 0x4e2   : > { %v976_v4 = vpop.xlane.xlu0 %975  ;;  %v745_v5 = vmul.f32 %v2076_v2, %v2068_v51  ;;  %v1714_v51 = vld [vmem:[#allocation11] ss:$0 sm:$0xff]  ;;  %v2058_v2 = vld [vmem:[#allocation15 + $0x8] sm:$0xff]  }
 0x4e3   : > { %2079 = vrcp.f32 %v976_v4  ;;  %v2059_v4 = vld [vmem:[#allocation18] sm:$0xff]  }
 0x4e4   : > { %v746_v9 = vpack.c.bf16 %v745_v5, %v745_v5  ;;  %v2060_v5 = vld [vmem:[#allocation18 + $0x8] sm:$0xff]  }
 0x4e5   : > { %v2078_v11 = vpop.eup %2077 }
 0x4e6   : > { %v748_v6 = vpop.permute.xlu0 %747  ;;  %v859_v10 = vmul.f32 %v2078_v11, %v2070_v54  ;;  %v1718_v11 = vld [vmem:[#allocation12] ss:$0 sm:$0xff] }
 0x4e7   : > { %v754_v7 = vsel %vm752_vm3, %v748_v6, 0 }
 0x4e8   : > { %1791 = vmatpush3.bf16.msra.mxu0 %v754_v7  ;;  %v860_v13 = vpack.c.bf16 %v859_v10, %v859_v10  ;;  %v1719_v10 = vld [vmem:[#allocation14] ss:$0 sm:$0xff] }
 0x4e9   : > { %1802 = vmatprep.subr.bf16.mxu0 %v2562_v0 }
 0x4ea   : > { %v1100_v19 = vpop.permute.xlu0 %1099 }
 0x4eb   : > { %1793 = vmatmul.mubr.msk.bf16.vlgmr.msra.gmra.mrb[8].mxu0 %vm688_vm2, %v746_v9  ;;  %v1105_v21 = vsel %vm752_vm3, %v1100_v19, 0  ;;  %v2065_v19 = vld [vmem:[#allocation18 + $0x30] sm:$0xff]  }
 0x4ec   : > { %1803 = vmatpush3.bf16.msra.mxu0 %v867_v12  ;;  %1804 = vmatprep.mubr.msk.bf16.mxu0 %vm2563_vm0, %v2562_v0 }
 0x4ed   : > { %1814 = vmatprep.subr.bf16.mxu0 %v2562_v0  ;;  %v2080_v14 = vpop.eup %2079 }
 0x4ee   : > { %v978_v16 = vmul.f32 %v2080_v14, %v2072_v56 }
 0x4f0   : > { %v979_v20 = vpack.c.bf16 %v978_v16, %v978_v16  ;;  %v2062_v16 = vld [vmem:[#allocation18 + $0x18] sm:$0xff]  }
 0x4f3   : > { %1805 = vmatmul.mubr.msk.bf16.vlgmr.msra.gmra.mrb[12].mxu0 %vm688_vm2, %v860_v13 }
 0x4f4   : > { %1816 = vmatprep.mubr.msk.bf16.mxu0 %vm2563_vm0, %v2562_v0 }
 0x50f   : > { %v1095_v15 = vpop.xlane.xlu1 %1094 }
 0x510   : > { %2081 = vrcp.f32 %v1095_v15 }
 0x513   : > { %v981_v17 = vpop.permute.xlu1 %980 }
 0x514   : > { %v986_v18 = vsel %vm752_vm3, %v981_v17, 0  ;;  %v2063_v17 = vld [vmem:[#allocation18 + $0x20] sm:$0xff]  }
 0x515   : > { %1815 = vmatpush3.bf16.msra.mxu0 %v986_v18  ;;  %v2064_v18 = vld [vmem:[#allocation18 + $0x28] sm:$0xff]  }
 0x516   : > { %1826 = vmatprep.subr.bf16.mxu0 %v2562_v0 }
 0x518   : > { %1817 = vmatmul.mubr.msk.bf16.vlgmr.msra.gmra.mrb[16].mxu0 %vm688_vm2, %v979_v20  ;;  %v2066_v20 = vld [vmem:[#allocation18 + $0x38] sm:$0xff]  }
 0x519   : > { %1827 = vmatpush3.bf16.msra.mxu0 %v1105_v21  ;;  %1828 = vmatprep.mubr.msk.bf16.mxu0 %vm2563_vm0, %v2562_v0  ;;  %v1720_v21 = vld [vmem:[#allocation17] ss:$0 sm:$0xff] }
 0x51a   : > { %v2082_v22 = vpop.eup %2081  ;;  %1840 = vmatprep.subr.bf16.mxu0 %v2562_v0 }
 0x51b   : > { %v1097_v23 = vmul.f32 %v2082_v22, %v2074_v61 }
 0x51d   : > { %v1098_v24 = vpack.c.bf16 %v1097_v23, %v1097_v23 }
 0x520   : > { %1829 = vmatmul.mubr.msk.bf16.vlgmr.msra.gmra.mrb[20].mxu0 %vm688_vm2, %v1098_v24 }
 0x521   : > { %1844 = vmatprep.mubr.msk.bf16.mxu0 %vm2563_vm0, %v2562_v0  ;;  %1841 = vmatpush3.bf16.msra.mxu0 %v2057_v1 }
 0x522   : > { %1842 = vmatprep.subr.bf16.mxu0 %v2562_v0 }
 0x525   : > { %1843 = vmatpush3.bf16.msra.mxu0 %v2058_v2 }
 0x5be   : > { %v790_v25 = vpop.f32.mrb[8].mxu0 }
 0x5bf   : > { %v796_v26 = vpack.c.bf16 %v790_v25, %v790_v25  ;;  %v1794_v27 = vpop.f32.mrb[9].mxu0 }
 0x5c0   : > { %v793_v28 = vpop.f32.mrb[10].mxu0 }
 0x5c1   : > { %798 = vst.msk [vmem:[#allocation2] sm:$0xf] %vm797_vm4, %v796_v26  ;;  %v1795_v29 = vpop.f32.mrb[11].mxu0 }
 0x5c6   : > { %v903_v30 = vpop.f32.mrb[12].mxu0 }
 0x5c7   : > { %v1739_v31 = vpack.c.bf16 %v903_v30, %v903_v30  ;;  %v1806_v32 = vpop.f32.mrb[13].mxu0 }
 0x5c8   : > { %v906_v33 = vpop.f32.mrb[14].mxu0 }
 0x5c9   : > { %913 = vrot.lane.b32.xlu1 %v1739_v31, %s2575_s1  ;;  %v1807_v34 = vpop.f32.mrb[15].mxu0  ;;  %v1724_v33 = vld [vmem:[#allocation20] ss:$0 sm:$0xff]  ;;  %s1470_s1 = scalar_lea.sflag [#allocation5], %s3022_s17 }
 0x5eb   : > { %v1022_v37 = vpop.f32.mrb[16].mxu0 }
 0x5ec   : > { %v1740_v38 = vpack.c.bf16 %v1022_v37, %v1022_v37  ;;  %v1818_v39 = vpop.f32.mrb[17].mxu0 }
 0x5ed   : > { %v1025_v40 = vpop.f32.mrb[18].mxu0 }
 0x5ee   : > { %1032 = vrot.lane.b32.xlu0 %v1740_v38, %s2576_s25  ;;  %v1819_v41 = vpop.f32.mrb[19].mxu0  ;;  %s2455_s25 = scalar_lea.vmem %s3160_s24, 128 }
 0x5ef   : > { %p2456_p2 = scmp.ne.s32.totalorder %s3160_s24, %s2455_s25 }
 0x5f1   : > { %p2457_p4 = pnand %p2456_p2, %p3266_p3 }
 0x5f3   : > { %v1141_v42 = vpop.f32.mrb[20].mxu0  ;;  %p2458_p10 = pneg %p2457_p4 }
 0x5f4   : > { %v1741_v43 = vpack.c.bf16 %v1141_v42, %v1141_v42  ;;  %v1830_v44 = vpop.f32.mrb[21].mxu0 }
 0x5f5   : > { %v1144_v45 = vpop.f32.mrb[22].mxu0 }
 0x5f6   : > { %1151 = vrot.lane.b32.xlu1 %v1741_v43, %s2577_s19  ;;  %v1831_v46 = vpop.f32.mrb[23].mxu0  ;;  %s2461_s19 = scalar_lea.vmem %s2460_s16, 256 }
 0x5f7   : > { %p2463_p8 = scmp.lt.s32.totalorder %s2461_s19, %s2455_s25 }
 0x5f9   : > { %p2464_p5 = por %p2463_p8, %p2462_p11 }
 0x5fb   : > { %p2465_p7 = pnand %p2464_p5, %p2458_p10 }
 0x63b   : > { %v914_v47 = vpop.permute.xlu1 %913 }
 0x63c   : > { %917 = vst.msk [vmem:[#allocation2] sm:$0xf] %vm916_vm5, %v914_v47 }
 0x660   : > { %v1033_v48 = vpop.permute.xlu0 %1032 }
 0x661   : > { %1036 = vst.msk [vmem:[#allocation2] sm:$0xf] %vm1035_vm6, %v1033_v48 }
 0x668   : > { %v1152_v49 = vpop.permute.xlu1 %1151 }
 0x669   : > { %1155 = vst.msk [vmem:[#allocation2] sm:$0xf] %vm1154_vm7, %v1152_v49  ;;  %v1733_v49 = vld [vmem:[#allocation21] ss:$0 sm:$0xff] }
 0x670   : > { %v1156_v50 = vld [vmem:[#allocation2] sm:$0xf] }
 0x671   : > { %1837 = vmatmul.mubr.msk.bf16.vlgmr.msra.gmra.mrb[12].mxu1 %vm640_vm1, %v1156_v50 }
 0x672   : > { %1864 = vmatprep.mubr.msk.bf16.mxu1 %vm2563_vm0, %v2562_v0  ;;  %1849 = vmatpush3.bf16.msra.mxu1 %v2059_v4 }
 0x673   : > { %1850 = vmatprep.subr.bf16.mxu1 %v2562_v0 }
 0x676   : > { %1851 = vmatpush3.bf16.msra.mxu1 %v2060_v5 }
 0x677   : > { %1852 = vmatprep.subr.bf16.mxu1 %v2562_v0 }
 0x744   : > { %v1217_v52 = vpop.f32.mrb[12].mxu1 }
 0x745   : > { %v1218_v53 = vadd.f32 %v1714_v51, %v1217_v52  ;;  %v1838_v54 = vpop.f32.mrb[13].mxu1  ;;  %v1734_v51 = vld [vmem:[#allocation23] ss:$0 sm:$0xff] }
 0x746   : > { %v1220_v55 = vpop.f32.mrb[14].mxu1 }
 0x747   : > { %v1839_v56 = vpop.f32.mrb[15].mxu1  ;;  %v1223_v57 = vadd.f32 %v1218_v53, %v3062_v3  ;;  %v2061_v3 = vld [vmem:[#allocation18 + $0x10] sm:$0xff]  }
 0x748   : > { %1853 = vmatpush3.bf16.msra.mxu1 %v2061_v3 }
 0x749   : > { %v1226_v58 = vsel %vm640_vm1, %v1223_v57, 0.0  ;;  %1854 = vmatprep.subr.bf16.mxu1 %v2562_v0 }
 0x74a   : > { %1227 = vadd.xlane.f32.xlu0 %v1226_v58 }
 0x74c   : > { %1855 = vmatpush3.bf16.msra.mxu1 %v2062_v16 }
 0x74d   : > { %1856 = vmatprep.subr.bf16.mxu1 %v2562_v0 }
 0x750   : > { %1857 = vmatpush3.bf16.msra.mxu1 %v2063_v17 }
 0x751   : > { %1858 = vmatprep.subr.bf16.mxu1 %v2562_v0 }
 0x754   : > { %1859 = vmatpush3.bf16.msra.mxu1 %v2064_v18 }
 0x755   : > { %1860 = vmatprep.subr.bf16.mxu1 %v2562_v0 }
 0x758   : > { %1861 = vmatpush3.bf16.msra.mxu1 %v2065_v19 }
 0x759   : > { %1862 = vmatprep.subr.bf16.mxu1 %v2562_v0 }
 0x75c   : > { %1863 = vmatpush3.bf16.msra.mxu1 %v2066_v20 }
 0x7d7   : > { %v1228_v59 = vpop.xlane.xlu0 %1227 }
 0x7d8   : > { %v1230_v60 = vmul.f32 0.03125, %v1228_v59 }
 0x7da   : > { %v1231_v61 = vsub.f32 %v1223_v57, %v1230_v60 }
 0x7dc   : > { %v1232_v62 = vmul.f32 %v1231_v61, %v1231_v61 }
 0x7de   : > { %v1233_v63 = vsel %vm640_vm1, %v1232_v62, 0.0 }
 0x7df   : > { %1234 = vadd.xlane.f32.xlu1 %v1233_v63 }
 0x86c   : > { %v1235_v6 = vpop.xlane.xlu1 %1234 }
 0x86d   : > { %v1236_v7 = vmul.f32 0.03125, %v1235_v6 }
 0x86f   : > { %v1237_v8 = vadd.f32 1e-05, %v1236_v7 }
 0x871   : > { %2083 = vrsqrt.f32 %v1237_v8 }
 0x87b   : > { %v2084_v9 = vpop.eup %2083 }
 0x87c   : > { %v1239_v12 = vmul.f32 %v2084_v9, %v1231_v61 }
 0x87e   : > { %v1246_v13 = vmul.f32 %v1718_v11, %v1239_v12 }
 0x880   : > { %v1253_v14 = vadd.f32 %v1719_v10, %v1246_v13 }
 0x882   : > { %v1254_v15 = vpack.c.bf16 %v1253_v14, %v1253_v14 }
 0x884   : > { %1845 = vmatmul.mubr.msk.bf16.vlgmr.msra.gmra.mrb[24].mxu0 %vm640_vm1, %v1254_v15 }
 0x957   : > { %v1315_v22 = vpop.f32.mrb[24].mxu0 }
 0x958   : > { %v1316_v23 = vadd.f32 %v1720_v21, %v1315_v22  ;;  %v1846_v24 = vpop.f32.mrb[25].mxu0 }
 0x959   : > { %v1318_v25 = vpop.f32.mrb[26].mxu0 }
 0x95a   : > { %v1322_v26 = vmul.f32 0.70710677, %v1316_v23  ;;  %v1847_v27 = vpop.f32.mrb[27].mxu0  ;;  %v1321_v29 = vmul.f32 0.5, %v1316_v23 }
 0x95c   : > { %2085 = verf.f32 %v1322_v26 }
 0x966   : > { %v2086_v28 = vpop.eup %2085 }
 0x967   : > { %v1324_v30 = vadd.f32 1.0, %v2086_v28 }
 0x969   : > { %v1325_v31 = vmul.f32 %v1324_v30, %v1321_v29 }
 0x96b   : > { %v1326_v32 = vpack.c.bf16 %v1325_v31, %v1325_v31 }
 0x96d   : > { %1865 = vmatmul.mubr.bf16.vlgmr.msra.gmra.mrb[16].mxu1 %v1326_v32 }
 0xa40   : > { %v1432_v34 = vpop.f32.mrb[16].mxu1 }
 0xa41   : > { %v1433_v35 = vadd.f32 %v1724_v33, %v1432_v34  ;;  %v1866_v0 = vpop.f32.mrb[17].mxu1 }
 0xa42   : > { %v1435_v36 = vpop.f32.mrb[18].mxu1 }
 0xa43   : > { %v1867_v37 = vpop.f32.mrb[19].mxu1  ;;  %v1438_v38 = vadd.f32 %v1433_v35, %v1253_v14 }
 0xa45   : > { %v1441_v39 = vsel %vm640_vm1, %v1438_v38, 0.0 }
 0xa46   : > { %1442 = vadd.xlane.f32.xlu0 %v1441_v39 }
 0xad3   : > { %v1443_v40 = vpop.xlane.xlu0 %1442 }
 0xad4   : > { %v1444_v41 = vmul.f32 0.03125, %v1443_v40 }
 0xad6   : > { %v1445_v42 = vsub.f32 %v1438_v38, %v1444_v41 }
 0xad8   : > { %v1446_v43 = vmul.f32 %v1445_v42, %v1445_v42 }
 0xada   : > { %v1447_v44 = vsel %vm640_vm1, %v1446_v43, 0.0 }
 0xadb   : > { %1448 = vadd.xlane.f32.xlu0 %v1447_v44 }
 0xb68   : > { %v1449_v45 = vpop.xlane.xlu0 %1448 }
 0xb69   : > { %v1450_v46 = vmul.f32 0.03125, %v1449_v45 }
 0xb6b   : > { %v1451_v47 = vadd.f32 1e-05, %v1450_v46 }
 0xb6d   : > { %2087 = vrsqrt.f32 %v1451_v47 }
 0xb77   : > { %v2088_v48 = vpop.eup %2087 }
 0xb78   : > { %v1453_v50 = vmul.f32 %v2088_v48, %v1445_v42 }
 0xb7a   : > { %v1460_v52 = vmul.f32 %v1733_v49, %v1453_v50 }
 0xb7c   : > { %v1467_v53 = vadd.f32 %v1734_v51, %v1460_v52 }
 0xb7e   : > { %1468 = vst.msk [vmem:[%s613_s21] sm:$0xff] %vm640_vm1, %v1467_v53 }
 0xb7f   : > { %2468 = shalt.err (!%p2465_p7)
}
 0xb80   : > { %s2469_s17 = scalar_lea.hbm %s3158_s20, 128  ;;  %s2473_s2 = scalar_lea.hbm %s3265_s22, 256 }
 0xb81   : > { %p2470_p6 = scmp.ne.s32.totalorder %s3158_s20, %s2469_s17  ;;  %p2474_p1 = scmp.lt.u32.totalorder %s3158_s20, %s3265_s22 }
 0xb82   : > { %p2475_p13 = scmp.lt.u32.totalorder %s2473_s2, %s2469_s17  ;;  %p2477_p2 = scmp.lt.u32.totalorder %s2469_s17, %s3158_s20 }
 0xb83   : > { %p2471_p9 = pnand %p2470_p6, %p3266_p3 }
 0xb84   : > { %p2476_p0 = por %p2475_p13, %p2474_p1 }
 0xb85   : > { %p2472_p12 = pneg %p2471_p9 }
 0xb86   : > { %p2478_p4 = por %p2477_p2, %p2476_p0 }
 0xb88   : > { %p2479_p10 = pnand %p2478_p4, %p2472_p12 }
 0xb8a   : > { %2482 = shalt.err (!%p2479_p10)
}
 0xb8b   : > { %1918 = dma.vmem_to_hbm [thread:$0]  (%p3266_p3), %s3160_s24, 128, %s3158_s20, %s1470_s1  }
 0xb8c PF: > { %s3267_s25 = sld [smem:[#allocation33_spill]]  ;;  %p3268_p11 = scmp.ne.s32.totalorder %s3247_s29, 0 }
 0xb8d   : > { %p3269_p8 = scmp.ge.s32.totalorder %s2545_s28, 2 }
 0xb8f   : > { %p1962_p5 = pnand %p3269_p8, %p3268_p11 }
 0xb92   : > { %s1495_s16 = sand.u32 1, %s3267_s25  }
 0xb93   : > { %s1496_s19 = scalar_lea.sflag [#allocation5], %s1495_s16 }
 0xb94   : > { %2528 = dma.done.wait (!%p1962_p5), %s1496_s19, 128  }
 0xb95   : > { %2530 = vsyncadd (!%p1962_p5), %s1496_s19, 4294967168  ;;  %p32_p7 = scmp.ge.s32.totalorder %s2946_s18, 4   ;;  %s3270_s25 = smov %s2537_s26 }
 0xb96   : > { %s3271_s26 = smov %s2541_s27  ;;  %s3272_s27 = smov %s2957_s23 }
 0xb97   : > { %s3273_s28 = smov %s2946_s18  ;;  %34 = sbr.rel (!%p32_p7) target bundleno = 16 (0x10), region = 165 }
 0xb9e   :  { %1501 = vsyncpa [#allocation4], 1 }
 0xb9f   :  { %1503 = vsyncpa [#allocation4 + $0x1], 1 }
 0xba0   :  { %1504 = vsyncpa [#allocation7], 1 }
 0xba1   :  { %1505 = vsyncpa [#allocation10], 1 }
 0xba2   :  { %1506 = vsyncpa [#allocation13], 1 }
 0xba3   :  { %1507 = vsyncpa [#allocation16], 1 }
 0xba4   :  { %1508 = vsyncpa [#allocation19], 1 }
 0xba5   :  { %1509 = vsyncpa [#allocation22], 1 }
 0xba6   :  { %1510 = vsyncpa [#allocation5], 1 }
 0xba7   :  { %1512 = vsyncpa [#allocation5 + $0x1], 1 }

</bundles_post_ra>
